<compile_context>
chip_gen: v6e
topology: v6e:2x2x1
jax: 0.10.0
libtpu: 0.0.40
codegen_flags: <defaults>
</compile_context>

<pallas_src>
import functools

import jax
import jax.numpy as jnp
from jax import lax
from jax.experimental import pallas as pl
from jax.experimental.pallas import tpu as pltpu

BN_EPS = 1e-5


@functools.lru_cache(maxsize=None)
def _vmem_limit_bytes():
    """~75% of physical VMEM: 96 MiB on v5e/v6e (128 MiB), 48 MiB on v7x (64 MiB)."""
    try:
        cap = int(getattr(pltpu.get_tpu_info(), "vmem_capacity_bytes", 64 * 1024 * 1024))
    except Exception:
        cap = 64 * 1024 * 1024
    return int(min(cap * 3 // 4, 112 * 1024 * 1024))


# ------------- fused [maxpool | prev-BN+ReLU] -> im2col -> conv3x3 -> batch stats -------------
def _make_conv_kernel(Ho, Wo, Cin, Cout, fuse_pool, fuse_bnrelu):
    """Conv3x3 (padding=1, no bias) via a single im2col matmul, with fused input transforms.

    fuse_pool   : input block is (1, 2Ho, Wo, 2Cin) bf16 (W-pool pairs pre-placed on lanes
                  by a free wrapper reshape); 2x2 max-pool is applied in-kernel.
    fuse_bnrelu : input block is (1, Ho, Wo, Cin) bf16; the previous layer's folded BN
                  scale/shift + ReLU is applied in-kernel.
    Outputs: pre-BN conv result y (bf16) and per-image channel sum / sum-of-squares (f32).
    """
    HW = Ho * Wo

    def body(x_ref, w_ref, scale_ref, shift_ref, y_ref, sum_ref, sq_ref, xp_ref, col_ref):
        # ---- input prologue: produce the (Ho, Wo, Cin) bf16 conv input -----------------
        if fuse_pool:
            xr = x_ref[0]                                          # (2Ho, Wo, 2Cin) bf16
            xw = jnp.maximum(xr[:, :, :Cin], xr[:, :, Cin:2 * Cin])   # W-pool (lane pairs)
            x = jnp.max(xw.reshape(Ho, 2, Wo, Cin), axis=1)        # H-pool (leading split)
        else:
            x = x_ref[0]                                           # (Ho, Wo, Cin) bf16
        if fuse_bnrelu:
            # previous layer's BatchNorm folded to per-channel scale/shift, then ReLU;
            # computed in f32 and written straight back to the bf16 im2col path.
            xf = x.astype(jnp.float32)
            x = jnp.maximum(xf * scale_ref[...] + shift_ref[...], 0.0).astype(jnp.bfloat16)

        # ---- zero-pad halo: border only (interior is fully overwritten every step) -----
        zrow = jnp.zeros((1, Wo + 2, Cin), jnp.bfloat16)
        xp_ref[0:1, :, :] = zrow
        xp_ref[Ho + 1:Ho + 2, :, :] = zrow
        zcol = jnp.zeros((Ho + 2, 1, Cin), jnp.bfloat16)
        xp_ref[:, 0:1, :] = zcol
        xp_ref[:, Wo + 1:Wo + 2, :] = zcol
        xp_ref[1:Ho + 1, 1:Wo + 1, :] = x

        # ---- im2col buffer (bf16) + ONE MXU matmul, K = 9*Cin, f32 accumulation --------
        for t in range(9):                                         # 9 cheap slab copies
            dy, dx = t // 3, t % 3
            col_ref[:, t * Cin:(t + 1) * Cin] = (
                xp_ref[dy:dy + Ho, dx:dx + Wo, :].reshape(HW, Cin))
        acc = jnp.dot(col_ref[...], w_ref[...], preferred_element_type=jnp.float32)

        # ---- single tile store + per-image BN statistics --------------------------------
        y_ref[0] = acc.reshape(Ho, Wo, Cout).astype(y_ref.dtype)
        # TODO(synk): at production HW these reductions could ride the MXU via a ones-row
        # matmul; kept as exact f32 jnp.sum to protect the E[x^2]-E[x]^2 variance precision.
        sum_ref[0] = jnp.sum(acc, axis=0, keepdims=True)
        sq_ref[0] = jnp.sum(acc * acc, axis=0, keepdims=True)

    if fuse_bnrelu:
        def kernel(x_ref, w_ref, scale_ref, shift_ref, y_ref, sum_ref, sq_ref, xp_ref, col_ref):
            body(x_ref, w_ref, scale_ref, shift_ref, y_ref, sum_ref, sq_ref, xp_ref, col_ref)
    else:
        def kernel(x_ref, w_ref, y_ref, sum_ref, sq_ref, xp_ref, col_ref):
            body(x_ref, w_ref, None, None, y_ref, sum_ref, sq_ref, xp_ref, col_ref)
    return kernel


def _conv_layer(x, w_hwio, in_scale, in_shift, Ho, Wo, fuse_pool, fuse_bnrelu):
    N = x.shape[0]
    Cin, Cout = w_hwio.shape[2], w_hwio.shape[3]
    wk = w_hwio.reshape(9 * Cin, Cout).astype(jnp.bfloat16)   # resident weight, im2col layout

    x_block = (1, 2 * Ho, Wo, 2 * Cin) if fuse_pool else (1, Ho, Wo, Cin)
    in_specs = [
        pl.BlockSpec(x_block, lambda n: (n, 0, 0, 0)),
        pl.BlockSpec((9 * Cin, Cout), lambda n: (0, 0)),
    ]
    args = [x, wk]
    if fuse_bnrelu:
        in_specs += [pl.BlockSpec((1, 1, Cin), lambda n: (0, 0, 0))] * 2
        args += [in_scale, in_shift]

    kernel = _make_conv_kernel(Ho, Wo, Cin, Cout, fuse_pool, fuse_bnrelu)
    y, s, q = pl.pallas_call(
        kernel,
        out_shape=(
            jax.ShapeDtypeStruct((N, Ho, Wo, Cout), jnp.bfloat16),   # pre-BN conv output
            jax.ShapeDtypeStruct((N, 1, Cout), jnp.float32),         # per-image sum
            jax.ShapeDtypeStruct((N, 1, Cout), jnp.float32),         # per-image sum of squares
        ),
        grid=(N,),
        in_specs=in_specs,
        out_specs=(
            pl.BlockSpec((1, Ho, Wo, Cout), lambda n: (n, 0, 0, 0)),
            pl.BlockSpec((1, 1, Cout), lambda n: (n, 0, 0)),
            pl.BlockSpec((1, 1, Cout), lambda n: (n, 0, 0)),
        ),
        scratch_shapes=[
            pltpu.VMEM((Ho + 2, Wo + 2, Cin), jnp.bfloat16),   # zero-padded input tile
            pltpu.VMEM((Ho * Wo, 9 * Cin), jnp.bfloat16),      # im2col buffer
        ],
        compiler_params=pltpu.CompilerParams(
            dimension_semantics=("parallel",),          # per-image partial stats -> megacore OK
            vmem_limit_bytes=_vmem_limit_bytes()),
    )(*args)
    return y, s, q


def _fold_bn(s, q, gamma, beta, count):
    """Fold training-mode batch statistics into per-channel scale/shift (tiny jnp glue)."""
    mean = jnp.sum(s, axis=(0, 1)) / count
    var = jnp.sum(q, axis=(0, 1)) / count - mean * mean
    var = jnp.maximum(var, 0.0)                    # guard E[x^2]-E[x]^2 cancellation
    inv = gamma * lax.rsqrt(var + BN_EPS)
    scale = inv.reshape(1, 1, -1)
    shift = (beta - mean * inv).reshape(1, 1, -1)
    return scale, shift


# ------------------------------------- EncoderBlock ---------------------------------------
@functools.partial(jax.jit, static_argnames=("is_maxpool",))
def encoder_block_forward(x_nhwc, params, is_maxpool=True):
    """NHWC forward pass of EncoderBlock; returns NHWC float32."""
    N, H, W, _ = x_nhwc.shape
    if is_maxpool:
        assert H % 2 == 0 and W % 2 == 0, "MaxPool2d(2,2) needs even spatial dims"
        Ho, Wo = H // 2, W // 2
    else:
        Ho, Wo = H, W

    x = x_nhwc.astype(jnp.bfloat16)      # bf16 HBM read for the largest (layer-0) input
    scale = shift = None
    for li, (w, gamma, beta) in enumerate(params):
        fuse_pool = is_maxpool and li == 0
        fuse_bnrelu = li > 0
        # Free wrapper reshape: put the W-pool pairs on the lane axis so the in-kernel pool
        # is a plain lane-slice max (no strided mid-axis loads).
        xin = x.reshape(N, H, W // 2, 2 * x.shape[-1]) if fuse_pool else x
        x, s, q = _conv_layer(xin, w, scale, shift, Ho, Wo, fuse_pool, fuse_bnrelu)
        scale, shift = _fold_bn(s, q, gamma, beta, float(N * Ho * Wo))

    # Last layer's BN+ReLU: purely mem-bound elementwise op -> left to XLA fusion (per review,
    # the per-image lane-masked Pallas epilogue was strictly worse).
    return jnp.maximum(x.astype(jnp.float32) * scale + shift, 0.0)


def init_params(key, in_c, out_c, num_blocks):
    params = []
    c_prev = in_c
    for _ in range(num_blocks):
        key, k1, k2, k3 = jax.random.split(key, 4)
        w = 0.1 * jax.random.normal(k1, (3, 3, c_prev, out_c), jnp.float32)     # HWIO
        gamma = 1.0 + 0.1 * jax.random.normal(k2, (out_c,), jnp.float32)
        beta = 0.1 * jax.random.normal(k3, (out_c,), jnp.float32)
        params.append((w, gamma, beta))
        c_prev = out_c
    return params


# --------------------------------- pure-JAX reference -------------------------------------
def reference_forward(x, params, is_maxpool=True):
    """lax.conv reference mirroring the kernel's bf16 storage points (f32 accumulation)."""
    xb = x.astype(jnp.bfloat16).astype(jnp.float32)          # layer-0 input stored bf16
    if is_maxpool:
        N, H, W, C = xb.shape
        xb = xb.reshape(N, H // 2, 2, W // 2, 2, C).max(axis=(2, 4))
    for w, gamma, beta in params:
        lhs = xb.astype(jnp.bfloat16).astype(jnp.float32)
        rhs = w.astype(jnp.bfloat16).astype(jnp.float32)
        y = lax.conv_general_dilated(
            lhs, rhs, window_strides=(1, 1), padding="SAME",
            dimension_numbers=("NHWC", "HWIO", "NHWC"),
            precision=lax.Precision.HIGHEST)
        mean = y.mean(axis=(0, 1, 2))
        var = jnp.maximum(y.var(axis=(0, 1, 2)), 0.0)     # biased, PyTorch train-mode BN
        yq = y.astype(jnp.bfloat16).astype(jnp.float32)   # kernel stores pre-BN y in bf16
        xb = jnp.maximum((yq - mean) * lax.rsqrt(var + BN_EPS) * gamma + beta, 0.0)
    return xb


if __name__ == "__main__":
    in_c, out_c, num_blocks = 4, 8, 2
    N, H, W = 2, 16, 16

    key = jax.random.PRNGKey(0)
    kx, kp = jax.random.split(key)
    x_nchw = jax.random.normal(kx, (N, in_c, H, W), jnp.float32)   # PyTorch-style NCHW input
    x = jnp.transpose(x_nchw, (0, 2, 3, 1))                        # -> NHWC for the kernels
    params = init_params(kp, in_c, out_c, num_blocks)

    out = encoder_block_forward(x, params, is_maxpool=True)
    out = jax.block_until_ready(out)

    ref = reference_forward(x, params, is_maxpool=True)
    assert out.shape == (N, H // 2, W // 2, out_c), out.shape
    if not jnp.allclose(out, ref, rtol=1e-2, atol=1e-2):
        max_err = float(jnp.max(jnp.abs(out - ref)))
        raise AssertionError(f"mismatch vs reference, max abs err = {max_err}")
    print("KERNEL_OK")
</pallas_src>

<mosaic_0001>
module attributes {stable_mosaic.version = 11 : i64} {
  func.func @kernel(%arg0: i32, %arg1: memref<1x8x8x8xbf16, #tpu.memory_space<vmem>>, %arg2: memref<72x8xbf16, #tpu.memory_space<vmem>>, %arg3: memref<1x1x8xf32, #tpu.memory_space<vmem>>, %arg4: memref<1x1x8xf32, #tpu.memory_space<vmem>>, %arg5: memref<1x8x8x8xbf16, #tpu.memory_space<vmem>>, %arg6: memref<1x1x8xf32, #tpu.memory_space<vmem>>, %arg7: memref<1x1x8xf32, #tpu.memory_space<vmem>>, %arg8: memref<10x10x8xbf16, #tpu.memory_space<vmem>>, %arg9: memref<64x72xbf16, #tpu.memory_space<vmem>>) attributes {dimension_semantics = [#tpu.dimension_semantics<parallel>], iteration_bounds = array<i64: 2>, scalar_prefetch = 0 : i64, scratch_operands = 2 : i64, tpu.core_type = #tpu.core_type<tc>, window_params = [{transform_indices = @transform_0, window_bounds = array<i64: 1, 8, 8, 8>}, {pipeline_mode = #tpu.pipeline_mode<synchronous>, transform_indices = @transform_1, window_bounds = array<i64: 72, 8>}, {pipeline_mode = #tpu.pipeline_mode<synchronous>, transform_indices = @transform_2, window_bounds = array<i64: 1, 1, 8>}, {pipeline_mode = #tpu.pipeline_mode<synchronous>, transform_indices = @transform_3, window_bounds = array<i64: 1, 1, 8>}, {transform_indices = @transform_4, window_bounds = array<i64: 1, 8, 8, 8>}, {transform_indices = @transform_5, window_bounds = array<i64: 1, 1, 8>}, {transform_indices = @transform_6, window_bounds = array<i64: 1, 1, 8>}]} {
    %c0 = arith.constant 0 : index
    %c0_0 = arith.constant 0 : index
    %c0_1 = arith.constant 0 : index
    %c0_2 = arith.constant 0 : index
    %0 = vector.load %arg1[%c0, %c0_0, %c0_1, %c0_2] : memref<1x8x8x8xbf16, #tpu.memory_space<vmem>>, vector<1x8x8x8xbf16>
    %1 = vector.shape_cast %0 : vector<1x8x8x8xbf16> to vector<8x8x8xbf16>
    %2 = arith.extf %1 : vector<8x8x8xbf16> to vector<8x8x8xf32>
    %c0_3 = arith.constant 0 : index
    %c0_4 = arith.constant 0 : index
    %c0_5 = arith.constant 0 : index
    %3 = vector.load %arg3[%c0_3, %c0_4, %c0_5] : memref<1x1x8xf32, #tpu.memory_space<vmem>>, vector<1x1x8xf32>
    %4 = vector.broadcast %3 : vector<1x1x8xf32> to vector<8x8x8xf32>
    %5 = arith.mulf %2, %4 : vector<8x8x8xf32>
    %c0_6 = arith.constant 0 : index
    %c0_7 = arith.constant 0 : index
    %c0_8 = arith.constant 0 : index
    %6 = vector.load %arg4[%c0_6, %c0_7, %c0_8] : memref<1x1x8xf32, #tpu.memory_space<vmem>>, vector<1x1x8xf32>
    %7 = vector.broadcast %6 : vector<1x1x8xf32> to vector<8x8x8xf32>
    %8 = arith.addf %5, %7 : vector<8x8x8xf32>
    %cst = arith.constant 0.000000e+00 : f32
    %9 = vector.broadcast %cst : f32 to vector<8x8x8xf32>
    %10 = arith.maximumf %8, %9 : vector<8x8x8xf32>
    %11 = arith.truncf %10 : vector<8x8x8xf32> to vector<8x8x8xbf16>
    %cst_9 = arith.constant 0.000000e+00 : bf16
    %12 = vector.broadcast %cst_9 : bf16 to vector<1x10x8xbf16>
    %c0_10 = arith.constant 0 : index
    %c0_11 = arith.constant 0 : index
    %c0_12 = arith.constant 0 : index
    %13 = vector.load %arg8[%c0_10, %c0_11, %c0_12] : memref<10x10x8xbf16, #tpu.memory_space<vmem>>, vector<1x10x8xbf16>
    tpu.vector_store %arg8[%c0_10, %c0_11, %c0_12], %12 {strides = array<i32>} : memref<10x10x8xbf16, #tpu.memory_space<vmem>>, vector<1x10x8xbf16>,
    %c9 = arith.constant 9 : index
    %c0_13 = arith.constant 0 : index
    %c0_14 = arith.constant 0 : index
    %14 = vector.load %arg8[%c9, %c0_13, %c0_14] : memref<10x10x8xbf16, #tpu.memory_space<vmem>>, vector<1x10x8xbf16>
    tpu.vector_store %arg8[%c9, %c0_13, %c0_14], %12 {strides = array<i32>} : memref<10x10x8xbf16, #tpu.memory_space<vmem>>, vector<1x10x8xbf16>,
    %cst_15 = arith.constant 0.000000e+00 : bf16
    %15 = vector.broadcast %cst_15 : bf16 to vector<10x1x8xbf16>
    %c0_16 = arith.constant 0 : index
    %c0_17 = arith.constant 0 : index
    %c0_18 = arith.constant 0 : index
    %16 = vector.load %arg8[%c0_16, %c0_17, %c0_18] : memref<10x10x8xbf16, #tpu.memory_space<vmem>>, vector<10x1x8xbf16>
    tpu.vector_store %arg8[%c0_16, %c0_17, %c0_18], %15 {strides = array<i32>} : memref<10x10x8xbf16, #tpu.memory_space<vmem>>, vector<10x1x8xbf16>,
    %c0_19 = arith.constant 0 : index
    %c9_20 = arith.constant 9 : index
    %c0_21 = arith.constant 0 : index
    %17 = vector.load %arg8[%c0_19, %c9_20, %c0_21] : memref<10x10x8xbf16, #tpu.memory_space<vmem>>, vector<10x1x8xbf16>
    tpu.vector_store %arg8[%c0_19, %c9_20, %c0_21], %15 {strides = array<i32>} : memref<10x10x8xbf16, #tpu.memory_space<vmem>>, vector<10x1x8xbf16>,
    %c1 = arith.constant 1 : index
    %c1_22 = arith.constant 1 : index
    %c0_23 = arith.constant 0 : index
    %18 = vector.load %arg8[%c1, %c1_22, %c0_23] : memref<10x10x8xbf16, #tpu.memory_space<vmem>>, vector<8x8x8xbf16>
    tpu.vector_store %arg8[%c1, %c1_22, %c0_23], %11 {strides = array<i32>} : memref<10x10x8xbf16, #tpu.memory_space<vmem>>, vector<8x8x8xbf16>,
    %c0_24 = arith.constant 0 : index
    %c0_25 = arith.constant 0 : index
    %c0_26 = arith.constant 0 : index
    %19 = vector.load %arg8[%c0_24, %c0_25, %c0_26] : memref<10x10x8xbf16, #tpu.memory_space<vmem>>, vector<8x8x8xbf16>
    %20 = vector.shape_cast %19 : vector<8x8x8xbf16> to vector<64x8xbf16>
    %c0_27 = arith.constant 0 : index
    %c0_28 = arith.constant 0 : index
    %21 = vector.load %arg9[%c0_27, %c0_28] : memref<64x72xbf16, #tpu.memory_space<vmem>>, vector<64x8xbf16>
    tpu.vector_store %arg9[%c0_27, %c0_28], %20 {strides = array<i32>} : memref<64x72xbf16, #tpu.memory_space<vmem>>, vector<64x8xbf16>,
    %c0_29 = arith.constant 0 : index
    %c1_30 = arith.constant 1 : index
    %c0_31 = arith.constant 0 : index
    %22 = vector.load %arg8[%c0_29, %c1_30, %c0_31] : memref<10x10x8xbf16, #tpu.memory_space<vmem>>, vector<8x8x8xbf16>
    %23 = vector.shape_cast %22 : vector<8x8x8xbf16> to vector<64x8xbf16>
    %c0_32 = arith.constant 0 : index
    %c8 = arith.constant 8 : index
    %24 = vector.load %arg9[%c0_32, %c8] : memref<64x72xbf16, #tpu.memory_space<vmem>>, vector<64x8xbf16>
    tpu.vector_store %arg9[%c0_32, %c8], %23 {strides = array<i32>} : memref<64x72xbf16, #tpu.memory_space<vmem>>, vector<64x8xbf16>,
    %c0_33 = arith.constant 0 : index
    %c2 = arith.constant 2 : index
    %c0_34 = arith.constant 0 : index
    %25 = vector.load %arg8[%c0_33, %c2, %c0_34] : memref<10x10x8xbf16, #tpu.memory_space<vmem>>, vector<8x8x8xbf16>
    %26 = vector.shape_cast %25 : vector<8x8x8xbf16> to vector<64x8xbf16>
    %c0_35 = arith.constant 0 : index
    %c16 = arith.constant 16 : index
    %27 = vector.load %arg9[%c0_35, %c16] : memref<64x72xbf16, #tpu.memory_space<vmem>>, vector<64x8xbf16>
    tpu.vector_store %arg9[%c0_35, %c16], %26 {strides = array<i32>} : memref<64x72xbf16, #tpu.memory_space<vmem>>, vector<64x8xbf16>,
    %c1_36 = arith.constant 1 : index
    %c0_37 = arith.constant 0 : index
    %c0_38 = arith.constant 0 : index
    %28 = vector.load %arg8[%c1_36, %c0_37, %c0_38] : memref<10x10x8xbf16, #tpu.memory_space<vmem>>, vector<8x8x8xbf16>
    %29 = vector.shape_cast %28 : vector<8x8x8xbf16> to vector<64x8xbf16>
    %c0_39 = arith.constant 0 : index
    %c24 = arith.constant 24 : index
    %30 = vector.load %arg9[%c0_39, %c24] : memref<64x72xbf16, #tpu.memory_space<vmem>>, vector<64x8xbf16>
    tpu.vector_store %arg9[%c0_39, %c24], %29 {strides = array<i32>} : memref<64x72xbf16, #tpu.memory_space<vmem>>, vector<64x8xbf16>,
    %c1_40 = arith.constant 1 : index
    %c1_41 = arith.constant 1 : index
    %c0_42 = arith.constant 0 : index
    %31 = vector.load %arg8[%c1_40, %c1_41, %c0_42] : memref<10x10x8xbf16, #tpu.memory_space<vmem>>, vector<8x8x8xbf16>
    %32 = vector.shape_cast %31 : vector<8x8x8xbf16> to vector<64x8xbf16>
    %c0_43 = arith.constant 0 : index
    %c32 = arith.constant 32 : index
    %33 = vector.load %arg9[%c0_43, %c32] : memref<64x72xbf16, #tpu.memory_space<vmem>>, vector<64x8xbf16>
    tpu.vector_store %arg9[%c0_43, %c32], %32 {strides = array<i32>} : memref<64x72xbf16, #tpu.memory_space<vmem>>, vector<64x8xbf16>,
    %c1_44 = arith.constant 1 : index
    %c2_45 = arith.constant 2 : index
    %c0_46 = arith.constant 0 : index
    %34 = vector.load %arg8[%c1_44, %c2_45, %c0_46] : memref<10x10x8xbf16, #tpu.memory_space<vmem>>, vector<8x8x8xbf16>
    %35 = vector.shape_cast %34 : vector<8x8x8xbf16> to vector<64x8xbf16>
    %c0_47 = arith.constant 0 : index
    %c40 = arith.constant 40 : index
    %36 = vector.load %arg9[%c0_47, %c40] : memref<64x72xbf16, #tpu.memory_space<vmem>>, vector<64x8xbf16>
    tpu.vector_store %arg9[%c0_47, %c40], %35 {strides = array<i32>} : memref<64x72xbf16, #tpu.memory_space<vmem>>, vector<64x8xbf16>,
    %c2_48 = arith.constant 2 : index
    %c0_49 = arith.constant 0 : index
    %c0_50 = arith.constant 0 : index
    %37 = vector.load %arg8[%c2_48, %c0_49, %c0_50] : memref<10x10x8xbf16, #tpu.memory_space<vmem>>, vector<8x8x8xbf16>
    %38 = vector.shape_cast %37 : vector<8x8x8xbf16> to vector<64x8xbf16>
    %c0_51 = arith.constant 0 : index
    %c48 = arith.constant 48 : index
    %39 = vector.load %arg9[%c0_51, %c48] : memref<64x72xbf16, #tpu.memory_space<vmem>>, vector<64x8xbf16>
    tpu.vector_store %arg9[%c0_51, %c48], %38 {strides = array<i32>} : memref<64x72xbf16, #tpu.memory_space<vmem>>, vector<64x8xbf16>,
    %c2_52 = arith.constant 2 : index
    %c1_53 = arith.constant 1 : index
    %c0_54 = arith.constant 0 : index
    %40 = vector.load %arg8[%c2_52, %c1_53, %c0_54] : memref<10x10x8xbf16, #tpu.memory_space<vmem>>, vector<8x8x8xbf16>
    %41 = vector.shape_cast %40 : vector<8x8x8xbf16> to vector<64x8xbf16>
    %c0_55 = arith.constant 0 : index
    %c56 = arith.constant 56 : index
    %42 = vector.load %arg9[%c0_55, %c56] : memref<64x72xbf16, #tpu.memory_space<vmem>>, vector<64x8xbf16>
    tpu.vector_store %arg9[%c0_55, %c56], %41 {strides = array<i32>} : memref<64x72xbf16, #tpu.memory_space<vmem>>, vector<64x8xbf16>,
    %c2_56 = arith.constant 2 : index
    %c2_57 = arith.constant 2 : index
    %c0_58 = arith.constant 0 : index
    %43 = vector.load %arg8[%c2_56, %c2_57, %c0_58] : memref<10x10x8xbf16, #tpu.memory_space<vmem>>, vector<8x8x8xbf16>
    %44 = vector.shape_cast %43 : vector<8x8x8xbf16> to vector<64x8xbf16>
    %c0_59 = arith.constant 0 : index
    %c64 = arith.constant 64 : index
    %45 = vector.load %arg9[%c0_59, %c64] : memref<64x72xbf16, #tpu.memory_space<vmem>>, vector<64x8xbf16>
    tpu.vector_store %arg9[%c0_59, %c64], %44 {strides = array<i32>} : memref<64x72xbf16, #tpu.memory_space<vmem>>, vector<64x8xbf16>,
    %c0_60 = arith.constant 0 : index
    %c0_61 = arith.constant 0 : index
    %46 = vector.load %arg9[%c0_60, %c0_61] : memref<64x72xbf16, #tpu.memory_space<vmem>>, vector<64x72xbf16>
    %c0_62 = arith.constant 0 : index
    %c0_63 = arith.constant 0 : index
    %47 = vector.load %arg2[%c0_62, %c0_63] : memref<72x8xbf16, #tpu.memory_space<vmem>>, vector<72x8xbf16>
    %cst_64 = arith.constant dense<0.000000e+00> : vector<64x8xf32>
    %48 = tpu.matmul %46, %47, %cst_64 {dimension_numbers = #tpu.dot_dimension_numbers<[1], [0], [0], [1], [0, 0, 1, 1], [], []>} : vector<64x72xbf16>, vector<72x8xbf16>, vector<64x8xf32> -> vector<64x8xf32>
    %49 = vector.shape_cast %48 : vector<64x8xf32> to vector<8x8x8xf32>
    %50 = arith.truncf %49 : vector<8x8x8xf32> to vector<8x8x8xbf16>
    %c0_65 = arith.constant 0 : index
    %c0_66 = arith.constant 0 : index
    %c0_67 = arith.constant 0 : index
    %c0_68 = arith.constant 0 : index
    %51 = vector.load %arg5[%c0_65, %c0_66, %c0_67, %c0_68] : memref<1x8x8x8xbf16, #tpu.memory_space<vmem>>, vector<1x8x8x8xbf16>
    %52 = vector.shape_cast %51 : vector<1x8x8x8xbf16> to vector<8x8x8xbf16>
    %53 = vector.shape_cast %50 : vector<8x8x8xbf16> to vector<1x8x8x8xbf16>
    tpu.vector_store %arg5[%c0_65, %c0_66, %c0_67, %c0_68], %53 {strides = array<i32>} : memref<1x8x8x8xbf16, #tpu.memory_space<vmem>>, vector<1x8x8x8xbf16>,
    %cst_69 = arith.constant dense<0.000000e+00> : vector<8xf32>
    %54 = vector.multi_reduction <add>, %48, %cst_69 [0] : vector<64x8xf32> to vector<8xf32>
    %55 = vector.shape_cast %54 : vector<8xf32> to vector<1x8xf32>
    %c0_70 = arith.constant 0 : index
    %c0_71 = arith.constant 0 : index
    %c0_72 = arith.constant 0 : index
    %56 = vector.load %arg6[%c0_70, %c0_71, %c0_72] : memref<1x1x8xf32, #tpu.memory_space<vmem>>, vector<1x1x8xf32>
    %57 = vector.shape_cast %56 : vector<1x1x8xf32> to vector<1x8xf32>
    %58 = vector.shape_cast %55 : vector<1x8xf32> to vector<1x1x8xf32>
    tpu.vector_store %arg6[%c0_70, %c0_71, %c0_72], %58 {strides = array<i32>} : memref<1x1x8xf32, #tpu.memory_space<vmem>>, vector<1x1x8xf32>,
    %59 = arith.mulf %48, %48 : vector<64x8xf32>
    %cst_73 = arith.constant dense<0.000000e+00> : vector<8xf32>
    %60 = vector.multi_reduction <add>, %59, %cst_73 [0] : vector<64x8xf32> to vector<8xf32>
    %61 = vector.shape_cast %60 : vector<8xf32> to vector<1x8xf32>
    %c0_74 = arith.constant 0 : index
    %c0_75 = arith.constant 0 : index
    %c0_76 = arith.constant 0 : index
    %62 = vector.load %arg7[%c0_74, %c0_75, %c0_76] : memref<1x1x8xf32, #tpu.memory_space<vmem>>, vector<1x1x8xf32>
    %63 = vector.shape_cast %62 : vector<1x1x8xf32> to vector<1x8xf32>
    %64 = vector.shape_cast %61 : vector<1x8xf32> to vector<1x1x8xf32>
    tpu.vector_store %arg7[%c0_74, %c0_75, %c0_76], %64 {strides = array<i32>} : memref<1x1x8xf32, #tpu.memory_space<vmem>>, vector<1x1x8xf32>,
    return
  }
  func.func @transform_0(%arg0: i32) -> (i32, i32, i32, i32) {
    %c0_i32 = arith.constant 0 : i32
    %c0_i32_0 = arith.constant 0 : i32
    %c0_i32_1 = arith.constant 0 : i32
    %c0_i32_2 = arith.constant 0 : i32
    return %arg0, %c0_i32, %c0_i32_0, %c0_i32_1 : i32, i32, i32, i32
  }
  func.func @transform_1(%arg0: i32) -> (i32, i32) {
    %c0_i32 = arith.constant 0 : i32
    %c0_i32_0 = arith.constant 0 : i32
    %c0_i32_1 = arith.constant 0 : i32
    return %c0_i32, %c0_i32_0 : i32, i32
  }
  func.func @transform_2(%arg0: i32) -> (i32, i32, i32) {
    %c0_i32 = arith.constant 0 : i32
    %c0_i32_0 = arith.constant 0 : i32
    %c0_i32_1 = arith.constant 0 : i32
    %c0_i32_2 = arith.constant 0 : i32
    return %c0_i32, %c0_i32_0, %c0_i32_1 : i32, i32, i32
  }
  func.func @transform_3(%arg0: i32) -> (i32, i32, i32) {
    %c0_i32 = arith.constant 0 : i32
    %c0_i32_0 = arith.constant 0 : i32
    %c0_i32_1 = arith.constant 0 : i32
    %c0_i32_2 = arith.constant 0 : i32
    return %c0_i32, %c0_i32_0, %c0_i32_1 : i32, i32, i32
  }
  func.func @transform_4(%arg0: i32) -> (i32, i32, i32, i32) {
    %c0_i32 = arith.constant 0 : i32
    %c0_i32_0 = arith.constant 0 : i32
    %c0_i32_1 = arith.constant 0 : i32
    %c0_i32_2 = arith.constant 0 : i32
    return %arg0, %c0_i32, %c0_i32_0, %c0_i32_1 : i32, i32, i32, i32
  }
  func.func @transform_5(%arg0: i32) -> (i32, i32, i32) {
    %c0_i32 = arith.constant 0 : i32
    %c0_i32_0 = arith.constant 0 : i32
    %c0_i32_1 = arith.constant 0 : i32
    return %arg0, %c0_i32, %c0_i32_0 : i32, i32, i32
  }
  func.func @transform_6(%arg0: i32) -> (i32, i32, i32) {
    %c0_i32 = arith.constant 0 : i32
    %c0_i32_0 = arith.constant 0 : i32
    %c0_i32_1 = arith.constant 0 : i32
    return %arg0, %c0_i32, %c0_i32_0 : i32, i32, i32
  }
}

module attributes {stable_mosaic.version = 11 : i64} {
  func.func @kernel(%arg0: i32, %arg1: memref<1x16x8x8xbf16, #tpu.memory_space<vmem>>, %arg2: memref<36x8xbf16, #tpu.memory_space<vmem>>, %arg3: memref<1x8x8x8xbf16, #tpu.memory_space<vmem>>, %arg4: memref<1x1x8xf32, #tpu.memory_space<vmem>>, %arg5: memref<1x1x8xf32, #tpu.memory_space<vmem>>, %arg6: memref<10x10x4xbf16, #tpu.memory_space<vmem>>, %arg7: memref<64x36xbf16, #tpu.memory_space<vmem>>) attributes {dimension_semantics = [#tpu.dimension_semantics<parallel>], iteration_bounds = array<i64: 2>, scalar_prefetch = 0 : i64, scratch_operands = 2 : i64, tpu.core_type = #tpu.core_type<tc>, window_params = [{transform_indices = @transform_0, window_bounds = array<i64: 1, 16, 8, 8>}, {pipeline_mode = #tpu.pipeline_mode<synchronous>, transform_indices = @transform_1, window_bounds = array<i64: 36, 8>}, {transform_indices = @transform_2, window_bounds = array<i64: 1, 8, 8, 8>}, {transform_indices = @transform_3, window_bounds = array<i64: 1, 1, 8>}, {transform_indices = @transform_4, window_bounds = array<i64: 1, 1, 8>}]} {
    %c0 = arith.constant 0 : index
    %c0_0 = arith.constant 0 : index
    %c0_1 = arith.constant 0 : index
    %c0_2 = arith.constant 0 : index
    %0 = vector.load %arg1[%c0, %c0_0, %c0_1, %c0_2] : memref<1x16x8x8xbf16, #tpu.memory_space<vmem>>, vector<1x16x8x8xbf16>
    %1 = vector.shape_cast %0 : vector<1x16x8x8xbf16> to vector<16x8x8xbf16>
    %2 = vector.extract_strided_slice %1 {offsets = [0, 0, 0], sizes = [16, 8, 4], strides = [1, 1, 1]} : vector<16x8x8xbf16> to vector<16x8x4xbf16>
    %3 = vector.extract_strided_slice %1 {offsets = [0, 0, 4], sizes = [16, 8, 4], strides = [1, 1, 1]} : vector<16x8x8xbf16> to vector<16x8x4xbf16>
    %4 = arith.maximumf %2, %3 : vector<16x8x4xbf16>
    %5 = vector.shape_cast %4 : vector<16x8x4xbf16> to vector<8x2x8x4xbf16>
    %cst = arith.constant dense<0xFF80> : vector<8x8x4xbf16>
    %6 = vector.multi_reduction <maximumf>, %5, %cst [1] : vector<8x2x8x4xbf16> to vector<8x8x4xbf16>
    %cst_3 = arith.constant 0.000000e+00 : bf16
    %7 = vector.broadcast %cst_3 : bf16 to vector<1x10x4xbf16>
    %c0_4 = arith.constant 0 : index
    %c0_5 = arith.constant 0 : index
    %c0_6 = arith.constant 0 : index
    %8 = vector.load %arg6[%c0_4, %c0_5, %c0_6] : memref<10x10x4xbf16, #tpu.memory_space<vmem>>, vector<1x10x4xbf16>
    tpu.vector_store %arg6[%c0_4, %c0_5, %c0_6], %7 {strides = array<i32>} : memref<10x10x4xbf16, #tpu.memory_space<vmem>>, vector<1x10x4xbf16>,
    %c9 = arith.constant 9 : index
    %c0_7 = arith.constant 0 : index
    %c0_8 = arith.constant 0 : index
    %9 = vector.load %arg6[%c9, %c0_7, %c0_8] : memref<10x10x4xbf16, #tpu.memory_space<vmem>>, vector<1x10x4xbf16>
    tpu.vector_store %arg6[%c9, %c0_7, %c0_8], %7 {strides = array<i32>} : memref<10x10x4xbf16, #tpu.memory_space<vmem>>, vector<1x10x4xbf16>,
    %cst_9 = arith.constant 0.000000e+00 : bf16
    %10 = vector.broadcast %cst_9 : bf16 to vector<10x1x4xbf16>
    %c0_10 = arith.constant 0 : index
    %c0_11 = arith.constant 0 : index
    %c0_12 = arith.constant 0 : index
    %11 = vector.load %arg6[%c0_10, %c0_11, %c0_12] : memref<10x10x4xbf16, #tpu.memory_space<vmem>>, vector<10x1x4xbf16>
    tpu.vector_store %arg6[%c0_10, %c0_11, %c0_12], %10 {strides = array<i32>} : memref<10x10x4xbf16, #tpu.memory_space<vmem>>, vector<10x1x4xbf16>,
    %c0_13 = arith.constant 0 : index
    %c9_14 = arith.constant 9 : index
    %c0_15 = arith.constant 0 : index
    %12 = vector.load %arg6[%c0_13, %c9_14, %c0_15] : memref<10x10x4xbf16, #tpu.memory_space<vmem>>, vector<10x1x4xbf16>
    tpu.vector_store %arg6[%c0_13, %c9_14, %c0_15], %10 {strides = array<i32>} : memref<10x10x4xbf16, #tpu.memory_space<vmem>>, vector<10x1x4xbf16>,
    %c1 = arith.constant 1 : index
    %c1_16 = arith.constant 1 : index
    %c0_17 = arith.constant 0 : index
    %13 = vector.load %arg6[%c1, %c1_16, %c0_17] : memref<10x10x4xbf16, #tpu.memory_space<vmem>>, vector<8x8x4xbf16>
    tpu.vector_store %arg6[%c1, %c1_16, %c0_17], %6 {strides = array<i32>} : memref<10x10x4xbf16, #tpu.memory_space<vmem>>, vector<8x8x4xbf16>,
    %c0_18 = arith.constant 0 : index
    %c0_19 = arith.constant 0 : index
    %c0_20 = arith.constant 0 : index
    %14 = vector.load %arg6[%c0_18, %c0_19, %c0_20] : memref<10x10x4xbf16, #tpu.memory_space<vmem>>, vector<8x8x4xbf16>
    %15 = vector.shape_cast %14 : vector<8x8x4xbf16> to vector<64x4xbf16>
    %c0_21 = arith.constant 0 : index
    %c0_22 = arith.constant 0 : index
    %16 = vector.load %arg7[%c0_21, %c0_22] : memref<64x36xbf16, #tpu.memory_space<vmem>>, vector<64x4xbf16>
    tpu.vector_store %arg7[%c0_21, %c0_22], %15 {strides = array<i32>} : memref<64x36xbf16, #tpu.memory_space<vmem>>, vector<64x4xbf16>,
    %c0_23 = arith.constant 0 : index
    %c1_24 = arith.constant 1 : index
    %c0_25 = arith.constant 0 : index
    %17 = vector.load %arg6[%c0_23, %c1_24, %c0_25] : memref<10x10x4xbf16, #tpu.memory_space<vmem>>, vector<8x8x4xbf16>
    %18 = vector.shape_cast %17 : vector<8x8x4xbf16> to vector<64x4xbf16>
    %c0_26 = arith.constant 0 : index
    %c4 = arith.constant 4 : index
    %19 = vector.load %arg7[%c0_26, %c4] : memref<64x36xbf16, #tpu.memory_space<vmem>>, vector<64x4xbf16>
    tpu.vector_store %arg7[%c0_26, %c4], %18 {strides = array<i32>} : memref<64x36xbf16, #tpu.memory_space<vmem>>, vector<64x4xbf16>,
    %c0_27 = arith.constant 0 : index
    %c2 = arith.constant 2 : index
    %c0_28 = arith.constant 0 : index
    %20 = vector.load %arg6[%c0_27, %c2, %c0_28] : memref<10x10x4xbf16, #tpu.memory_space<vmem>>, vector<8x8x4xbf16>
    %21 = vector.shape_cast %20 : vector<8x8x4xbf16> to vector<64x4xbf16>
    %c0_29 = arith.constant 0 : index
    %c8 = arith.constant 8 : index
    %22 = vector.load %arg7[%c0_29, %c8] : memref<64x36xbf16, #tpu.memory_space<vmem>>, vector<64x4xbf16>
    tpu.vector_store %arg7[%c0_29, %c8], %21 {strides = array<i32>} : memref<64x36xbf16, #tpu.memory_space<vmem>>, vector<64x4xbf16>,
    %c1_30 = arith.constant 1 : index
    %c0_31 = arith.constant 0 : index
    %c0_32 = arith.constant 0 : index
    %23 = vector.load %arg6[%c1_30, %c0_31, %c0_32] : memref<10x10x4xbf16, #tpu.memory_space<vmem>>, vector<8x8x4xbf16>
    %24 = vector.shape_cast %23 : vector<8x8x4xbf16> to vector<64x4xbf16>
    %c0_33 = arith.constant 0 : index
    %c12 = arith.constant 12 : index
    %25 = vector.load %arg7[%c0_33, %c12] : memref<64x36xbf16, #tpu.memory_space<vmem>>, vector<64x4xbf16>
    tpu.vector_store %arg7[%c0_33, %c12], %24 {strides = array<i32>} : memref<64x36xbf16, #tpu.memory_space<vmem>>, vector<64x4xbf16>,
    %c1_34 = arith.constant 1 : index
    %c1_35 = arith.constant 1 : index
    %c0_36 = arith.constant 0 : index
    %26 = vector.load %arg6[%c1_34, %c1_35, %c0_36] : memref<10x10x4xbf16, #tpu.memory_space<vmem>>, vector<8x8x4xbf16>
    %27 = vector.shape_cast %26 : vector<8x8x4xbf16> to vector<64x4xbf16>
    %c0_37 = arith.constant 0 : index
    %c16 = arith.constant 16 : index
    %28 = vector.load %arg7[%c0_37, %c16] : memref<64x36xbf16, #tpu.memory_space<vmem>>, vector<64x4xbf16>
    tpu.vector_store %arg7[%c0_37, %c16], %27 {strides = array<i32>} : memref<64x36xbf16, #tpu.memory_space<vmem>>, vector<64x4xbf16>,
    %c1_38 = arith.constant 1 : index
    %c2_39 = arith.constant 2 : index
    %c0_40 = arith.constant 0 : index
    %29 = vector.load %arg6[%c1_38, %c2_39, %c0_40] : memref<10x10x4xbf16, #tpu.memory_space<vmem>>, vector<8x8x4xbf16>
    %30 = vector.shape_cast %29 : vector<8x8x4xbf16> to vector<64x4xbf16>
    %c0_41 = arith.constant 0 : index
    %c20 = arith.constant 20 : index
    %31 = vector.load %arg7[%c0_41, %c20] : memref<64x36xbf16, #tpu.memory_space<vmem>>, vector<64x4xbf16>
    tpu.vector_store %arg7[%c0_41, %c20], %30 {strides = array<i32>} : memref<64x36xbf16, #tpu.memory_space<vmem>>, vector<64x4xbf16>,
    %c2_42 = arith.constant 2 : index
    %c0_43 = arith.constant 0 : index
    %c0_44 = arith.constant 0 : index
    %32 = vector.load %arg6[%c2_42, %c0_43, %c0_44] : memref<10x10x4xbf16, #tpu.memory_space<vmem>>, vector<8x8x4xbf16>
    %33 = vector.shape_cast %32 : vector<8x8x4xbf16> to vector<64x4xbf16>
    %c0_45 = arith.constant 0 : index
    %c24 = arith.constant 24 : index
    %34 = vector.load %arg7[%c0_45, %c24] : memref<64x36xbf16, #tpu.memory_space<vmem>>, vector<64x4xbf16>
    tpu.vector_store %arg7[%c0_45, %c24], %33 {strides = array<i32>} : memref<64x36xbf16, #tpu.memory_space<vmem>>, vector<64x4xbf16>,
    %c2_46 = arith.constant 2 : index
    %c1_47 = arith.constant 1 : index
    %c0_48 = arith.constant 0 : index
    %35 = vector.load %arg6[%c2_46, %c1_47, %c0_48] : memref<10x10x4xbf16, #tpu.memory_space<vmem>>, vector<8x8x4xbf16>
    %36 = vector.shape_cast %35 : vector<8x8x4xbf16> to vector<64x4xbf16>
    %c0_49 = arith.constant 0 : index
    %c28 = arith.constant 28 : index
    %37 = vector.load %arg7[%c0_49, %c28] : memref<64x36xbf16, #tpu.memory_space<vmem>>, vector<64x4xbf16>
    tpu.vector_store %arg7[%c0_49, %c28], %36 {strides = array<i32>} : memref<64x36xbf16, #tpu.memory_space<vmem>>, vector<64x4xbf16>,
    %c2_50 = arith.constant 2 : index
    %c2_51 = arith.constant 2 : index
    %c0_52 = arith.constant 0 : index
    %38 = vector.load %arg6[%c2_50, %c2_51, %c0_52] : memref<10x10x4xbf16, #tpu.memory_space<vmem>>, vector<8x8x4xbf16>
    %39 = vector.shape_cast %38 : vector<8x8x4xbf16> to vector<64x4xbf16>
    %c0_53 = arith.constant 0 : index
    %c32 = arith.constant 32 : index
    %40 = vector.load %arg7[%c0_53, %c32] : memref<64x36xbf16, #tpu.memory_space<vmem>>, vector<64x4xbf16>
    tpu.vector_store %arg7[%c0_53, %c32], %39 {strides = array<i32>} : memref<64x36xbf16, #tpu.memory_space<vmem>>, vector<64x4xbf16>,
    %c0_54 = arith.constant 0 : index
    %c0_55 = arith.constant 0 : index
    %41 = vector.load %arg7[%c0_54, %c0_55] : memref<64x36xbf16, #tpu.memory_space<vmem>>, vector<64x36xbf16>
    %c0_56 = arith.constant 0 : index
    %c0_57 = arith.constant 0 : index
    %42 = vector.load %arg2[%c0_56, %c0_57] : memref<36x8xbf16, #tpu.memory_space<vmem>>, vector<36x8xbf16>
    %cst_58 = arith.constant dense<0.000000e+00> : vector<64x8xf32>
    %43 = tpu.matmul %41, %42, %cst_58 {dimension_numbers = #tpu.dot_dimension_numbers<[1], [0], [0], [1], [0, 0, 1, 1], [], []>} : vector<64x36xbf16>, vector<36x8xbf16>, vector<64x8xf32> -> vector<64x8xf32>
    %44 = vector.shape_cast %43 : vector<64x8xf32> to vector<8x8x8xf32>
    %45 = arith.truncf %44 : vector<8x8x8xf32> to vector<8x8x8xbf16>
    %c0_59 = arith.constant 0 : index
    %c0_60 = arith.constant 0 : index
    %c0_61 = arith.constant 0 : index
    %c0_62 = arith.constant 0 : index
    %46 = vector.load %arg3[%c0_59, %c0_60, %c0_61, %c0_62] : memref<1x8x8x8xbf16, #tpu.memory_space<vmem>>, vector<1x8x8x8xbf16>
    %47 = vector.shape_cast %46 : vector<1x8x8x8xbf16> to vector<8x8x8xbf16>
    %48 = vector.shape_cast %45 : vector<8x8x8xbf16> to vector<1x8x8x8xbf16>
    tpu.vector_store %arg3[%c0_59, %c0_60, %c0_61, %c0_62], %48 {strides = array<i32>} : memref<1x8x8x8xbf16, #tpu.memory_space<vmem>>, vector<1x8x8x8xbf16>,
    %cst_63 = arith.constant dense<0.000000e+00> : vector<8xf32>
    %49 = vector.multi_reduction <add>, %43, %cst_63 [0] : vector<64x8xf32> to vector<8xf32>
    %50 = vector.shape_cast %49 : vector<8xf32> to vector<1x8xf32>
    %c0_64 = arith.constant 0 : index
    %c0_65 = arith.constant 0 : index
    %c0_66 = arith.constant 0 : index
    %51 = vector.load %arg4[%c0_64, %c0_65, %c0_66] : memref<1x1x8xf32, #tpu.memory_space<vmem>>, vector<1x1x8xf32>
    %52 = vector.shape_cast %51 : vector<1x1x8xf32> to vector<1x8xf32>
    %53 = vector.shape_cast %50 : vector<1x8xf32> to vector<1x1x8xf32>
    tpu.vector_store %arg4[%c0_64, %c0_65, %c0_66], %53 {strides = array<i32>} : memref<1x1x8xf32, #tpu.memory_space<vmem>>, vector<1x1x8xf32>,
    %54 = arith.mulf %43, %43 : vector<64x8xf32>
    %cst_67 = arith.constant dense<0.000000e+00> : vector<8xf32>
    %55 = vector.multi_reduction <add>, %54, %cst_67 [0] : vector<64x8xf32> to vector<8xf32>
    %56 = vector.shape_cast %55 : vector<8xf32> to vector<1x8xf32>
    %c0_68 = arith.constant 0 : index
    %c0_69 = arith.constant 0 : index
    %c0_70 = arith.constant 0 : index
    %57 = vector.load %arg5[%c0_68, %c0_69, %c0_70] : memref<1x1x8xf32, #tpu.memory_space<vmem>>, vector<1x1x8xf32>
    %58 = vector.shape_cast %57 : vector<1x1x8xf32> to vector<1x8xf32>
    %59 = vector.shape_cast %56 : vector<1x8xf32> to vector<1x1x8xf32>
    tpu.vector_store %arg5[%c0_68, %c0_69, %c0_70], %59 {strides = array<i32>} : memref<1x1x8xf32, #tpu.memory_space<vmem>>, vector<1x1x8xf32>,
    return
  }
  func.func @transform_0(%arg0: i32) -> (i32, i32, i32, i32) {
    %c0_i32 = arith.constant 0 : i32
    %c0_i32_0 = arith.constant 0 : i32
    %c0_i32_1 = arith.constant 0 : i32
    %c0_i32_2 = arith.constant 0 : i32
    return %arg0, %c0_i32, %c0_i32_0, %c0_i32_1 : i32, i32, i32, i32
  }
  func.func @transform_1(%arg0: i32) -> (i32, i32) {
    %c0_i32 = arith.constant 0 : i32
    %c0_i32_0 = arith.constant 0 : i32
    %c0_i32_1 = arith.constant 0 : i32
    return %c0_i32, %c0_i32_0 : i32, i32
  }
  func.func @transform_2(%arg0: i32) -> (i32, i32, i32, i32) {
    %c0_i32 = arith.constant 0 : i32
    %c0_i32_0 = arith.constant 0 : i32
    %c0_i32_1 = arith.constant 0 : i32
    %c0_i32_2 = arith.constant 0 : i32
    return %arg0, %c0_i32, %c0_i32_0, %c0_i32_1 : i32, i32, i32, i32
  }
  func.func @transform_3(%arg0: i32) -> (i32, i32, i32) {
    %c0_i32 = arith.constant 0 : i32
    %c0_i32_0 = arith.constant 0 : i32
    %c0_i32_1 = arith.constant 0 : i32
    return %arg0, %c0_i32, %c0_i32_0 : i32, i32, i32
  }
  func.func @transform_4(%arg0: i32) -> (i32, i32, i32) {
    %c0_i32 = arith.constant 0 : i32
    %c0_i32_0 = arith.constant 0 : i32
    %c0_i32_1 = arith.constant 0 : i32
    return %arg0, %c0_i32, %c0_i32_0 : i32, i32, i32
  }
}

</mosaic_0001>

<bundles_post_ra>
// kernel: encoder_block_forward.2
= control target key start
LH: loop header
LB: loop body
LE: loop exit
PB: predicated region body
PF: predicated region fallthrough
CT: control target
= control target key end

     0   :  { %s1919_s15 = smov 0   ;;  %s2548_s0 = inlined_call_operand.vmem [shape: bf16[2,16,8,8], index: 0, kind: input, shape index: {}]   ;;  %s2549_s1 = inlined_call_operand.vmem [shape: bf16[36,8], index: 1, kind: input, shape index: {}]   ;;  %s2550_s2 = inlined_call_operand.vmem [shape: bf16[2,8,8,8], index: 2, kind: output, shape index: {0}]   ;;  %s2551_s3 = inlined_call_operand.vmem [shape: f32[2,1,8], index: 3, kind: output, shape index: {1}]   ;;  %s2552_s4 = inlined_call_operand.vmem [shape: f32[2,1,8], index: 4, kind: output, shape index: {2}]  }
   0x1 LB: > { %s1774_s16 = sadd.s32 4294967295, %s1882_s15   ;;  %p1778_p0 = scmp.ge.s32.totalorder %s1882_s15, 1  ;;  %s1882_s15 = sphi %s1919_s15, %s15_s15  }
   0x2   : > { %p167_p1 = scmp.lt.s32.totalorder %s1882_s15, 3 }
   0x4   : > { %p168_p2 = pnand %p1778_p0, %p167_p1 }
   0x5   : > { %p199_p3 = scmp.lt.s32.totalorder (!%p168_p2), %s1774_s16, 1  ;;  %s1885_s21 = smov (!%p168_p2), 124  }
   0x6   : > { %171 = sbr.rel (%p168_p2) target bundleno = 623 (0x26f), region = 28  ;;  %s1886_s22 = smov (!%p168_p2), 24  }
   0x7   : > { %s1887_s23 = smov (!%p168_p2), 4   ;;  %s1888_s24 = smov (!%p168_p2), 28  }
   0x8   : > { %s1889_s25 = smov (!%p168_p2), 8   ;;  %s1890_s26 = smov (!%p168_p2), 12  }
   0x9   : > { %s1891_s27 = smov (!%p168_p2), 20   ;;  %s1892_s28 = smov (!%p168_p2), 32  }
   0xa   : > { %s1893_s29 = smov (!%p168_p2), 16  }
   0xb   : > { %vm313_vm0 = vcmask 27648   ;;  %vm372_vm1 = vcmask 24576   ;;  %vm378_vm2 = vsmask.f32 256  ;;  %v386_v1 = vld [vmem:[#allocation2 + $0x10] sm:$0x1] }
   0xc   : > { %vm1928_vm3 = vmand %vm372_vm1, %vm378_vm2  ;;  %vm410_vm4 = vsmask.f32 7938  ;;  %v418_v2 = vld [vmem:[#allocation2 + $0x14] sm:$0x1]  ;;  %s2564_s16 = smov (!%p199_p3, %s1774_s16), 1  ;;  %v1884_v13 = vmov 0  }
   0xd   : > { %v387_v3 = vsel %vm1928_vm3, 0, %v386_v1  ;;  %vm1938_vm5 = vmand %vm372_vm1, %vm410_vm4  ;;  %v383_v5 = vld [vmem:[#allocation2 + $0x8] sm:$0x1]  ;;  %v415_v6 = vld [vmem:[#allocation2 + $0xc] sm:$0x1]  ;;  %s1820_s17 = sshll.u32 %s2564_s16, 6  ;;  %s211_s18 = scalar_lea.vmem %s2551_s3, %s2564_s16 }
   0xe   : > { %388 = vst [vmem:[#allocation2 + $0x10] sm:$0x1] %v387_v3  ;;  %v419_v7 = vsel %vm1938_vm5, 0, %v418_v2  ;;  %v384_v8 = vsel %vm1928_vm3, 0, %v383_v5  ;;  %v416_v9 = vsel %vm1938_vm5, 0, %v415_v6  ;;  %s1958_s20 = scalar_lea.vmem %s2548_s0, %s1820_s17  ;;  %vm785_vm9 = vcmask 1042432   ;;  %vm2105_vm12 = vmand %vm313_vm0, %vm410_vm4 }
   0xf   : > { %v389_v10 = vld [vmem:[#allocation2 + $0x18] sm:$0x1]  ;;  %420 = vst [vmem:[#allocation2 + $0x14] sm:$0x1] %v419_v7  ;;  %385 = vst [vmem:[#allocation2 + $0x8] sm:$0x1] %v384_v8 }
  0x10   : > { %417 = vst [vmem:[#allocation2 + $0xc] sm:$0x1] %v416_v9  ;;  %v390_v11 = vsel %vm1928_vm3, 0, %v389_v10  ;;  %v421_v12 = vld [vmem:[#allocation2 + $0x1c] sm:$0x1]  ;;  %vm786_vm10 = vcmask 1046532  }
  0x11   : > { %371 = vst.msk [vmem:[#allocation2] sm:$0xf] %vm313_vm0, %v1884_v13  ;;  %375 = vst.msk [vmem:[#allocation2 + $0x48] sm:$0xf] %vm313_vm0, %v1884_v13  ;;  %v422_v14 = vsel %vm1938_vm5, 0, %v421_v12  ;;  %vm744_vm13 = vcmask 60448  }
  0x12   : > { %373 = vst.msk [vmem:[#allocation2 + $0x4] sm:$0x1] %vm372_vm1, %v1884_v13  ;;  %376 = vst.msk [vmem:[#allocation2 + $0x4c] sm:$0x1] %vm372_vm1, %v1884_v13  ;;  %v1963_v15 = vld [vmem:[%s1958_s20 + $0x8] sm:$0xf] }
  0x13   : > { %391 = vst [vmem:[#allocation2 + $0x18] sm:$0x1] %v390_v11  ;;  %v1966_v16 = vld [vmem:[%s1958_s20] sm:$0xf]  ;;  %423 = vst [vmem:[#allocation2 + $0x1c] sm:$0x1] %v422_v14  ;;  %253 = vrot.lane.b32.xlu1 %v1963_v15, %s1885_s21 }
  0x14   : > { %249 = vrot.lane.b32.xlu0 %v1966_v16, %s1885_s21  ;;  %v1973_v17 = vld [vmem:[%s1958_s20 + $0xc] sm:$0xf]  ;;  %v1976_v18 = vld [vmem:[%s1958_s20 + $0x4] sm:$0xf]  ;;  %v1983_v19 = vld [vmem:[%s1958_s20 + $0x14] sm:$0xf] }
  0x15   : > { %v1986_v20 = vld [vmem:[%s1958_s20 + $0x10] sm:$0xf]  ;;  %v392_v21 = vld [vmem:[#allocation2 + $0x20] sm:$0x1]  ;;  %v1989_v22 = vld [vmem:[%s1958_s20 + $0x1c] sm:$0xf] }
  0x16   : > { %v1992_v23 = vld [vmem:[%s1958_s20 + $0x18] sm:$0xf]  ;;  %v393_v24 = vsel %vm1928_vm3, 0, %v392_v21  ;;  %v424_v25 = vld [vmem:[#allocation2 + $0x24] sm:$0x1]  ;;  %vm2078_vm11 = vmor %vm785_vm9, %vm786_vm10  ;;  %vm844_vm14 = vcmask 93248  }
  0x17   : > { %255 = vrot.lane.b32.xlu1 %v1973_v17, %s1885_s21  ;;  %v395_v26 = vld [vmem:[#allocation2 + $0x28] sm:$0x1]  ;;  %394 = vst [vmem:[#allocation2 + $0x20] sm:$0x1] %v393_v24  ;;  %v425_v27 = vsel %vm1938_vm5, 0, %v424_v25  ;;  %vm1529_vm15 = vcmask 1041408  }
  0x18   : > { %251 = vrot.lane.b32.xlu0 %v1976_v18, %s1885_s21  ;;  %v396_v28 = vsel %vm1928_vm3, 0, %v395_v26  ;;  %v427_v29 = vld [vmem:[#allocation2 + $0x2c] sm:$0x1]  ;;  %v407_v30 = vld [vmem:[#allocation2 + $0x48] sm:$0x1]  ;;  %vm1054_vm1 = vcmask 158848  }
  0x19   : > { %426 = vst [vmem:[#allocation2 + $0x24] sm:$0x1] %v425_v27  ;;  %397 = vst [vmem:[#allocation2 + $0x28] sm:$0x1] %v396_v28  ;;  %v428_v31 = vsel %vm1938_vm5, 0, %v427_v29  ;;  %v408_v32 = vsel %vm1928_vm3, 0, %v407_v30 }
  0x1a   : > { %v380_v33 = vld [vmem:[#allocation2] sm:$0x1]  ;;  %v412_v34 = vld [vmem:[#allocation2 + $0x4] sm:$0x1]  ;;  %429 = vst [vmem:[#allocation2 + $0x2c] sm:$0x1] %v428_v31 }
  0x1b   : > { %259 = vrot.lane.b32.xlu1 %v1983_v19, %s1885_s21  ;;  %409 = vst [vmem:[#allocation2 + $0x48] sm:$0x1] %v408_v32  ;;  %v381_v35 = vsel %vm1928_vm3, 0, %v380_v33  ;;  %v413_v36 = vsel %vm1938_vm5, 0, %v412_v34  ;;  %v398_v37 = vld [vmem:[#allocation2 + $0x30] sm:$0x1] }
  0x1c   : > { %257 = vrot.lane.b32.xlu0 %v1986_v20, %s1885_s21  ;;  %382 = vst [vmem:[#allocation2] sm:$0x1] %v381_v35  ;;  %414 = vst [vmem:[#allocation2 + $0x4] sm:$0x1] %v413_v36  ;;  %v430_v38 = vld [vmem:[#allocation2 + $0x34] sm:$0x1] }
  0x1d   : > { %v399_v39 = vsel %vm1928_vm3, 0, %v398_v37  ;;  %v431_v40 = vsel %vm1938_vm5, 0, %v430_v38  ;;  %v439_v41 = vld [vmem:[#allocation2 + $0x4c] sm:$0x1]  ;;  %v2021_v42 = vld [vmem:[%s1958_s20 + $0x24] sm:$0xf] }
  0x1e   : > { %v2024_v43 = vld [vmem:[%s1958_s20 + $0x20] sm:$0xf]  ;;  %400 = vst [vmem:[#allocation2 + $0x30] sm:$0x1] %v399_v39  ;;  %432 = vst [vmem:[#allocation2 + $0x34] sm:$0x1] %v431_v40 }
  0x1f   : > { %263 = vrot.lane.b32.xlu1 %v1989_v22, %s1885_s21  ;;  %v440_v44 = vsel %vm1938_vm5, 0, %v439_v41  ;;  %v401_v45 = vld [vmem:[#allocation2 + $0x38] sm:$0x1]  ;;  %v433_v46 = vld [vmem:[#allocation2 + $0x3c] sm:$0x1]  ;;  %vm1151_vm2 = vcmask 191648  }
  0x20   : > { %261 = vrot.lane.b32.xlu0 %v1992_v23, %s1885_s21  ;;  %441 = vst [vmem:[#allocation2 + $0x4c] sm:$0x1] %v440_v44  ;;  %v402_v47 = vsel %vm1928_vm3, 0, %v401_v45  ;;  %v434_v48 = vsel %vm1938_vm5, 0, %v433_v46  ;;  %v2037_v49 = vld [vmem:[%s1958_s20 + $0x2c] sm:$0xf] }
  0x21   : > { %403 = vst [vmem:[#allocation2 + $0x38] sm:$0x1] %v402_v47  ;;  %435 = vst [vmem:[#allocation2 + $0x3c] sm:$0x1] %v434_v48  ;;  %v2040_v50 = vld [vmem:[%s1958_s20 + $0x28] sm:$0xf] }
  0x22   : > { %v1224_v51 = vld [vmem:[#allocation2 + $0x48] sm:$0xf]  ;;  %v2047_v58 = vld [vmem:[%s1958_s20 + $0x34] sm:$0xf]  ;;  %vm605_vm6 = vsmask.f32 3328 }
  0x23   : > { %267 = vrot.lane.b32.xlu1 %v2021_v42, %s1885_s21  ;;  %v589_v52 = vld [vmem:[#allocation2] sm:$0xf]  ;;  %v590_v53 = vld [vmem:[#allocation2 + $0x4] sm:$0x1]  ;;  %v1325_v54 = vshrl.u32 %v1224_v51, 16  ;;  %v1328_v55 = vshll.u32 %v1224_v51, 16 }
  0x24   : > { %265 = vrot.lane.b32.xlu0 %v2024_v43, %s1885_s21  ;;  %v609_v56 = vshrl.u32 %v589_v52, 16  ;;  %v612_v57 = vshll.u32 %v589_v52, 16  ;;  %v618_v59 = vshll.u32 %v590_v53, 16  ;;  %v2050_v60 = vld [vmem:[%s1958_s20 + $0x30] sm:$0xf]  ;;  %vm1362_vm4 = vcmask 257248  }
  0x25   : > { %v1327_v63 = vrot.slane %v1325_v54, 4  ;;  %v1330_v1 = vrot.slane %v1328_v55, 5  ;;  %v404_v3 = vld [vmem:[#allocation2 + $0x40] sm:$0x1]  ;;  %v436_v5 = vld [vmem:[#allocation2 + $0x44] sm:$0x1] }
  0x26   : > { %v611_v61 = vrot.slane %v609_v56, 4  ;;  %v614_v62 = vrot.slane %v612_v57, 5  ;;  %vm606_vm7 = vsmask.f32 7440  ;;  %v405_v7 = vsel %vm1928_vm3, 0, %v404_v3  ;;  %s1821_s10 = sshll.u32 %s2564_s16, 5 }
  0x27   : > { %271 = vrot.lane.b32.xlu1 %v2037_v49, %s1885_s21  ;;  %v1225_v2 = vld [vmem:[#allocation2 + $0x4c] sm:$0x1]  ;;  %v437_v8 = vsel %vm1938_vm5, 0, %v436_v5  ;;  %v2061_v9 = vld [vmem:[%s1958_s20 + $0x3c] sm:$0xf]  ;;  %v620_v12 = vrot.slane %v618_v59, 5  ;;  %v1331_v13 = vor.u32 %v1330_v1, %v1327_v63  ;;  %vm2068_vm8 = vmor %vm605_vm6, %vm606_vm7  ;;  %s2503_s13 = scalar_lea.vmem %s2550_s2, %s1821_s10 }
  0x28   : > { %269 = vrot.lane.b32.xlu0 %v2040_v50, %s1885_s21  ;;  %v615_v6 = vor.u32 %v614_v62, %v611_v61  ;;  %v2064_v10 = vld [vmem:[%s1958_s20 + $0x38] sm:$0xf]  ;;  %406 = vst [vmem:[#allocation2 + $0x40] sm:$0x1] %v405_v7  ;;  %438 = vst [vmem:[#allocation2 + $0x44] sm:$0x1] %v437_v8 }
  0x29   : > { %v1334_v14 = vshll.u32 %v1225_v2, 16  ;;  %v753_v21 = vld [vmem:[#allocation2] sm:$0xe]  ;;  %v754_v24 = vld [vmem:[#allocation2 + $0x4] sm:$0x1]  ;;  %v1332_v28 = vrot.slane %v1331_v13, 4 }
  0x2a   : > { %v616_v11 = vrot.slane %v615_v6, 4  ;;  %v1783_v25 = vrot.slane %v753_v21, 9  ;;  %v1168_v26 = vld [vmem:[#allocation2 + $0x48] sm:$0xf]  ;;  %v790_v30 = vrot.slane %v754_v24, 5  ;;  %vm1459_vm5 = vcmask 290048  }
  0x2b   : > { %275 = vrot.lane.b32.xlu1 %v2047_v58, %s1885_s21  ;;  %v1336_v29 = vrot.slane %v1334_v14, 5  ;;  %v573_v37 = vld [vmem:[#allocation2] sm:$0xf]  ;;  %v531_v61 = vld [vmem:[#allocation2 + $0x10] sm:$0xf]  ;;  %vm1516_vm6 = vcmask 293888  }
  0x2c   : > { %273 = vrot.lane.b32.xlu0 %v2050_v60, %s1885_s21  ;;  %v621_v27 = vsel %vm2068_vm8, %v616_v11, %v620_v12  ;;  %v791_v33 = vsel %vm2078_vm11, %v1783_v25, %v790_v30  ;;  %581 = vst.msk [vmem:[#allocation3] sm:$0xf] %vm313_vm0, %v573_v37  ;;  %v534_v3 = vld [vmem:[#allocation2 + $0x14] sm:$0x1]  ;;  %v525_v5 = vld [vmem:[#allocation2 + $0x8] sm:$0xf] }
  0x2d   : > { %v1337_v32 = vsel %vm2068_vm8, %v1332_v28, %v1336_v29  ;;  %v528_v6 = vld [vmem:[#allocation2 + $0xc] sm:$0x1]  ;;  %v540_v37 = vld [vmem:[#allocation2 + $0x1c] sm:$0x1]  ;;  %vm1606_vm7 = vcmask 60416   ;;  %vm1637_vm9 = vcmask 57344  }
  0x2f   : > { %279 = vrot.lane.b32.xlu1 %v2061_v9, %s1885_s21 }
  0x30   : > { %277 = vrot.lane.b32.xlu0 %v2064_v10, %s1885_s21  ;;  %s214_s21 = scalar_lea.vmem %s2552_s4, %s2564_s16 }
  0x33   : > { %1191 = vrot.lane.b32.xlu1 %v1168_v26, %s1886_s22 }
  0x34   : > { %720 = vrot.lane.b32.xlu0 %v621_v27, %s1887_s23 }
  0x37   : > { %1352 = vrot.lane.b32.xlu1 %v1337_v32, %s1888_s24 }
  0x38   : > { %820 = vrot.lane.b32.xlu0 %v791_v33, %s1889_s25 }
  0x85   : > { %v254_v34 = vpop.permute.xlu1 %253 }
  0x86   : > { %v250_v35 = vpop.permute.xlu0 %249  ;;  %v299_v36 = vmax.bf16 %v254_v34, %v1963_v15 }
  0x87   : > { %v297_v38 = vmax.bf16 %v250_v35, %v1966_v16 }
  0x88   : > { %v323_v45 = vsel %vm313_vm0, %v299_v36, 4286644096  ;;  %v537_v36 = vld [vmem:[#allocation2 + $0x18] sm:$0xf] }
  0x89   : > { %v256_v39 = vpop.permute.xlu1 %255  ;;  %v316_v46 = vsel %vm313_vm0, %v297_v38, 4286644096 }
  0x8a   : > { %v252_v40 = vpop.permute.xlu0 %251  ;;  %v300_v41 = vmax.bf16 %v256_v39, %v1973_v17 }
  0x8b   : > { %v298_v44 = vmax.bf16 %v252_v40, %v1976_v18 }
  0x8c   : > { %v326_v47 = vsel %vm313_vm0, %v300_v41, 4286644096 }
  0x8d   : > { %v319_v48 = vsel %vm313_vm0, %v298_v44, 4286644096  ;;  %v328_v15 = vmax.bf16 %v326_v47, %v323_v45  ;;  %v260_v52 = vpop.permute.xlu1 %259 }
  0x8e   : > { %v321_v51 = vmax.bf16 %v319_v48, %v316_v46  ;;  %v258_v16 = vpop.permute.xlu0 %257  ;;  %v302_v53 = vmax.bf16 %v260_v52, %v1983_v19  ;;  %v546_v52 = vld [vmem:[#allocation2 + $0x24] sm:$0x1] }
  0x8f   : > { %v301_v54 = vmax.bf16 %v258_v16, %v1986_v20  ;;  %v451_v55 = vshrl.u32 %v328_v15, 16  ;;  %v454_v56 = vshll.u32 %v328_v15, 16 }
  0x90   : > { %v443_v17 = vshrl.u32 %v321_v51, 16  ;;  %v333_v18 = vsel %vm313_vm0, %v302_v53, 4286644096  ;;  %v446_v1 = vshll.u32 %v321_v51, 16  ;;  %v543_v51 = vld [vmem:[#allocation2 + $0x20] sm:$0xf] }
  0x91   : > { %v330_v57 = vsel %vm313_vm0, %v301_v54, 4286644096  ;;  %v453_v62 = vrot.slane %v451_v55, 7  ;;  %v264_v2 = vpop.permute.xlu1 %263 }
  0x92   : > { %v445_v63 = vrot.slane %v443_v17, 7  ;;  %v335_v19 = vmax.bf16 %v333_v18, %v330_v57  ;;  %v262_v20 = vpop.permute.xlu0 %261  ;;  %v304_v7 = vmax.bf16 %v264_v2, %v1989_v22 }
  0x93   : > { %v303_v8 = vmax.bf16 %v262_v20, %v1992_v23  ;;  %v456_v11 = vor.u32 %v454_v56, %v453_v62  ;;  %v457_v12 = vrot.slane %v453_v62, 4  ;;  %v549_v20 = vld [vmem:[#allocation2 + $0x28] sm:$0xf] }
  0x94   : > { %v448_v13 = vor.u32 %v446_v1, %v445_v63  ;;  %v449_v14 = vrot.slane %v445_v63, 4  ;;  %v459_v21 = vshrl.u32 %v335_v19, 16  ;;  %v462_v24 = vshll.u32 %v335_v19, 16 }
  0x95   : > { %v340_v25 = vsel %vm313_vm0, %v304_v7, 4286644096  ;;  %v337_v26 = vsel %vm313_vm0, %v303_v8, 4286644096  ;;  %v532_v27 = vsel %vm2105_vm12, %v456_v11, %v531_v61  ;;  %v535_v28 = vsel %vm1928_vm3, %v457_v12, %v534_v3  ;;  %v268_v29 = vpop.permute.xlu1 %267  ;;  %v552_v3 = vld [vmem:[#allocation2 + $0x2c] sm:$0x1] }
  0x96   : > { %v526_v22 = vsel %vm2105_vm12, %v448_v13, %v525_v5  ;;  %v529_v23 = vsel %vm1928_vm3, %v449_v14, %v528_v6  ;;  %v266_v30 = vpop.permute.xlu0 %265  ;;  %533 = vst [vmem:[#allocation2 + $0x10] sm:$0xf] %v532_v27  ;;  %536 = vst [vmem:[#allocation2 + $0x14] sm:$0x1] %v535_v28  ;;  %v461_v32 = vrot.slane %v459_v21, 7  ;;  %v342_v33 = vmax.bf16 %v340_v25, %v337_v26 }
  0x97   : > { %527 = vst [vmem:[#allocation2 + $0x8] sm:$0xf] %v526_v22  ;;  %530 = vst [vmem:[#allocation2 + $0xc] sm:$0x1] %v529_v23  ;;  %v306_v34 = vmax.bf16 %v268_v29, %v2021_v42  ;;  %v305_v35 = vmax.bf16 %v266_v30, %v2024_v43  ;;  %v555_v28 = vld [vmem:[#allocation2 + $0x30] sm:$0xf] }
  0x98   : > { %v464_v38 = vor.u32 %v462_v24, %v461_v32  ;;  %v465_v39 = vrot.slane %v461_v32, 4  ;;  %v467_v40 = vshrl.u32 %v342_v33, 16  ;;  %v470_v41 = vshll.u32 %v342_v33, 16  ;;  %v558_v22 = vld [vmem:[#allocation2 + $0x34] sm:$0x1] }
  0x99   : > { %v347_v44 = vsel %vm313_vm0, %v306_v34, 4286644096  ;;  %v344_v45 = vsel %vm313_vm0, %v305_v35, 4286644096  ;;  %v272_v46 = vpop.permute.xlu1 %271 }
  0x9a   : > { %v270_v47 = vpop.permute.xlu0 %269  ;;  %v538_v48 = vsel %vm2105_vm12, %v464_v38, %v537_v36  ;;  %v541_v42 = vsel %vm1928_vm3, %v465_v39, %v540_v37  ;;  %v469_v15 = vrot.slane %v467_v40, 7  ;;  %v349_v43 = vmax.bf16 %v347_v44, %v344_v45  ;;  %v561_v44 = vld [vmem:[#allocation2 + $0x38] sm:$0xf]  ;;  %v564_v45 = vld [vmem:[#allocation2 + $0x3c] sm:$0x1] }
  0x9b   : > { %539 = vst [vmem:[#allocation2 + $0x18] sm:$0xf] %v538_v48  ;;  %542 = vst [vmem:[#allocation2 + $0x1c] sm:$0x1] %v541_v42  ;;  %v308_v16 = vmax.bf16 %v272_v46, %v2037_v49  ;;  %v307_v53 = vmax.bf16 %v270_v47, %v2040_v50 }
  0x9c   : > { %v472_v54 = vor.u32 %v470_v41, %v469_v15  ;;  %v473_v55 = vrot.slane %v469_v15, 4  ;;  %v475_v17 = vshrl.u32 %v349_v43, 16  ;;  %v478_v56 = vshll.u32 %v349_v43, 16 }
  0x9d   : > { %v354_v18 = vsel %vm313_vm0, %v308_v16, 4286644096  ;;  %v351_v57 = vsel %vm313_vm0, %v307_v53, 4286644096  ;;  %v276_v61 = vpop.permute.xlu1 %275  ;;  %v854_v63 = vld [vmem:[#allocation2 + $0x10] sm:$0xf] }
  0x9e   : > { %v274_v62 = vpop.permute.xlu0 %273  ;;  %v544_v1 = vsel %vm2105_vm12, %v472_v54, %v543_v51  ;;  %v547_v19 = vsel %vm1928_vm3, %v473_v55, %v546_v52  ;;  %v477_v49 = vrot.slane %v475_v17, 7  ;;  %v356_v2 = vmax.bf16 %v354_v18, %v351_v57  ;;  %871 = vrot.lane.b32.xlu1 %v854_v63, %s1890_s26  ;;  %v853_v50 = vld [vmem:[#allocation2 + $0x8] sm:$0xf]  ;;  %v1161_v40 = vld [vmem:[#allocation2 + $0x10] sm:$0xf] }
  0x9f   : > { %545 = vst [vmem:[#allocation2 + $0x20] sm:$0xf] %v544_v1  ;;  %548 = vst [vmem:[#allocation2 + $0x24] sm:$0x1] %v547_v19  ;;  %v310_v5 = vmax.bf16 %v276_v61, %v2047_v58  ;;  %v309_v6 = vmax.bf16 %v274_v62, %v2050_v60  ;;  %869 = vrot.lane.b32.xlu0 %v853_v50, %s1890_s26  ;;  %v567_v54 = vld [vmem:[#allocation2 + $0x40] sm:$0xf] }
  0xa0   : > { %v480_v7 = vor.u32 %v478_v56, %v477_v49  ;;  %v481_v8 = vrot.slane %v477_v49, 4  ;;  %v483_v11 = vshrl.u32 %v356_v2, 16  ;;  %v486_v12 = vshll.u32 %v356_v2, 16  ;;  %v570_v55 = vld [vmem:[#allocation2 + $0x44] sm:$0x1] }
  0xa1   : > { %v361_v13 = vsel %vm313_vm0, %v310_v5, 4286644096  ;;  %v358_v14 = vsel %vm313_vm0, %v309_v6, 4286644096  ;;  %v280_v21 = vpop.permute.xlu1 %279  ;;  %v757_v19 = vld [vmem:[#allocation2 + $0x10] sm:$0xe] }
  0xa2   : > { %v278_v24 = vpop.permute.xlu0 %277  ;;  %v550_v25 = vsel %vm2105_vm12, %v480_v7, %v549_v20  ;;  %v553_v58 = vsel %vm1928_vm3, %v481_v8, %v552_v3  ;;  %v485_v26 = vrot.slane %v483_v11, 7  ;;  %v363_v60 = vmax.bf16 %v361_v13, %v358_v14  ;;  %v855_v27 = vld [vmem:[#allocation2 + $0x18] sm:$0xf]  ;;  %v758_v2 = vld [vmem:[#allocation2 + $0x14] sm:$0x1] }
  0xa3   : > { %551 = vst [vmem:[#allocation2 + $0x28] sm:$0xf] %v550_v25  ;;  %554 = vst [vmem:[#allocation2 + $0x2c] sm:$0x1] %v553_v58  ;;  %v312_v23 = vmax.bf16 %v280_v21, %v2061_v9  ;;  %v311_v29 = vmax.bf16 %v278_v24, %v2064_v10  ;;  %873 = vrot.lane.b32.xlu0 %v855_v27, %s1890_s26  ;;  %v1162_v53 = vld [vmem:[#allocation2 + $0x18] sm:$0xf] }
  0xa4   : > { %v488_v30 = vor.u32 %v486_v12, %v485_v26  ;;  %v489_v32 = vrot.slane %v485_v26, 4  ;;  %v491_v33 = vshrl.u32 %v363_v60, 16  ;;  %v494_v34 = vshll.u32 %v363_v60, 16  ;;  %v755_v0 = vld [vmem:[#allocation2 + $0x8] sm:$0xe] }
  0xa5   : > { %v368_v35 = vsel %vm313_vm0, %v312_v23, 4286644096  ;;  %v365_v36 = vsel %vm313_vm0, %v311_v29, 4286644096  ;;  %v756_v50 = vld [vmem:[#allocation2 + $0xc] sm:$0x1] }
  0xa6   : > { %v721_v37 = vpop.permute.xlu0 %720  ;;  %v556_v38 = vsel %vm2105_vm12, %v488_v30, %v555_v28  ;;  %v559_v9 = vsel %vm1928_vm3, %v489_v32, %v558_v22  ;;  %v493_v39 = vrot.slane %v491_v33, 7  ;;  %v370_v10 = vmax.bf16 %v368_v35, %v365_v36  ;;  %v856_v41 = vld [vmem:[#allocation2 + $0x20] sm:$0xf]  ;;  %v1063_v5 = vld [vmem:[#allocation2 + $0x8] sm:$0xe] }
  0xa7   : > { %745 = vst.msk [vmem:[#allocation3] sm:$0xf] %vm744_vm13, %v721_v37  ;;  %557 = vst [vmem:[#allocation2 + $0x30] sm:$0xf] %v556_v38  ;;  %1177 = vrot.lane.b32.xlu0 %v1161_v40, %s1886_s22  ;;  %875 = vrot.lane.b32.xlu1 %v856_v41, %s1890_s26  ;;  %v1163_v16 = vld [vmem:[#allocation2 + $0x20] sm:$0xf] }
  0xa8   : > { %560 = vst [vmem:[#allocation2 + $0x34] sm:$0x1] %v559_v9  ;;  %v496_v46 = vor.u32 %v494_v34, %v493_v39  ;;  %v497_v47 = vrot.slane %v493_v39, 4  ;;  %v499_v48 = vshrl.u32 %v370_v10, 16  ;;  %v502_v52 = vshll.u32 %v370_v10, 16 }
  0xa9   : > { %v1785_v20 = vrot.slane %v757_v19, 9  ;;  %v798_v3 = vrot.slane %v758_v2, 5  ;;  %v1064_v6 = vld [vmem:[#allocation2 + $0xc] sm:$0x1]  ;;  %v1784_v11 = vrot.slane %v755_v0, 9  ;;  %v794_v12 = vrot.slane %v756_v50, 5 }
  0xaa   : > { %v821_v42 = vpop.permute.xlu0 %820  ;;  %v562_v15 = vsel %vm2105_vm12, %v496_v46, %v561_v44  ;;  %v565_v43 = vsel %vm1928_vm3, %v497_v47, %v564_v45  ;;  %v501_v51 = vrot.slane %v499_v48, 7  ;;  %v1164_v61 = vld [vmem:[#allocation2 + $0x28] sm:$0xf]  ;;  %v759_v13 = vld [vmem:[#allocation2 + $0x18] sm:$0xe]  ;;  %v1791_v21 = vrot.slane %v1063_v5, 9 }
  0xab   : > { %845 = vst.msk [vmem:[#allocation3] sm:$0xf] %vm844_vm14, %v821_v42  ;;  %563 = vst [vmem:[#allocation2 + $0x38] sm:$0xf] %v562_v15  ;;  %1181 = vrot.lane.b32.xlu0 %v1163_v16, %s1886_s22  ;;  %1179 = vrot.lane.b32.xlu1 %v1162_v53, %s1886_s22  ;;  %v857_v62 = vld [vmem:[#allocation2 + $0x28] sm:$0xf]  ;;  %v799_v58 = vsel %vm2078_vm11, %v1785_v20, %v798_v3  ;;  %v795_v26 = vsel %vm2078_vm11, %v1784_v11, %v794_v12 }
  0xac   : > { %566 = vst [vmem:[#allocation2 + $0x3c] sm:$0x1] %v565_v43  ;;  %v504_v17 = vor.u32 %v502_v52, %v501_v51  ;;  %v505_v56 = vrot.slane %v501_v51, 4  ;;  %v760_v14 = vld [vmem:[#allocation2 + $0x1c] sm:$0x1]  ;;  %v1097_v24 = vrot.slane %v1064_v6, 5 }
  0xad   : > { %v1067_v25 = vld [vmem:[#allocation2 + $0x18] sm:$0xe]  ;;  %v1786_v60 = vrot.slane %v759_v13, 9  ;;  %v802_v27 = vrot.slane %v760_v14, 5  ;;  %v1068_v28 = vld [vmem:[#allocation2 + $0x1c] sm:$0x1] }
  0xae   : > { %v568_v18 = vsel %vm2105_vm12, %v504_v17, %v567_v54  ;;  %v571_v57 = vsel %vm1928_vm3, %v505_v56, %v570_v55  ;;  %v858_v63 = vld [vmem:[#allocation2 + $0x30] sm:$0xf]  ;;  %v1066_v23 = vld [vmem:[#allocation2 + $0x14] sm:$0x1]  ;;  %v1793_v29 = vrot.slane %v1067_v25, 9  ;;  %v1098_v32 = vsel %vm2078_vm11, %v1791_v21, %v1097_v24 }
  0xaf   : > { %569 = vst [vmem:[#allocation2 + $0x40] sm:$0xf] %v568_v18  ;;  %572 = vst [vmem:[#allocation2 + $0x44] sm:$0x1] %v571_v57  ;;  %1183 = vrot.lane.b32.xlu1 %v1164_v61, %s1886_s22  ;;  %877 = vrot.lane.b32.xlu0 %v857_v62, %s1890_s26  ;;  %v1165_v59 = vld [vmem:[#allocation2 + $0x30] sm:$0xf]  ;;  %v803_v36 = vsel %vm2078_vm11, %v1786_v60, %v802_v27 }
  0xb0   : > { %v1065_v22 = vld [vmem:[#allocation2 + $0x10] sm:$0xe]  ;;  %v1372_v33 = vld [vmem:[#allocation2 + $0x14] sm:$0x1]  ;;  %v1069_v34 = vld [vmem:[#allocation2 + $0x20] sm:$0xe] }
  0xb1   : > { %v1371_v30 = vld [vmem:[#allocation2 + $0x10] sm:$0xe]  ;;  %v1070_v35 = vld [vmem:[#allocation2 + $0x24] sm:$0x1]  ;;  %v1105_v37 = vrot.slane %v1068_v28, 5  ;;  %v1792_v38 = vrot.slane %v1065_v22, 9 }
  0xb2   : > { %v859_v1 = vld [vmem:[#allocation2 + $0x38] sm:$0xf]  ;;  %v1101_v9 = vrot.slane %v1066_v23, 5  ;;  %v1375_v39 = vld [vmem:[#allocation2 + $0x20] sm:$0xe]  ;;  %v1799_v10 = vrot.slane %v1371_v30, 9 }
  0xb3   : > { %879 = vrot.lane.b32.xlu1 %v858_v63, %s1890_s26  ;;  %881 = vrot.lane.b32.xlu0 %v859_v1, %s1890_s26  ;;  %v1166_v8 = vld [vmem:[#allocation2 + $0x38] sm:$0xf]  ;;  %v1405_v40 = vrot.slane %v1372_v33, 5  ;;  %v1794_v41 = vrot.slane %v1069_v34, 9  ;;  %v1109_v44 = vrot.slane %v1070_v35, 5  ;;  %v1801_v46 = vrot.slane %v1375_v39, 9 }
  0xb4   : > { %v1376_v45 = vld [vmem:[#allocation2 + $0x24] sm:$0x1]  ;;  %v1373_v47 = vld [vmem:[#allocation2 + $0x18] sm:$0xe]  ;;  %v1106_v48 = vsel %vm2078_vm11, %v1793_v29, %v1105_v37  ;;  %v1102_v42 = vsel %vm2078_vm11, %v1792_v38, %v1101_v9  ;;  %v1374_v15 = vld [vmem:[#allocation2 + $0x1c] sm:$0x1] }
  0xb5   : > { %v761_v43 = vld [vmem:[#allocation2 + $0x20] sm:$0xe]  ;;  %v762_v51 = vld [vmem:[#allocation2 + $0x24] sm:$0x1]  ;;  %v1377_v52 = vld [vmem:[#allocation2 + $0x28] sm:$0xe]  ;;  %v1406_v54 = vsel %vm2078_vm11, %v1799_v10, %v1405_v40  ;;  %v1110_v55 = vsel %vm2078_vm11, %v1794_v41, %v1109_v44 }
  0xb6   : > { %v860_v49 = vld [vmem:[#allocation2 + $0x40] sm:$0xf]  ;;  %v1378_v16 = vld [vmem:[#allocation2 + $0x2c] sm:$0x1]  ;;  %v765_v53 = vld [vmem:[#allocation2 + $0x30] sm:$0xe] }
  0xb7   : > { %1185 = vrot.lane.b32.xlu0 %v1165_v59, %s1886_s22  ;;  %883 = vrot.lane.b32.xlu1 %v860_v49, %s1890_s26  ;;  %v1167_v7 = vld [vmem:[#allocation2 + $0x40] sm:$0xf]  ;;  %v766_v17 = vld [vmem:[#allocation2 + $0x34] sm:$0x1]  ;;  %v763_v56 = vld [vmem:[#allocation2 + $0x28] sm:$0xe] }
  0xb8   : > { %v593_v18 = vld [vmem:[#allocation2 + $0x10] sm:$0xf]  ;;  %v1413_v57 = vrot.slane %v1376_v45, 5  ;;  %v1800_v61 = vrot.slane %v1373_v47, 9  ;;  %v1409_v62 = vrot.slane %v1374_v15, 5  ;;  %v1787_v63 = vrot.slane %v761_v43, 9 }
  0xb9   : > { %v806_v1 = vrot.slane %v762_v51, 5  ;;  %v1802_v19 = vrot.slane %v1377_v52, 9  ;;  %v1417_v59 = vrot.slane %v1378_v16, 5  ;;  %v1789_v49 = vrot.slane %v765_v53, 9  ;;  %v764_v0 = vld [vmem:[#allocation2 + $0x2c] sm:$0x1] }
  0xba   : > { %v814_v2 = vrot.slane %v766_v17, 5  ;;  %v1788_v50 = vrot.slane %v763_v56, 9  ;;  %v637_v20 = vshrl.u32 %v593_v18, 16  ;;  %v640_v3 = vshll.u32 %v593_v18, 16  ;;  %v1071_v5 = vld [vmem:[#allocation2 + $0x28] sm:$0xe] }
  0xbb   : > { %1189 = vrot.lane.b32.xlu0 %v1167_v7, %s1886_s22  ;;  %1187 = vrot.lane.b32.xlu1 %v1166_v8, %s1886_s22  ;;  %v1072_v6 = vld [vmem:[#allocation2 + $0x2c] sm:$0x1]  ;;  %v594_v7 = vld [vmem:[#allocation2 + $0x14] sm:$0x1]  ;;  %v767_v8 = vld [vmem:[#allocation2 + $0x38] sm:$0xe]  ;;  %v1414_v13 = vsel %vm2078_vm11, %v1801_v46, %v1413_v57  ;;  %v1410_v14 = vsel %vm2078_vm11, %v1800_v61, %v1409_v62  ;;  %v807_v21 = vsel %vm2078_vm11, %v1787_v63, %v806_v1 }
  0xbc   : > { %v768_v11 = vld [vmem:[#allocation2 + $0x3c] sm:$0x1]  ;;  %v2202_v12 = vld [vmem:[#allocation2 + $0x38] sm:$0xe]  ;;  %v2212_v25 = vld [vmem:[#allocation2 + $0x30] sm:$0xe]  ;;  %v1418_v9 = vsel %vm2078_vm11, %v1802_v19, %v1417_v59  ;;  %v815_v39 = vsel %vm2078_vm11, %v1789_v49, %v814_v2 }
  0xbd   : > { %v2210_v24 = vld [vmem:[#allocation2 + $0x3c] sm:$0x1]  ;;  %v2216_v60 = vld [vmem:[#allocation2 + $0x34] sm:$0x1]  ;;  %v639_v27 = vrot.slane %v637_v20, 4  ;;  %v642_v28 = vrot.slane %v640_v3, 5 }
  0xbe   : > { %v646_v22 = vshll.u32 %v594_v7, 16  ;;  %v1795_v23 = vrot.slane %v1071_v5, 9  ;;  %v1113_v29 = vrot.slane %v1072_v6, 5  ;;  %v1790_v30 = vrot.slane %v767_v8, 9  ;;  %v2218_v33 = vld [vmem:[#allocation2 + $0x40] sm:$0xe] }
  0xbf   : > { %824 = vrot.lane.b32.xlu0 %v799_v58, %s1889_s25  ;;  %822 = vrot.lane.b32.xlu1 %v795_v26, %s1889_s25  ;;  %v902_v58 = vld [vmem:[#allocation2 + $0x8] sm:$0xf]  ;;  %v810_v26 = vrot.slane %v764_v0, 5  ;;  %v1797_v34 = vrot.slane %v2202_v12, 9  ;;  %v1121_v35 = vrot.slane %v2210_v24, 5  ;;  %v1796_v10 = vrot.slane %v2212_v25, 9 }
  0xc0   : > { %v922_v37 = vshll.u32 %v902_v58, 16  ;;  %v591_v38 = vld [vmem:[#allocation2 + $0x8] sm:$0xf]  ;;  %v1117_v40 = vrot.slane %v2216_v60, 5  ;;  %v2228_v41 = vld [vmem:[#allocation2 + $0x44] sm:$0x1]  ;;  %v643_v46 = vor.u32 %v642_v28, %v639_v27  ;;  %v1114_v43 = vsel %vm2078_vm11, %v1795_v23, %v1113_v29 }
  0xc1   : > { %v906_v44 = vld [vmem:[#allocation2 + $0x18] sm:$0xf]  ;;  %v811_v45 = vsel %vm2078_vm11, %v1788_v50, %v810_v26  ;;  %v2234_v47 = vrot.slane %v646_v22, 5  ;;  %v1210_v15 = vld [vmem:[#allocation2 + $0x10] sm:$0xf]  ;;  %v623_v53 = vshrl.u32 %v591_v38, 16 }
  0xc2   : > { %v903_v52 = vld [vmem:[#allocation2 + $0xc] sm:$0x1]  ;;  %v924_v17 = vrot.slane %v922_v37, 5  ;;  %v947_v56 = vshrl.u32 %v906_v44, 16  ;;  %v950_v18 = vshll.u32 %v906_v44, 16  ;;  %v1227_v1 = vshrl.u32 %v1210_v15, 16 }
  0xc3   : > { %1127 = vrot.lane.b32.xlu0 %v1098_v32, %s1891_s27  ;;  %826 = vrot.lane.b32.xlu1 %v803_v36, %s1889_s25  ;;  %v818_v32 = vrot.slane %v768_v11, 5  ;;  %v919_v36 = vshrl.u32 %v902_v58, 16  ;;  %v592_v16 = vld [vmem:[#allocation2 + $0xc] sm:$0x1]  ;;  %v904_v57 = vld [vmem:[#allocation2 + $0x10] sm:$0xf]  ;;  %v1122_v58 = vsel %vm2078_vm11, %v1797_v34, %v1121_v35  ;;  %v1118_v22 = vsel %vm2078_vm11, %v1796_v10, %v1117_v40 }
  0xc4   : > { %v907_v61 = vld [vmem:[#allocation2 + $0x1c] sm:$0x1]  ;;  %v1230_v19 = vshll.u32 %v1210_v15, 16  ;;  %v644_v59 = vrot.slane %v643_v46, 4  ;;  %v1125_v49 = vrot.slane %v2228_v41, 5  ;;  %v928_v2 = vshll.u32 %v903_v52, 16 }
  0xc5   : > { %v819_v51 = vsel %vm2078_vm11, %v1790_v30, %v818_v32  ;;  %v632_v0 = vshll.u32 %v592_v16, 16  ;;  %v625_v50 = vrot.slane %v623_v53, 4  ;;  %v596_v3 = vld [vmem:[#allocation2 + $0x1c] sm:$0x1]  ;;  %v933_v5 = vshrl.u32 %v904_v57, 16 }
  0xc6   : > { %v936_v6 = vshll.u32 %v904_v57, 16  ;;  %v949_v8 = vrot.slane %v947_v56, 4  ;;  %v952_v11 = vrot.slane %v950_v18, 5  ;;  %v956_v12 = vshll.u32 %v907_v61, 16  ;;  %v905_v27 = vld [vmem:[#allocation2 + $0x14] sm:$0x1] }
  0xc7   : > { %1131 = vrot.lane.b32.xlu0 %v1106_v48, %s1891_s27  ;;  %1129 = vrot.lane.b32.xlu1 %v1102_v42, %s1891_s27  ;;  %v1798_v48 = vrot.slane %v2218_v33, 9  ;;  %v595_v42 = vld [vmem:[#allocation2 + $0x18] sm:$0xf]  ;;  %v1229_v24 = vrot.slane %v1227_v1, 4  ;;  %v1232_v25 = vrot.slane %v1230_v19, 5  ;;  %v2248_v26 = vrot.slane %v928_v2, 5 }
  0xc8   : > { %v651_v62 = vshrl.u32 %v595_v42, 16  ;;  %v654_v63 = vshll.u32 %v595_v42, 16  ;;  %v660_v60 = vshll.u32 %v596_v3, 16  ;;  %v1214_v28 = vld [vmem:[#allocation2 + $0x20] sm:$0xf]  ;;  %v935_v29 = vrot.slane %v933_v5, 4 }
  0xc9   : > { %v938_v30 = vrot.slane %v936_v6, 5  ;;  %v1215_v32 = vld [vmem:[#allocation2 + $0x24] sm:$0x1]  ;;  %v2252_v41 = vrot.slane %v956_v12, 5  ;;  %v1233_v35 = vor.u32 %v1232_v25, %v1229_v24  ;;  %v942_v44 = vshll.u32 %v905_v27, 16 }
  0xca   : > { %v1258_v10 = vshll.u32 %v1214_v28, 16  ;;  %v1264_v40 = vshll.u32 %v1215_v32, 16  ;;  %v597_v42 = vld [vmem:[#allocation2 + $0x20] sm:$0xf]  ;;  %v2258_v52 = vld [vmem:[#allocation2 + $0x24] sm:$0x1]  ;;  %v649_v53 = vsel %vm2068_vm8, %v644_v59, %v2234_v47 }
  0xcb   : > { %1435 = vrot.lane.b32.xlu0 %v1406_v54, %s1892_s28  ;;  %1133 = vrot.lane.b32.xlu1 %v1110_v55, %s1891_s27  ;;  %v626_v54 = vshll.u32 %v591_v38, 16  ;;  %v921_v55 = vrot.slane %v919_v36, 4  ;;  %v908_v36 = vld [vmem:[#allocation2 + $0x20] sm:$0xf]  ;;  %v634_v38 = vrot.slane %v632_v0, 5  ;;  %v2271_v61 = vrot.slane %v1233_v35, 4 }
  0xcc   : > { %v961_v46 = vshrl.u32 %v908_v36, 16  ;;  %v964_v16 = vshll.u32 %v908_v36, 16  ;;  %v2269_v56 = vld [vmem:[#allocation2 + $0x24] sm:$0x1]  ;;  %v1212_v18 = vld [vmem:[#allocation2 + $0x18] sm:$0xf] }
  0xcd   : > { %v628_v20 = vrot.slane %v626_v54, 5  ;;  %v925_v7 = vor.u32 %v924_v17, %v921_v55  ;;  %v1126_v54 = vsel %vm2078_vm11, %v1798_v48, %v1125_v49  ;;  %v601_v1 = vld [vmem:[#allocation2 + $0x30] sm:$0xf]  ;;  %v1260_v47 = vrot.slane %v1258_v10, 5  ;;  %v1213_v59 = vld [vmem:[#allocation2 + $0x1c] sm:$0x1] }
  0xce   : > { %v2277_v48 = vrot.slane %v1264_v40, 5  ;;  %v963_v19 = vrot.slane %v961_v46, 4  ;;  %v966_v2 = vrot.slane %v964_v16, 5  ;;  %v668_v0 = vshll.u32 %v597_v42, 16  ;;  %v576_v24 = vld [vmem:[#allocation2 + $0x18] sm:$0xf] }
  0xcf   : > { %1439 = vrot.lane.b32.xlu0 %v1414_v13, %s1892_s28  ;;  %1437 = vrot.lane.b32.xlu1 %v1410_v14, %s1892_s28  ;;  %v653_v13 = vrot.slane %v651_v62, 4  ;;  %v656_v14 = vrot.slane %v654_v63, 5  ;;  %v629_v23 = vor.u32 %v628_v20, %v625_v50  ;;  %v926_v37 = vrot.slane %v925_v7, 4  ;;  %v1216_v20 = vld [vmem:[#allocation2 + $0x28] sm:$0xf] }
  0xd0   : > { %v2273_v62 = vrot.slane %v942_v44, 5  ;;  %v665_v63 = vshrl.u32 %v597_v42, 16  ;;  %v1241_v50 = vshrl.u32 %v1212_v18, 16  ;;  %v970_v3 = vshll.u32 %v2258_v52, 16  ;;  %v599_v27 = vld [vmem:[#allocation2 + $0x28] sm:$0xf] }
  0xd1   : > { %v657_v34 = vor.u32 %v656_v14, %v653_v13  ;;  %v630_v15 = vrot.slane %v629_v23, 4  ;;  %v1244_v5 = vshll.u32 %v1212_v18, 16  ;;  %v693_v6 = vshrl.u32 %v601_v1, 16  ;;  %584 = vst.msk [vmem:[#allocation3 + $0xc] sm:$0xf] %vm313_vm0, %v576_v24 }
  0xd2   : > { %v696_v7 = vshll.u32 %v601_v1, 16  ;;  %v2287_v13 = vrot.slane %v665_v63, 4  ;;  %v674_v14 = vshll.u32 %v2269_v56, 16  ;;  %v670_v23 = vrot.slane %v668_v0, 5  ;;  %v579_v32 = vld [vmem:[#allocation2 + $0x30] sm:$0xf] }
  0xd3   : > { %828 = vrot.lane.b32.xlu0 %v807_v21, %s1889_s25  ;;  %1441 = vrot.lane.b32.xlu1 %v1418_v9, %s1892_s28  ;;  %v1211_v21 = vld [vmem:[#allocation2 + $0x14] sm:$0x1]  ;;  %v953_v9 = vor.u32 %v952_v11, %v949_v8  ;;  %v658_v57 = vrot.slane %v657_v34, 4  ;;  %v575_v8 = vld [vmem:[#allocation2 + $0x10] sm:$0xf]  ;;  %v931_v11 = vsel %vm2068_vm8, %v926_v37, %v2248_v26  ;;  %v635_v12 = vsel %vm2068_vm8, %v630_v15, %v634_v38 }
  0xd4   : > { %583 = vst.msk [vmem:[#allocation3 + $0x8] sm:$0xf] %vm313_vm0, %v575_v8  ;;  %v1246_v36 = vrot.slane %v1244_v5, 5  ;;  %v695_v37 = vrot.slane %v693_v6, 4  ;;  %v698_v38 = vrot.slane %v696_v7, 5  ;;  %v679_v44 = vshrl.u32 %v599_v27, 16 }
  0xd5   : > { %v954_v55 = vrot.slane %v953_v9, 4  ;;  %v1269_v9 = vshrl.u32 %v1216_v20, 16  ;;  %587 = vst.msk [vmem:[#allocation3 + $0x18] sm:$0xf] %vm313_vm0, %v579_v32  ;;  %v602_v42 = vld [vmem:[#allocation2 + $0x34] sm:$0x1]  ;;  %v671_v52 = vor.u32 %v670_v23, %v2287_v13 }
  0xd6   : > { %v682_v15 = vshll.u32 %v599_v27, 16  ;;  %v676_v16 = vrot.slane %v674_v14, 5  ;;  %v699_v56 = vor.u32 %v698_v38, %v695_v37  ;;  %v911_v63 = vld [vmem:[#allocation2 + $0x2c] sm:$0x1]  ;;  %v912_v14 = vld [vmem:[#allocation2 + $0x30] sm:$0xf] }
  0xd7   : > { %832 = vrot.lane.b32.xlu0 %v815_v39, %s1889_s25  ;;  %830 = vrot.lane.b32.xlu1 %v811_v45, %s1889_s25  ;;  %v1236_v39 = vshll.u32 %v1211_v21, 16  ;;  %v1255_v45 = vshrl.u32 %v1214_v28, 16  ;;  %v574_v21 = vld [vmem:[#allocation2 + $0x8] sm:$0xf]  ;;  %v959_v25 = vsel %vm2068_vm8, %v954_v55, %v2252_v41  ;;  %v577_v28 = vld [vmem:[#allocation2 + $0x20] sm:$0xf] }
  0xd8   : > { %582 = vst.msk [vmem:[#allocation3 + $0x4] sm:$0xf] %vm313_vm0, %v574_v21  ;;  %585 = vst.msk [vmem:[#allocation3 + $0x10] sm:$0xf] %vm313_vm0, %v577_v28  ;;  %v1272_v41 = vshll.u32 %v1216_v20, 16  ;;  %v1271_v18 = vrot.slane %v1269_v9, 4 }
  0xd9   : > { %v2267_v17 = vrot.slane %v1236_v39, 5  ;;  %v1257_v33 = vrot.slane %v1255_v45, 4  ;;  %v578_v39 = vld [vmem:[#allocation2 + $0x28] sm:$0xf]  ;;  %v580_v45 = vld [vmem:[#allocation2 + $0x38] sm:$0xf] }
  0xda   : > { %586 = vst.msk [vmem:[#allocation3 + $0x14] sm:$0xf] %vm313_vm0, %v578_v39  ;;  %588 = vst.msk [vmem:[#allocation3 + $0x1c] sm:$0xf] %vm313_vm0, %v580_v45  ;;  %v672_v5 = vrot.slane %v671_v52, 4  ;;  %v700_v7 = vrot.slane %v699_v56, 4 }
  0xdb   : > { %1135 = vrot.lane.b32.xlu0 %v1114_v43, %s1891_s27  ;;  %834 = vrot.lane.b32.xlu1 %v819_v51, %s1889_s25  ;;  %v2256_v43 = vrot.slane %v660_v60, 5  ;;  %v939_v51 = vor.u32 %v938_v30, %v935_v29  ;;  %v1261_v26 = vor.u32 %v1260_v47, %v1257_v33  ;;  %v910_v60 = vld [vmem:[#allocation2 + $0x28] sm:$0xf]  ;;  %v1243_v29 = vrot.slane %v1241_v50, 4  ;;  %v600_v24 = vld [vmem:[#allocation2 + $0x2c] sm:$0x1] }
  0xdc   : > { %v1250_v30 = vshll.u32 %v1213_v59, 16  ;;  %v975_v34 = vshrl.u32 %v910_v60, 16  ;;  %v978_v35 = vshll.u32 %v910_v60, 16  ;;  %v1239_v10 = vsel %vm2068_vm8, %v2271_v61, %v2267_v17  ;;  %v1217_v17 = vld [vmem:[#allocation2 + $0x2c] sm:$0x1] }
  0xdd   : > { %v2279_v49 = vrot.slane %v939_v51, 4  ;;  %v1262_v46 = vrot.slane %v1261_v26, 4  ;;  %v972_v51 = vrot.slane %v970_v3, 5  ;;  %v1274_v61 = vrot.slane %v1272_v41, 5  ;;  %v1870_v21 = vld [vmem:[%s2549_s1 + $0x8] sm:$0xff]  }
  0xde   : > { %v1252_v55 = vrot.slane %v1250_v30, 5  ;;  %v980_v1 = vrot.slane %v978_v35, 5  ;;  %v681_v33 = vrot.slane %v679_v44, 4  ;;  %v702_v50 = vshll.u32 %v602_v42, 16  ;;  %v1222_v41 = vld [vmem:[#allocation2 + $0x40] sm:$0xf] }
  0xdf   : > { %1139 = vrot.lane.b32.xlu0 %v1122_v58, %s1891_s27  ;;  %1137 = vrot.lane.b32.xlu1 %v1118_v22, %s1891_s27  ;;  %v663_v58 = vsel %vm2068_vm8, %v658_v57, %v2256_v43  ;;  %v967_v22 = vor.u32 %v966_v2, %v963_v19  ;;  %v945_v40 = vsel %vm2068_vm8, %v2279_v49, %v2273_v62  ;;  %v603_v57 = vld [vmem:[#allocation2 + $0x38] sm:$0xf]  ;;  %v977_v62 = vrot.slane %v975_v34, 4  ;;  %v1869_v2 = vld [vmem:[%s2549_s1 + $0x10] ss:$0 sps:$4 sm:$0x33]  }
  0xe0   : > { %v1267_v47 = vsel %vm2068_vm8, %v1262_v46, %v2277_v48  ;;  %v684_v19 = vrot.slane %v682_v15, 5  ;;  %v707_v20 = vshrl.u32 %v603_v57, 16  ;;  %v710_v3 = vshll.u32 %v603_v57, 16  ;;  %1849 = vmatprep.subr.msk.bf16.mxu0 %vm1529_vm15, %v1869_v2  ;;  %1850 = vmatprep.subr.msk.bf16.mxu1 %vm1529_vm15, %v1869_v2  ;;  %v1871_v34 = vld [vmem:[%s2549_s1] sm:$0xff]   ;;  %v915_v46 = vld [vmem:[#allocation2 + $0x3c] sm:$0x1] }
  0xe1   : > { %v968_v43 = vrot.slane %v967_v22, 4  ;;  %v1278_v8 = vshll.u32 %v1217_v17, 16  ;;  %v981_v48 = vor.u32 %v980_v1, %v977_v62  ;;  %v984_v13 = vshll.u32 %v911_v63, 16  ;;  %v604_v15 = vld [vmem:[#allocation2 + $0x3c] sm:$0x1] }
  0xe2   : > { %v1531_v60 = vsel %vm1529_vm15, %v1869_v2, 0  ;;  %v709_v27 = vrot.slane %v707_v20, 4  ;;  %v712_v28 = vrot.slane %v710_v3, 5  ;;  %v704_v30 = vrot.slane %v702_v50, 5  ;;  %v1220_v62 = vld [vmem:[#allocation2 + $0x38] sm:$0xf] }
  0xe3   : > { %724 = vrot.lane.b32.xlu0 %v649_v53, %s1887_s23  ;;  %1141 = vrot.lane.b32.xlu1 %v1126_v54, %s1891_s27  ;;  %v914_v53 = vld [vmem:[#allocation2 + $0x38] sm:$0xf]  ;;  %v1247_v54 = vor.u32 %v1246_v36, %v1243_v29  ;;  %v973_v0 = vsel %vm2068_vm8, %v968_v43, %v972_v51  ;;  %v677_v29 = vsel %vm2068_vm8, %v672_v5, %v676_v16  ;;  %v989_v32 = vshrl.u32 %v912_v14, 16  ;;  %v913_v2 = vld [vmem:[#allocation2 + $0x34] sm:$0x1] }
  0xe4   : > { %v1003_v59 = vshrl.u32 %v914_v53, 16  ;;  %v1006_v49 = vshll.u32 %v914_v53, 16  ;;  %v992_v36 = vshll.u32 %v912_v14, 16  ;;  %1830 = vmatpush3.bf16.msra.mxu0 %v1531_v60  ;;  %1846 = vmatpush3.bf16.msra.mxu1 %v1531_v60  ;;  %v1280_v9 = vrot.slane %v1278_v8, 5 }
  0xe5   : > { %v1248_v6 = vrot.slane %v1247_v54, 4  ;;  %v688_v39 = vshll.u32 %v600_v24, 16  ;;  %1831 = vmatprep.subr.bf16.mxu0 %v1870_v21  ;;  %1844 = vmatprep.subr.bf16.mxu1 %v1870_v21  ;;  %v705_v35 = vsel %vm2068_vm8, %v700_v7, %v704_v30  ;;  %v982_v44 = vrot.slane %v981_v48, 4  ;;  %v1223_v24 = vld [vmem:[#allocation2 + $0x44] sm:$0x1] }
  0xe6   : > { %v1008_v26 = vrot.slane %v1006_v49, 5  ;;  %v986_v45 = vrot.slane %v984_v13, 5  ;;  %v713_v43 = vor.u32 %v712_v28, %v709_v27  ;;  %v991_v16 = vrot.slane %v989_v32, 4 }
  0xe7   : > { %1030 = vrot.lane.b32.xlu0 %v931_v11, %s1893_s29  ;;  %722 = vrot.lane.b32.xlu1 %v635_v12, %s1887_s23  ;;  %v1218_v11 = vld [vmem:[#allocation2 + $0x30] sm:$0xf]  ;;  %v1275_v12 = vor.u32 %v1274_v61, %v1271_v18  ;;  %v1253_v37 = vsel %vm2068_vm8, %v1248_v6, %v1252_v55  ;;  %v994_v53 = vrot.slane %v992_v36, 5  ;;  %v1311_v54 = vshrl.u32 %v1222_v41, 16  ;;  %v1221_v36 = vld [vmem:[#allocation2 + $0x3c] sm:$0x1] }
  0xe8   : > { %v1283_v22 = vshrl.u32 %v1218_v11, 16  ;;  %v1286_v23 = vshll.u32 %v1218_v11, 16  ;;  %v1314_v55 = vshll.u32 %v1222_v41, 16  ;;  %1832 = vmatpush3.bf16.msra.mxu0 %v1870_v21  ;;  %1847 = vmatpush3.bf16.msra.mxu1 %v1870_v21  ;;  %v690_v17 = vrot.slane %v688_v39, 5  ;;  %v1379_v39 = vld [vmem:[#allocation2 + $0x30] sm:$0xe] }
  0xe9   : > { %v1276_v38 = vrot.slane %v1275_v12, 4  ;;  %1833 = vmatprep.subr.bf16.mxu0 %v1871_v34  ;;  %1845 = vmatprep.subr.bf16.mxu1 %v1871_v34  ;;  %v1012_v61 = vshll.u32 %v915_v46, 16  ;;  %v716_v63 = vshll.u32 %v604_v15, 16  ;;  %v987_v1 = vsel %vm2068_vm8, %v982_v44, %v986_v45  ;;  %v1380_v41 = vld [vmem:[#allocation2 + $0x34] sm:$0x1] }
  0xea   : > { %v1285_v51 = vrot.slane %v1283_v22, 4  ;;  %v1288_v52 = vrot.slane %v1286_v23, 5  ;;  %v1313_v50 = vrot.slane %v1311_v54, 4  ;;  %v1316_v20 = vrot.slane %v1314_v55, 5 }
  0xeb   : > { %1034 = vrot.lane.b32.xlu0 %v959_v25, %s1893_s29  ;;  %726 = vrot.lane.b32.xlu1 %v663_v58, %s1887_s23  ;;  %v685_v25 = vor.u32 %v684_v19, %v681_v33  ;;  %v1005_v58 = vrot.slane %v1003_v59, 4  ;;  %v1281_v56 = vsel %vm2068_vm8, %v1276_v38, %v1280_v9  ;;  %v714_v19 = vrot.slane %v713_v43, 4  ;;  %v1219_v59 = vld [vmem:[#allocation2 + $0x34] sm:$0x1] }
  0xec   : > { %v1289_v49 = vor.u32 %v1288_v52, %v1285_v51  ;;  %1834 = vmatpush3.bf16.msra.mxu0 %v1871_v34  ;;  %1848 = vmatpush3.bf16.msra.mxu1 %v1871_v34  ;;  %v1297_v6 = vshrl.u32 %v1220_v62, 16  ;;  %v1300_v7 = vshll.u32 %v1220_v62, 16  ;;  %v1014_v8 = vrot.slane %v1012_v61, 5  ;;  %v1383_v51 = vld [vmem:[#allocation2 + $0x40] sm:$0xe] }
  0xed   : > { %v1009_v42 = vor.u32 %v1008_v26, %v1005_v58  ;;  %v718_v11 = vrot.slane %v716_v63, 5  ;;  %v1292_v12 = vshll.u32 %v1219_v59, 16  ;;  %v998_v48 = vshll.u32 %v913_v2, 16  ;;  %v917_v58 = vld [vmem:[#allocation2 + $0x44] sm:$0x1] }
  0xee   : > { %v1290_v21 = vrot.slane %v1289_v49, 4  ;;  %v1299_v27 = vrot.slane %v1297_v6, 4  ;;  %v1302_v28 = vrot.slane %v1300_v7, 5  ;;  %v1026_v30 = vshll.u32 %v917_v58, 16  ;;  %v1384_v52 = vld [vmem:[#allocation2 + $0x44] sm:$0x1] }
  0xef   : > { %1338 = vrot.lane.b32.xlu0 %v1239_v10, %s1888_s24  ;;  %1032 = vrot.lane.b32.xlu1 %v945_v40, %s1893_s29  ;;  %v686_v10 = vrot.slane %v685_v25, 4  ;;  %v916_v40 = vld [vmem:[#allocation2 + $0x40] sm:$0xf]  ;;  %v719_v14 = vsel %vm2068_vm8, %v714_v19, %v718_v11  ;;  %v1317_v25 = vor.u32 %v1316_v20, %v1313_v50  ;;  %v1294_v22 = vrot.slane %v1292_v12, 5 }
  0xf0   : > { %v1017_v18 = vshrl.u32 %v916_v40, 16  ;;  %v1020_v57 = vshll.u32 %v916_v40, 16  ;;  %v1000_v23 = vrot.slane %v998_v48, 5  ;;  %v1303_v34 = vor.u32 %v1302_v28, %v1299_v27 }
  0xf1   : > { %v691_v33 = vsel %vm2068_vm8, %v686_v10, %v690_v17  ;;  %v1295_v32 = vsel %vm2068_vm8, %v1290_v21, %v1294_v22  ;;  %v1318_v38 = vrot.slane %v1317_v25, 4  ;;  %v1028_v44 = vrot.slane %v1026_v30, 5  ;;  %v2364_v10 = vpop.permute.xlu1 %1191  ;;  %v1385_v17 = vld [vmem:[#allocation2 + $0x48] sm:$0xe] }
  0xf2   : > { %v1019_v3 = vrot.slane %v1017_v18, 4  ;;  %v1022_v5 = vrot.slane %v1020_v57, 5  ;;  %v1306_v45 = vshll.u32 %v1221_v36, 16  ;;  %v1803_v40 = vrot.slane %v1379_v39, 9  ;;  %v1386_v18 = vld [vmem:[#allocation2 + $0x4c] sm:$0x1] }
  0xf3   : > { %1342 = vrot.lane.b32.xlu0 %v1267_v47, %s1888_s24  ;;  %1036 = vrot.lane.b32.xlu1 %v973_v0, %s1893_s29  ;;  %v1010_v47 = vrot.slane %v1009_v42, 4  ;;  %v995_v0 = vor.u32 %v994_v53, %v991_v16  ;;  %v1421_v46 = vrot.slane %v1380_v41, 5  ;;  %v1304_v43 = vrot.slane %v1303_v34, 4  ;;  %v1381_v16 = vld [vmem:[#allocation2 + $0x38] sm:$0xe] }
  0xf4   : > { %v1023_v60 = vor.u32 %v1022_v5, %v1019_v3  ;;  %v1382_v53 = vld [vmem:[#allocation2 + $0x3c] sm:$0x1]  ;;  %v1308_v54 = vrot.slane %v1306_v45, 5  ;;  %v1429_v61 = vrot.slane %v1384_v52, 5  ;;  %v1804_v63 = vrot.slane %v1381_v16, 9 }
  0xf5   : > { %v1015_v13 = vsel %vm2068_vm8, %v1010_v47, %v1014_v8  ;;  %v996_v26 = vrot.slane %v995_v0, 4  ;;  %v1422_v55 = vsel %vm2078_vm11, %v1803_v40, %v1421_v46  ;;  %v1425_v62 = vrot.slane %v1382_v53, 5 }
  0xf6   : > { %v1024_v9 = vrot.slane %v1023_v60, 4  ;;  %v1309_v57 = vsel %vm2068_vm8, %v1304_v43, %v1308_v54  ;;  %vm893_vm0 = vcmask 126048   ;;  %v1433_v47 = vrot.slane %v1386_v18, 5 }
  0xf7   : > { %728 = vrot.lane.b32.xlu0 %v677_v29, %s1887_s23  ;;  %1340 = vrot.lane.b32.xlu1 %v1253_v37, %s1888_s24  ;;  %v1320_v29 = vshll.u32 %v1223_v24, 16  ;;  %v1001_v37 = vsel %vm2068_vm8, %v996_v26, %v1000_v23  ;;  %v1426_v4 = vsel %vm2078_vm11, %v1804_v63, %v1425_v62  ;;  %vm1201_vm3 = vcmask 224448  }
  0xf8   : > { %v1029_v15 = vsel %vm2068_vm8, %v1024_v9, %v1028_v44 }
  0xfb   : > { %732 = vrot.lane.b32.xlu0 %v705_v35, %s1887_s23  ;;  %1344 = vrot.lane.b32.xlu1 %v1281_v56, %s1888_s24  ;;  %v1322_v35 = vrot.slane %v1320_v29, 5  ;;  %v1805_v56 = vrot.slane %v1383_v51, 9 }
  0xfd   : > { %v1323_v42 = vsel %vm2068_vm8, %v1318_v38, %v1322_v35  ;;  %v1430_v59 = vsel %vm2078_vm11, %v1805_v56, %v1429_v61  ;;  %vm1615_vm8 = vcmask 64512  }
  0xff   : > { %1038 = vrot.lane.b32.xlu0 %v987_v1, %s1893_s29  ;;  %730 = vrot.lane.b32.xlu1 %v691_v33, %s1887_s23  ;;  %v2376_v1 = vpop.permute.xlu1 %1352  ;;  %v1806_v33 = vrot.slane %v1385_v17, 9 }
 0x101   : > { %v1434_v49 = vsel %vm2078_vm11, %v1806_v33, %v1433_v47 }
 0x103   : > { %1042 = vrot.lane.b32.xlu0 %v1015_v13, %s1893_s29  ;;  %734 = vrot.lane.b32.xlu1 %v719_v14, %s1887_s23 }
 0x107   : > { %1346 = vrot.lane.b32.xlu0 %v1295_v32, %s1888_s24  ;;  %1040 = vrot.lane.b32.xlu1 %v1001_v37, %s1893_s29 }
 0x10b   : > { %1350 = vrot.lane.b32.xlu0 %v1323_v42, %s1888_s24  ;;  %1044 = vrot.lane.b32.xlu1 %v1029_v15, %s1893_s29 }
 0x10f   : > { %1443 = vrot.lane.b32.xlu0 %v1422_v55, %s1892_s28  ;;  %1348 = vrot.lane.b32.xlu1 %v1309_v57, %s1888_s24 }
 0x110   : > { %v872_v2 = vpop.permute.xlu1 %871 }
 0x111   : > { %v870_v19 = vpop.permute.xlu0 %869 }
 0x112   : > { %894 = vst.msk [vmem:[#allocation3] sm:$0xf] %vm893_vm0, %v870_v19 }
 0x113   : > { %1447 = vrot.lane.b32.xlu0 %v1430_v59, %s1892_s28  ;;  %1445 = vrot.lane.b32.xlu1 %v1426_v4, %s1892_s28 }
 0x115   : > { %v874_v0 = vpop.permute.xlu0 %873 }
 0x117   : > { %1449 = vrot.lane.b32.xlu1 %v1434_v49, %s1892_s28 }
 0x119   : > { %v876_v50 = vpop.permute.xlu1 %875  ;;  %v1178_v20 = vpop.permute.xlu0 %1177 }
 0x11d   : > { %v1180_v3 = vpop.permute.xlu1 %1179  ;;  %v1182_v5 = vpop.permute.xlu0 %1181 }
 0x121   : > { %v2390_v6 = vpop.permute.xlu1 %1183  ;;  %v2392_v7 = vpop.permute.xlu0 %877 }
 0x125   : > { %v2394_v8 = vpop.permute.xlu1 %879  ;;  %v2396_v11 = vpop.permute.xlu0 %881 }
 0x129   : > { %v2398_v12 = vpop.permute.xlu1 %883  ;;  %v2400_v31 = vpop.permute.xlu0 %1185 }
 0x12d   : > { %v2402_v48 = vpop.permute.xlu1 %1187  ;;  %v2404_v13 = vpop.permute.xlu0 %1189 }
 0x131   : > { %v823_v14 = vpop.permute.xlu1 %822  ;;  %v825_v21 = vpop.permute.xlu0 %824 }
 0x135   : > { %v827_v24 = vpop.permute.xlu1 %826  ;;  %v1128_v25 = vpop.permute.xlu0 %1127 }
 0x139   : > { %v1130_v58 = vpop.permute.xlu1 %1129  ;;  %v1132_v26 = vpop.permute.xlu0 %1131 }
 0x13d   : > { %v1134_v60 = vpop.permute.xlu1 %1133  ;;  %v1436_v27 = vpop.permute.xlu0 %1435 }
 0x141   : > { %v1438_v28 = vpop.permute.xlu1 %1437  ;;  %v1440_v22 = vpop.permute.xlu0 %1439 }
 0x145   : > { %v1442_v23 = vpop.permute.xlu1 %1441  ;;  %v829_v29 = vpop.permute.xlu0 %828 }
 0x149   : > { %v2406_v30 = vpop.permute.xlu1 %830  ;;  %v833_v32 = vpop.permute.xlu0 %832 }
 0x14d   : > { %v2408_v36 = vpop.permute.xlu1 %834  ;;  %v2410_v37 = vpop.permute.xlu0 %1135 }
 0x151   : > { %v2412_v38 = vpop.permute.xlu1 %1137  ;;  %v2414_v9 = vpop.permute.xlu0 %1139 }
 0x155   : > { %v2416_v39 = vpop.permute.xlu1 %1141  ;;  %v725_v41 = vpop.permute.xlu0 %724 }
 0x156   : > { %747 = vst.msk [vmem:[#allocation3 + $0x8] sm:$0xf] %vm744_vm13, %v725_v41 }
 0x157   : > { %847 = vst.msk [vmem:[#allocation3 + $0x8] sm:$0xf] %vm844_vm14, %v825_v21 }
 0x158   : > { %896 = vst.msk [vmem:[#allocation3 + $0x8] sm:$0xf] %vm893_vm0, %v874_v0 }
 0x159   : > { %v723_v34 = vpop.permute.xlu1 %722  ;;  %v1031_v35 = vpop.permute.xlu0 %1030 }
 0x15a   : > { %746 = vst.msk [vmem:[#allocation3 + $0x4] sm:$0xf] %vm744_vm13, %v723_v34 }
 0x15b   : > { %1055 = vst.msk [vmem:[#allocation3] sm:$0xf] %vm1054_vm1, %v1031_v35 }
 0x15c   : > { %846 = vst.msk [vmem:[#allocation3 + $0x4] sm:$0xf] %vm844_vm14, %v823_v14 }
 0x15d   : > { %1152 = vst.msk [vmem:[#allocation3] sm:$0xf] %vm1151_vm2, %v1128_v25  ;;  %v727_v44 = vpop.permute.xlu1 %726  ;;  %v1035_v45 = vpop.permute.xlu0 %1034 }
 0x15e   : > { %895 = vst.msk [vmem:[#allocation3 + $0x4] sm:$0xf] %vm893_vm0, %v872_v2 }
 0x15f   : > { %1202 = vst.msk [vmem:[#allocation3] sm:$0xf] %vm1201_vm3, %v1178_v20 }
 0x160   : > { %748 = vst.msk [vmem:[#allocation3 + $0xc] sm:$0xf] %vm744_vm13, %v727_v44 }
 0x161   : > { %1057 = vst.msk [vmem:[#allocation3 + $0x8] sm:$0xf] %vm1054_vm1, %v1035_v45  ;;  %v1033_v40 = vpop.permute.xlu1 %1032  ;;  %v1339_v46 = vpop.permute.xlu0 %1338 }
 0x162   : > { %848 = vst.msk [vmem:[#allocation3 + $0xc] sm:$0xf] %vm844_vm14, %v827_v24 }
 0x163   : > { %1154 = vst.msk [vmem:[#allocation3 + $0x8] sm:$0xf] %vm1151_vm2, %v1132_v26 }
 0x164   : > { %897 = vst.msk [vmem:[#allocation3 + $0xc] sm:$0xf] %vm893_vm0, %v876_v50 }
 0x165   : > { %1204 = vst.msk [vmem:[#allocation3 + $0x8] sm:$0xf] %vm1201_vm3, %v1182_v5  ;;  %v1037_v42 = vpop.permute.xlu1 %1036  ;;  %v1343_v15 = vpop.permute.xlu0 %1342 }
 0x166   : > { %1056 = vst.msk [vmem:[#allocation3 + $0x4] sm:$0xf] %vm1054_vm1, %v1033_v40  ;;  %1058 = vst.msk [vmem:[#allocation3 + $0xc] sm:$0xf] %vm1054_vm1, %v1037_v42 }
 0x167   : > { %1363 = vst.msk [vmem:[#allocation3] sm:$0xf] %vm1362_vm4, %v1339_v46  ;;  %1365 = vst.msk [vmem:[#allocation3 + $0x8] sm:$0xf] %vm1362_vm4, %v1343_v15 }
 0x168   : > { %1153 = vst.msk [vmem:[#allocation3 + $0x4] sm:$0xf] %vm1151_vm2, %v1130_v58  ;;  %1155 = vst.msk [vmem:[#allocation3 + $0xc] sm:$0xf] %vm1151_vm2, %v1134_v60 }
 0x169   : > { %1460 = vst.msk [vmem:[#allocation3] sm:$0xf] %vm1459_vm5, %v1436_v27  ;;  %1462 = vst.msk [vmem:[#allocation3 + $0x8] sm:$0xf] %vm1459_vm5, %v1440_v22  ;;  %v1341_v43 = vpop.permute.xlu1 %1340  ;;  %v729_v51 = vpop.permute.xlu0 %728 }
 0x16a   : > { %1203 = vst.msk [vmem:[#allocation3 + $0x4] sm:$0xf] %vm1201_vm3, %v1180_v3  ;;  %1205 = vst.msk [vmem:[#allocation3 + $0xc] sm:$0xf] %vm1201_vm3, %v2390_v6 }
 0x16b   : > { %1364 = vst.msk [vmem:[#allocation3 + $0x4] sm:$0xf] %vm1362_vm4, %v1341_v43 }
 0x16c   : > { %749 = vst.msk [vmem:[#allocation3 + $0x10] sm:$0xf] %vm744_vm13, %v729_v51 }
 0x16d   : > { %1461 = vst.msk [vmem:[#allocation3 + $0x4] sm:$0xf] %vm1459_vm5, %v1438_v28  ;;  %v1345_v52 = vpop.permute.xlu1 %1344  ;;  %v733_v16 = vpop.permute.xlu0 %732 }
 0x16e   : > { %849 = vst.msk [vmem:[#allocation3 + $0x10] sm:$0xf] %vm844_vm14, %v829_v29 }
 0x16f   : > { %898 = vst.msk [vmem:[#allocation3 + $0x10] sm:$0xf] %vm893_vm0, %v2392_v7 }
 0x170   : > { %1366 = vst.msk [vmem:[#allocation3 + $0xc] sm:$0xf] %vm1362_vm4, %v1345_v52 }
 0x171   : > { %751 = vst.msk [vmem:[#allocation3 + $0x18] sm:$0xf] %vm744_vm13, %v733_v16  ;;  %v731_v53 = vpop.permute.xlu1 %730  ;;  %v1039_v54 = vpop.permute.xlu0 %1038 }
 0x172   : > { %1463 = vst.msk [vmem:[#allocation3 + $0xc] sm:$0xf] %vm1459_vm5, %v1442_v23 }
 0x173   : > { %851 = vst.msk [vmem:[#allocation3 + $0x18] sm:$0xf] %vm844_vm14, %v833_v32 }
 0x174   : > { %900 = vst.msk [vmem:[#allocation3 + $0x18] sm:$0xf] %vm893_vm0, %v2396_v11  ;;  %v1872_v55 = vld [vmem:[#allocation3] sm:$0xff]  }
 0x175   : > { %750 = vst.msk [vmem:[#allocation3 + $0x14] sm:$0xf] %vm744_vm13, %v731_v53  ;;  %1835 = vmatprep.mubr.msk.bf16.mxu0 %vm1516_vm6, %v1872_v55  ;;  %v735_v56 = vpop.permute.xlu1 %734  ;;  %v1043_v17 = vpop.permute.xlu0 %1042 }
 0x176   : > { %1059 = vst.msk [vmem:[#allocation3 + $0x10] sm:$0xf] %vm1054_vm1, %v1039_v54  ;;  %1061 = vst.msk [vmem:[#allocation3 + $0x18] sm:$0xf] %vm1054_vm1, %v1043_v17 }
 0x177   : > { %850 = vst.msk [vmem:[#allocation3 + $0x14] sm:$0xf] %vm844_vm14, %v2406_v30 }
 0x178   : > { %1156 = vst.msk [vmem:[#allocation3 + $0x10] sm:$0xf] %vm1151_vm2, %v2410_v37  ;;  %1158 = vst.msk [vmem:[#allocation3 + $0x18] sm:$0xf] %vm1151_vm2, %v2414_v9 }
 0x179   : > { %899 = vst.msk [vmem:[#allocation3 + $0x14] sm:$0xf] %vm893_vm0, %v2394_v8  ;;  %v1873_v18 = vld [vmem:[#allocation3 + $0x8] sm:$0xff]   ;;  %v1041_v57 = vpop.permute.xlu1 %1040  ;;  %v1347_v61 = vpop.permute.xlu0 %1346 }
 0x17a   : > { %1206 = vst.msk [vmem:[#allocation3 + $0x10] sm:$0xf] %vm1201_vm3, %v2400_v31  ;;  %1208 = vst.msk [vmem:[#allocation3 + $0x18] sm:$0xf] %vm1201_vm3, %v2404_v13  ;;  %1836 = vmatmul.mubr.msk.bf16.vlgmr.msra.gmra.mxu0 %vm1516_vm6, %v1873_v18 }
 0x17b   : > { %752 = vst.msk [vmem:[#allocation3 + $0x1c] sm:$0xf] %vm744_vm13, %v735_v56 }
 0x17c   : > { %852 = vst.msk [vmem:[#allocation3 + $0x1c] sm:$0xf] %vm844_vm14, %v2408_v36 }
 0x17d   : > { %901 = vst.msk [vmem:[#allocation3 + $0x1c] sm:$0xf] %vm893_vm0, %v2398_v12  ;;  %v1045_v63 = vpop.permute.xlu1 %1044  ;;  %v1351_v62 = vpop.permute.xlu0 %1350 }
 0x17e   : > { %1060 = vst.msk [vmem:[#allocation3 + $0x14] sm:$0xf] %vm1054_vm1, %v1041_v57  ;;  %1062 = vst.msk [vmem:[#allocation3 + $0x1c] sm:$0xf] %vm1054_vm1, %v1045_v63 }
 0x17f   : > { %1367 = vst.msk [vmem:[#allocation3 + $0x10] sm:$0xf] %vm1362_vm4, %v1347_v61  ;;  %1369 = vst.msk [vmem:[#allocation3 + $0x18] sm:$0xf] %vm1362_vm4, %v1351_v62 }
 0x180   : > { %1157 = vst.msk [vmem:[#allocation3 + $0x14] sm:$0xf] %vm1151_vm2, %v2412_v38  ;;  %1159 = vst.msk [vmem:[#allocation3 + $0x1c] sm:$0xf] %vm1151_vm2, %v2416_v39 }
 0x181   : > { %1207 = vst.msk [vmem:[#allocation3 + $0x14] sm:$0xf] %vm1201_vm3, %v2402_v48  ;;  %1209 = vst.msk [vmem:[#allocation3 + $0x1c] sm:$0xf] %vm1201_vm3, %v2364_v10  ;;  %v1349_v33 = vpop.permute.xlu1 %1348  ;;  %v1444_v47 = vpop.permute.xlu0 %1443 }
 0x182   : > { %1370 = vst.msk [vmem:[#allocation3 + $0x1c] sm:$0xf] %vm1362_vm4, %v2376_v1  ;;  %1368 = vst.msk [vmem:[#allocation3 + $0x14] sm:$0xf] %vm1362_vm4, %v1349_v33 }
 0x183   : > { %1464 = vst.msk [vmem:[#allocation3 + $0x10] sm:$0xf] %vm1459_vm5, %v1444_v47 }
 0x185   : > { %v1446_v19 = vpop.permute.xlu1 %1445  ;;  %v1448_v59 = vpop.permute.xlu0 %1447 }
 0x186   : > { %1465 = vst.msk [vmem:[#allocation3 + $0x14] sm:$0xf] %vm1459_vm5, %v1446_v19  ;;  %1466 = vst.msk [vmem:[#allocation3 + $0x18] sm:$0xf] %vm1459_vm5, %v1448_v59 }
 0x189   : > { %v1450_v4 = vpop.permute.xlu1 %1449 }
 0x18a   : > { %1467 = vst.msk [vmem:[#allocation3 + $0x1c] sm:$0xf] %vm1459_vm5, %v1450_v4 }
 0x18d   : > { %v1874_v10 = vld [vmem:[#allocation3 + $0x10] sm:$0xff]  }
 0x18e   : > { %1839 = vmatprep.mubr.msk.bf16.mxu1 %vm1516_vm6, %v1874_v10 }
 0x191   : > { %v1875_v49 = vld [vmem:[#allocation3 + $0x18] sm:$0xff]  }
 0x192   : > { %1840 = vmatmul.mubr.msk.bf16.vlgmr.msra.gmra.mxu1 %vm1516_vm6, %v1875_v49 }
 0x23a   : > { %v1837_v1 = vpop.f32.mrf.mxu0 }
 0x23b   : > { %v1600_v2 = vpack.c.bf16 %v1837_v1, %v1837_v1  ;;  %v1641_v13 = vmul.f32 %v1837_v1, %v1837_v1  ;;  %v1619_v24 = vsel %vm1615_vm8, %v1837_v1, 0.0 }
 0x23c   : > { %v1567_v0 = vpop.f32.mrf.mxu0 }
 0x23d   : > { %1609 = vst.msk [vmem:[%s2503_s13 + $0x8] sm:$0xf] %vm1606_vm7, %v1600_v2  ;;  %v1598_v50 = vpack.c.bf16 %v1567_v0, %v1567_v0  ;;  %v1639_v8 = vmul.f32 %v1567_v0, %v1567_v0  ;;  %v1616_v12 = vsel %vm1615_vm8, %v1567_v0, 0.0  ;;  %v1650_v26 = vsel %vm1615_vm8, %v1641_v13, 0.0 }
 0x23e   : > { %v1838_v20 = vpop.f32.mrf.mxu0 }
 0x23f   : > { %1607 = vst.msk [vmem:[%s2503_s13] sm:$0xf] %vm1606_vm7, %v1598_v50  ;;  %v1601_v3 = vpack.c.bf16 %v1838_v20, %v1838_v20  ;;  %v1647_v14 = vsel %vm1615_vm8, %v1639_v8, 0.0  ;;  %v1642_v60 = vmul.f32 %v1838_v20, %v1838_v20  ;;  %v1621_v23 = vsel %vm1615_vm8, %v1838_v20, 0.0 }
 0x240   : > { %v1570_v5 = vpop.f32.mrf.mxu0 }
 0x241   : > { %1610 = vst.msk [vmem:[%s2503_s13 + $0xc] sm:$0xf] %vm1606_vm7, %v1601_v3  ;;  %v1599_v6 = vpack.c.bf16 %v1570_v5, %v1570_v5  ;;  %v1640_v7 = vmul.f32 %v1570_v5, %v1570_v5  ;;  %v1617_v11 = vsel %vm1615_vm8, %v1570_v5, 0.0  ;;  %v1652_v38 = vsel %vm1615_vm8, %v1642_v60, 0.0 }
 0x242   : > { %v1618_v48 = vadd.f32 %v1617_v11, %v1616_v12 }
 0x243   : > { %1608 = vst.msk [vmem:[%s2503_s13 + $0x4] sm:$0xf] %vm1606_vm7, %v1599_v6  ;;  %v1648_v31 = vsel %vm1615_vm8, %v1640_v7, 0.0 }
 0x244   : > { %v1649_v21 = vadd.f32 %v1648_v31, %v1647_v14  ;;  %v1620_v25 = vadd.f32 %v1619_v24, %v1618_v48 }
 0x246   : > { %v1651_v28 = vadd.f32 %v1650_v26, %v1649_v21  ;;  %v1622_v36 = vadd.f32 %v1621_v23, %v1620_v25 }
 0x248   : > { %v1653_v34 = vadd.f32 %v1652_v38, %v1651_v28 }
 0x252   : > { %v1841_v58 = vpop.f32.mrf.mxu1 }
 0x253   : > { %v1604_v27 = vpack.c.bf16 %v1841_v58, %v1841_v58  ;;  %v1645_v44 = vmul.f32 %v1841_v58, %v1841_v58  ;;  %v1627_v43 = vsel %vm1615_vm8, %v1841_v58, 0.0 }
 0x254   : > { %v1583_v22 = vpop.f32.mrf.mxu1 }
 0x255   : > { %1613 = vst.msk [vmem:[%s2503_s13 + $0x18] sm:$0xf] %vm1606_vm7, %v1604_v27  ;;  %v1602_v29 = vpack.c.bf16 %v1583_v22, %v1583_v22  ;;  %v1623_v30 = vsel %vm1615_vm8, %v1583_v22, 0.0  ;;  %v1643_v32 = vmul.f32 %v1583_v22, %v1583_v22  ;;  %v1658_v54 = vsel %vm1615_vm8, %v1645_v44, 0.0 }
 0x256   : > { %v1842_v37 = vpop.f32.mrf.mxu1  ;;  %v1624_v41 = vadd.f32 %v1623_v30, %v1622_v36 }
 0x257   : > { %1611 = vst.msk [vmem:[%s2503_s13 + $0x10] sm:$0xf] %vm1606_vm7, %v1602_v29  ;;  %v1654_v9 = vsel %vm1615_vm8, %v1643_v32, 0.0  ;;  %v1605_v39 = vpack.c.bf16 %v1842_v37, %v1842_v37  ;;  %v1646_v51 = vmul.f32 %v1842_v37, %v1842_v37  ;;  %v1629_v55 = vsel %vm1615_vm8, %v1842_v37, 0.0 }
 0x258   : > { %v1586_v35 = vpop.f32.mrf.mxu1  ;;  %v1655_v42 = vadd.f32 %v1654_v9, %v1653_v34 }
 0x259   : > { %1614 = vst.msk [vmem:[%s2503_s13 + $0x1c] sm:$0xf] %vm1606_vm7, %v1605_v39  ;;  %v1603_v45 = vpack.c.bf16 %v1586_v35, %v1586_v35  ;;  %v1625_v40 = vsel %vm1615_vm8, %v1586_v35, 0.0  ;;  %v1644_v46 = vmul.f32 %v1586_v35, %v1586_v35  ;;  %v1660_v18 = vsel %vm1615_vm8, %v1646_v51, 0.0 }
 0x25a   : > { %v1626_v15 = vadd.f32 %v1625_v40, %v1624_v41 }
 0x25b   : > { %1612 = vst.msk [vmem:[%s2503_s13 + $0x14] sm:$0xf] %vm1606_vm7, %v1603_v45  ;;  %v1656_v52 = vsel %vm1615_vm8, %v1644_v46, 0.0 }
 0x25c   : > { %v1628_v16 = vadd.f32 %v1627_v43, %v1626_v15  ;;  %v1657_v53 = vadd.f32 %v1656_v52, %v1655_v42 }
 0x25e   : > { %v1630_v56 = vadd.f32 %v1629_v55, %v1628_v16  ;;  %v1659_v17 = vadd.f32 %v1658_v54, %v1657_v53 }
 0x260   : > { %v1631_v57 = vrot.slane %v1630_v56, 4  ;;  %v1661_v61 = vadd.f32 %v1660_v18, %v1659_v17 }
 0x262   : > { %v1632_v63 = vadd.f32 %v1631_v57, %v1630_v56  ;;  %v1662_v62 = vrot.slane %v1661_v61, 4 }
 0x264   : > { %v1633_v33 = vrot.slane %v1632_v63, 2  ;;  %v1663_v47 = vadd.f32 %v1662_v62, %v1661_v61 }
 0x266   : > { %v1634_v19 = vadd.f32 %v1633_v33, %v1632_v63  ;;  %v1664_v59 = vrot.slane %v1663_v47, 2 }
 0x268   : > { %v1635_v4 = vrot.slane %v1634_v19, 1  ;;  %v1665_v10 = vadd.f32 %v1664_v59, %v1663_v47 }
 0x26a   : > { %v1636_v49 = vadd.f32 %v1635_v4, %v1634_v19  ;;  %v1666_v1 = vrot.slane %v1665_v10, 1 }
 0x26c   : > { %1638 = vst.msk [vmem:[%s211_s18] sm:$0x1] %vm1637_vm9, %v1636_v49  ;;  %v1667_v2 = vadd.f32 %v1666_v1, %v1665_v10 }
 0x26e   : > { %1668 = vst.msk [vmem:[%s214_s21] sm:$0x1] %vm1637_vm9, %v1667_v2 }
 0x26f PF: > { %s15_s15 = sadd.s32 1, %s1882_s15  }
 0x270   : > { %p12_p4 = scmp.ge.s32.totalorder %s15_s15, 4  }
 0x272   :  { %14 = sbr.rel (!%p12_p4) target bundleno = 1 (0x1), region = 85 }

// kernel: encoder_block_forward.3
= control target key start
LH: loop header
LB: loop body
LE: loop exit
PB: predicated region body
PF: predicated region fallthrough
CT: control target
= control target key end

     0   :  { %s1978_s21 = smov 0   ;;  %s2470_s0 = inlined_call_operand.vmem [shape: bf16[2,8,8,8], index: 0, kind: input, shape index: {}]   ;;  %s2471_s1 = inlined_call_operand.vmem [shape: bf16[72,8], index: 1, kind: input, shape index: {}]   ;;  %s2472_s2 = inlined_call_operand.vmem [shape: f32[1,1,8], index: 2, kind: input, shape index: {}]   ;;  %s2473_s3 = inlined_call_operand.vmem [shape: f32[1,1,8], index: 3, kind: input, shape index: {}]   ;;  %s2474_s4 = inlined_call_operand.vmem [shape: bf16[2,8,8,8], index: 4, kind: output, shape index: {0}]   ;;  %s2475_s5 = inlined_call_operand.vmem [shape: f32[2,1,8], index: 5, kind: output, shape index: {1}]   ;;  %s2476_s6 = inlined_call_operand.vmem [shape: f32[2,1,8], index: 6, kind: output, shape index: {2}]  }
   0x1 LB: > { %s1774_s22 = sadd.s32 4294967295, %s1932_s21   ;;  %p1778_p0 = scmp.ge.s32.totalorder %s1932_s21, 1  ;;  %s1932_s21 = sphi %s1978_s21, %s17_s21  }
   0x2   : > { %p217_p1 = scmp.lt.s32.totalorder %s1932_s21, 3 }
   0x4   : > { %p218_p2 = pnand %p1778_p0, %p217_p1 }
   0x5   : > { %p253_p3 = scmp.lt.s32.totalorder (!%p218_p2), %s1774_s22, 1  ;;  %s1935_s7 = smov (!%p218_p2), 16  }
   0x6   : > { %221 = sbr.rel (%p218_p2) target bundleno = 516 (0x204), region = 36  ;;  %s1936_s8 = smov (!%p218_p2), 8  }
   0x7   : > { %s1937_s9 = smov (!%p218_p2), 24   ;;  %s1938_s10 = smov (!%p218_p2), 48  }
   0x8   : > { %s1939_s11 = smov (!%p218_p2), 40   ;;  %s1940_s12 = smov (!%p218_p2), 32  }
   0x9   : > { %s1941_s13 = smov (!%p218_p2), 56   ;;  %s1942_s14 = smov (!%p218_p2), 64  }
   0xb   : > { %vm332_vm0 = vcmask 60416   ;;  %vm334_vm1 = vcmask 57344   ;;  %vm340_vm2 = vsmask.f32 256  ;;  %v1934_v0 = vmov 0   ;;  %s2488_s22 = smov (!%p253_p3, %s1774_s22), 1 }
   0xc   : > { %333 = vst.msk [vmem:[#allocation2] sm:$0xf] %vm332_vm0, %v1934_v0  ;;  %337 = vst.msk [vmem:[#allocation2 + $0x48] sm:$0xf] %vm332_vm0, %v1934_v0  ;;  %vm372_vm3 = vsmask.f32 7938 }
   0xd   : > { %335 = vst.msk [vmem:[#allocation2 + $0x4] sm:$0x1] %vm334_vm1, %v1934_v0  ;;  %338 = vst.msk [vmem:[#allocation2 + $0x4c] sm:$0x1] %vm334_vm1, %v1934_v0  ;;  %v348_v2 = vld [vmem:[#allocation2 + $0x10] sm:$0x1] }
   0xe   : > { %vm1991_vm4 = vmand %vm334_vm1, %vm340_vm2  ;;  %v345_v4 = vld [vmem:[#allocation2 + $0x8] sm:$0x1]  ;;  %v354_v5 = vld [vmem:[#allocation2 + $0x20] sm:$0x1]  ;;  %s1832_s23 = sshll.u32 %s2488_s22, 5  ;;  %vm771_vm6 = vcmask 1042432  }
   0xf   : > { %v349_v3 = vsel %vm1991_vm4, 0, %v348_v2  ;;  %vm2001_vm5 = vmand %vm334_vm1, %vm372_vm3  ;;  %v346_v7 = vsel %vm1991_vm4, 0, %v345_v4  ;;  %v355_v8 = vsel %vm1991_vm4, 0, %v354_v5  ;;  %v351_v9 = vld [vmem:[#allocation2 + $0x18] sm:$0x1]  ;;  %s2019_s26 = scalar_lea.vmem %s2470_s0, %s1832_s23  ;;  %vm772_vm7 = vcmask 1046532   ;;  %s2423_s30 = scalar_lea.vmem %s2474_s4, %s1832_s23 }
  0x10   : > { %350 = vst [vmem:[#allocation2 + $0x10] sm:$0x1] %v349_v3  ;;  %v380_v10 = vld [vmem:[#allocation2 + $0x14] sm:$0x1]  ;;  %347 = vst [vmem:[#allocation2 + $0x8] sm:$0x1] %v346_v7 }
  0x11   : > { %356 = vst [vmem:[#allocation2 + $0x20] sm:$0x1] %v355_v8  ;;  %v352_v11 = vsel %vm1991_vm4, 0, %v351_v9  ;;  %v381_v12 = vsel %vm2001_vm5, 0, %v380_v10  ;;  %v377_v13 = vld [vmem:[#allocation2 + $0xc] sm:$0x1]  ;;  %vm2071_vm10 = vmor %vm771_vm6, %vm772_vm7 }
  0x12   : > { %v2024_v14 = vld [vmem:[%s2472_s2] ss:$0 sm:$0xff]  ;;  %353 = vst [vmem:[#allocation2 + $0x18] sm:$0x1] %v352_v11  ;;  %382 = vst [vmem:[#allocation2 + $0x14] sm:$0x1] %v381_v12 }
  0x13   : > { %v378_v15 = vsel %vm2001_vm5, 0, %v377_v13  ;;  %v383_v16 = vld [vmem:[#allocation2 + $0x1c] sm:$0x1]  ;;  %v342_v18 = vld [vmem:[#allocation2] sm:$0x1]  ;;  %v1858_v24 = vld [vmem:[%s2019_s26 + $0x8] sm:$0xff]  }
  0x14   : > { %v374_v17 = vld [vmem:[#allocation2 + $0x4] sm:$0x1]  ;;  %379 = vst [vmem:[#allocation2 + $0xc] sm:$0x1] %v378_v15  ;;  %v343_v21 = vsel %vm1991_vm4, 0, %v342_v18  ;;  %v384_v25 = vsel %vm2001_vm5, 0, %v383_v16  ;;  %v1849_v28 = vunpack.c.h.bf16 %v1858_v24  ;;  %v1848_v29 = vunpack.c.l.bf16 %v1858_v24  ;;  %vm2094_vm12 = vmand %vm332_vm0, %vm372_vm3 }
  0x15   : > { %v386_v19 = vld [vmem:[#allocation2 + $0x24] sm:$0x1]  ;;  %v375_v20 = vsel %vm2001_vm5, 0, %v374_v17  ;;  %v2036_v23 = vld [vmem:[%s2473_s3] ss:$0 sm:$0xff]  ;;  %v2042_v30 = vld [vmem:[%s2019_s26 + $0x10] sm:$0xff]  }
  0x16   : > { %v1843_v22 = vld [vmem:[%s2019_s26] sm:$0xff]   ;;  %376 = vst [vmem:[#allocation2 + $0x4] sm:$0x1] %v375_v20  ;;  %344 = vst [vmem:[#allocation2] sm:$0x1] %v343_v21  ;;  %v387_v33 = vsel %vm2001_vm5, 0, %v386_v19  ;;  %v1852_v34 = vunpack.c.l.bf16 %v2042_v30  ;;  %v296_v41 = vmul.f32 %v1849_v28, %v2024_v14  ;;  %v295_v42 = vmul.f32 %v1848_v29, %v2024_v14 }
  0x17   : > { %v1845_v26 = vunpack.c.h.bf16 %v1843_v22  ;;  %v1844_v27 = vunpack.c.l.bf16 %v1843_v22  ;;  %385 = vst [vmem:[#allocation2 + $0x1c] sm:$0x1] %v384_v25  ;;  %v357_v31 = vld [vmem:[#allocation2 + $0x28] sm:$0x1]  ;;  %v389_v32 = vld [vmem:[#allocation2 + $0x2c] sm:$0x1] }
  0x18   : > { %v358_v35 = vsel %vm1991_vm4, 0, %v357_v31  ;;  %v2050_v36 = vld [vmem:[%s2019_s26 + $0x18] sm:$0xff]   ;;  %v739_v38 = vld [vmem:[#allocation2] sm:$0xe]  ;;  %vm591_vm8 = vsmask.f32 3328  ;;  %v297_v44 = vmul.f32 %v1852_v34, %v2024_v14  ;;  %v311_v50 = vadd.f32 %v2036_v23, %v296_v41 }
  0x19   : > { %v363_v37 = vld [vmem:[#allocation2 + $0x38] sm:$0x1]  ;;  %v294_v39 = vmul.f32 %v1845_v26, %v2024_v14  ;;  %v293_v40 = vmul.f32 %v1844_v27, %v2024_v14  ;;  %388 = vst [vmem:[#allocation2 + $0x24] sm:$0x1] %v387_v33  ;;  %359 = vst [vmem:[#allocation2 + $0x28] sm:$0x1] %v358_v35  ;;  %v1856_v46 = vunpack.c.l.bf16 %v2050_v36  ;;  %v310_v51 = vadd.f32 %v2036_v23, %v295_v42 }
  0x1a   : > { %v395_v43 = vld [vmem:[#allocation2 + $0x3c] sm:$0x1]  ;;  %v390_v45 = vsel %vm2001_vm5, 0, %v389_v32  ;;  %v364_v47 = vsel %vm1991_vm4, 0, %v363_v37  ;;  %v1793_v52 = vrot.slane %v739_v38, 9  ;;  %v319_v58 = vmax.f32 %v311_v50, 0.0 }
  0x1b   : > { %v309_v48 = vadd.f32 %v2036_v23, %v294_v39  ;;  %v308_v49 = vadd.f32 %v2036_v23, %v293_v40  ;;  %391 = vst [vmem:[#allocation2 + $0x2c] sm:$0x1] %v390_v45  ;;  %365 = vst [vmem:[#allocation2 + $0x38] sm:$0x1] %v364_v47  ;;  %vm592_vm9 = vsmask.f32 7440  ;;  %v299_v53 = vmul.f32 %v1856_v46, %v2024_v14 }
  0x1c   : > { %v396_v54 = vsel %vm2001_vm5, 0, %v395_v43  ;;  %v318_v59 = vmax.f32 %v310_v51, 0.0  ;;  %v2076_v63 = vadd.f32 %v2036_v23, %v297_v44  ;;  %v1837_v9 = vpack.c.bf16 %v319_v58, %v319_v58  ;;  %v517_v22 = vld [vmem:[#allocation2 + $0x10] sm:$0xf]  ;;  %v511_v24 = vld [vmem:[#allocation2 + $0x8] sm:$0xf]  ;;  %vm2087_vm11 = vmor %vm591_vm8, %vm592_vm9 }
  0x1d   : > { %v317_v56 = vmax.f32 %v309_v48, 0.0  ;;  %v316_v57 = vmax.f32 %v308_v49, 0.0  ;;  %397 = vst [vmem:[#allocation2 + $0x3c] sm:$0x1] %v396_v54  ;;  %v740_v60 = vld [vmem:[#allocation2 + $0x4] sm:$0x1]  ;;  %v2079_v0 = vadd.f32 %v2036_v23, %v299_v53 }
  0x1e   : > { %v575_v61 = vld [vmem:[#allocation2] sm:$0xf]  ;;  %v576_v62 = vld [vmem:[#allocation2 + $0x4] sm:$0x1]  ;;  %v776_v2 = vrot.slane %v740_v60, 5  ;;  %v1836_v10 = vpack.c.bf16 %v318_v59, %v318_v59  ;;  %v453_v25 = vshrl.u32 %v1837_v9, 16 }
  0x1f   : > { %v595_v3 = vshrl.u32 %v575_v61, 16  ;;  %v598_v4 = vshll.u32 %v575_v61, 16  ;;  %v604_v5 = vshll.u32 %v576_v62, 16  ;;  %v1835_v7 = vpack.c.bf16 %v317_v56, %v317_v56  ;;  %v559_v16 = vld [vmem:[#allocation2] sm:$0xf] }
  0x20   : > { %v1834_v8 = vpack.c.bf16 %v316_v57, %v316_v57  ;;  %v777_v11 = vsel %vm2071_vm10, %v1793_v52, %v776_v2  ;;  %567 = vst.msk [vmem:[#allocation3] sm:$0xf] %vm332_vm0, %v559_v16  ;;  %v456_v26 = vshll.u32 %v1837_v9, 16  ;;  %v445_v27 = vshrl.u32 %v1836_v10, 16  ;;  %v520_v28 = vld [vmem:[#allocation2 + $0x14] sm:$0x1] }
  0x21   : > { %v597_v12 = vrot.slane %v595_v3, 4  ;;  %v600_v13 = vrot.slane %v598_v4, 5  ;;  %v606_v15 = vrot.slane %v604_v5, 5  ;;  %806 = vrot.lane.b32.xlu0 %v777_v11, %s1935_s7  ;;  %v437_v17 = vshrl.u32 %v1835_v7, 16  ;;  %v529_v33 = vld [vmem:[#allocation2 + $0x20] sm:$0xf] }
  0x22   : > { %v440_v18 = vshll.u32 %v1835_v7, 16  ;;  %v429_v19 = vshrl.u32 %v1834_v8, 16  ;;  %v432_v20 = vshll.u32 %v1834_v8, 16  ;;  %v448_v34 = vshll.u32 %v1836_v10, 16  ;;  %v523_v35 = vld [vmem:[#allocation2 + $0x18] sm:$0xf] }
  0x23   : > { %v601_v21 = vor.u32 %v600_v13, %v597_v12  ;;  %v439_v31 = vrot.slane %v437_v17, 7  ;;  %v514_v37 = vld [vmem:[#allocation2 + $0xc] sm:$0x1]  ;;  %v320_v38 = vmax.f32 %v2076_v63, 0.0  ;;  %v455_v41 = vrot.slane %v453_v25, 7 }
  0x24   : > { %v431_v32 = vrot.slane %v429_v19, 7  ;;  %v447_v42 = vrot.slane %v445_v27, 7  ;;  %v526_v43 = vld [vmem:[#allocation2 + $0x1c] sm:$0x1]  ;;  %v532_v44 = vld [vmem:[#allocation2 + $0x24] sm:$0x1] }
  0x25   : > { %v602_v39 = vrot.slane %v601_v21, 4  ;;  %v322_v45 = vmax.f32 %v2079_v0, 0.0  ;;  %v442_v46 = vor.u32 %v440_v18, %v439_v31  ;;  %v443_v47 = vrot.slane %v439_v31, 4  ;;  %v360_v50 = vld [vmem:[#allocation2 + $0x30] sm:$0x1] }
  0x26   : > { %v434_v48 = vor.u32 %v432_v20, %v431_v32  ;;  %v435_v49 = vrot.slane %v431_v32, 4  ;;  %v392_v51 = vld [vmem:[#allocation2 + $0x34] sm:$0x1]  ;;  %v366_v52 = vld [vmem:[#allocation2 + $0x40] sm:$0x1]  ;;  %v458_v54 = vor.u32 %v456_v26, %v455_v41  ;;  %v459_v56 = vrot.slane %v455_v41, 4 }
  0x27   : > { %v607_v53 = vsel %vm2087_vm11, %v602_v39, %v606_v15  ;;  %v450_v57 = vor.u32 %v448_v34, %v447_v42  ;;  %v518_v58 = vsel %vm2094_vm12, %v442_v46, %v517_v22  ;;  %v451_v60 = vrot.slane %v447_v42, 4  ;;  %v398_v7 = vld [vmem:[#allocation2 + $0x44] sm:$0x1]  ;;  %v369_v8 = vld [vmem:[#allocation2 + $0x48] sm:$0x1] }
  0x28   : > { %706 = vrot.lane.b32.xlu0 %v607_v53, %s1936_s8  ;;  %v512_v59 = vsel %vm2094_vm12, %v434_v48, %v511_v24  ;;  %v521_v61 = vsel %vm1991_vm4, %v443_v47, %v520_v28  ;;  %519 = vst [vmem:[#allocation2 + $0x10] sm:$0xf] %v518_v58  ;;  %v530_v62 = vsel %vm2094_vm12, %v458_v54, %v529_v33  ;;  %v361_v9 = vsel %vm1991_vm4, 0, %v360_v50  ;;  %v535_v21 = vld [vmem:[#allocation2 + $0x28] sm:$0xf] }
  0x29   : > { %513 = vst [vmem:[#allocation2 + $0x8] sm:$0xf] %v512_v59  ;;  %v524_v63 = vsel %vm2094_vm12, %v450_v57, %v523_v35  ;;  %522 = vst [vmem:[#allocation2 + $0x14] sm:$0x1] %v521_v61  ;;  %v515_v0 = vsel %vm1991_vm4, %v435_v49, %v514_v37  ;;  %v533_v2 = vsel %vm1991_vm4, %v459_v56, %v532_v44  ;;  %v393_v10 = vsel %vm2001_vm5, 0, %v392_v51 }
  0x2a   : > { %531 = vst [vmem:[#allocation2 + $0x20] sm:$0xf] %v530_v62  ;;  %525 = vst [vmem:[#allocation2 + $0x18] sm:$0xf] %v524_v63  ;;  %v527_v3 = vsel %vm1991_vm4, %v451_v60, %v526_v43  ;;  %v1838_v4 = vpack.c.bf16 %v320_v38, %v320_v38  ;;  %v1840_v5 = vpack.c.bf16 %v322_v45, %v322_v45  ;;  %v367_v11 = vsel %vm1991_vm4, 0, %v366_v52 }
  0x2b   : > { %516 = vst [vmem:[#allocation2 + $0xc] sm:$0x1] %v515_v0  ;;  %534 = vst [vmem:[#allocation2 + $0x24] sm:$0x1] %v533_v2  ;;  %v399_v17 = vsel %vm2001_vm5, 0, %v398_v7  ;;  %v370_v18 = vsel %vm1991_vm4, 0, %v369_v8  ;;  %v1853_v54 = vunpack.c.h.bf16 %v2042_v30 }
  0x2c   : > { %528 = vst [vmem:[#allocation2 + $0x1c] sm:$0x1] %v527_v3  ;;  %v461_v12 = vshrl.u32 %v1838_v4, 16  ;;  %v464_v13 = vshll.u32 %v1838_v4, 16  ;;  %v477_v15 = vshrl.u32 %v1840_v5, 16  ;;  %v480_v16 = vshll.u32 %v1840_v5, 16 }
  0x2d   : > { %362 = vst [vmem:[#allocation2 + $0x30] sm:$0x1] %v361_v9  ;;  %394 = vst [vmem:[#allocation2 + $0x34] sm:$0x1] %v393_v10  ;;  %v547_v22 = vld [vmem:[#allocation2 + $0x38] sm:$0xf] }
  0x2e   : > { %368 = vst [vmem:[#allocation2 + $0x40] sm:$0x1] %v367_v11  ;;  %v463_v19 = vrot.slane %v461_v12, 7  ;;  %v479_v20 = vrot.slane %v477_v15, 7  ;;  %400 = vst [vmem:[#allocation2 + $0x44] sm:$0x1] %v399_v17  ;;  %v298_v12 = vmul.f32 %v1853_v54, %v2024_v14 }
  0x2f   : > { %371 = vst [vmem:[#allocation2 + $0x48] sm:$0x1] %v370_v18  ;;  %v840_v24 = vld [vmem:[#allocation2 + $0x10] sm:$0xf]  ;;  %v538_v32 = vld [vmem:[#allocation2 + $0x2c] sm:$0x1] }
  0x30   : > { %v839_v25 = vld [vmem:[#allocation2 + $0x8] sm:$0xf]  ;;  %v466_v26 = vor.u32 %v464_v13, %v463_v19  ;;  %v482_v27 = vor.u32 %v480_v16, %v479_v20  ;;  %857 = vrot.lane.b32.xlu1 %v840_v24, %s1937_s9  ;;  %v743_v33 = vld [vmem:[#allocation2 + $0x10] sm:$0xe]  ;;  %v744_v34 = vld [vmem:[#allocation2 + $0x14] sm:$0x1]  ;;  %v2169_v54 = vadd.f32 %v2036_v23, %v298_v12 }
  0x31   : > { %855 = vrot.lane.b32.xlu0 %v839_v25, %s1937_s9  ;;  %v842_v28 = vld [vmem:[#allocation2 + $0x20] sm:$0xf]  ;;  %v841_v31 = vld [vmem:[#allocation2 + $0x18] sm:$0xf]  ;;  %v741_v35 = vld [vmem:[#allocation2 + $0x8] sm:$0xe] }
  0x32   : > { %v536_v37 = vsel %vm2094_vm12, %v466_v26, %v535_v21  ;;  %v548_v38 = vsel %vm2094_vm12, %v482_v27, %v547_v22  ;;  %v1795_v39 = vrot.slane %v743_v33, 9  ;;  %v742_v41 = vld [vmem:[#allocation2 + $0xc] sm:$0x1]  ;;  %v467_v42 = vrot.slane %v463_v19, 4  ;;  %v550_v43 = vld [vmem:[#allocation2 + $0x3c] sm:$0x1] }
  0x33   : > { %537 = vst [vmem:[#allocation2 + $0x28] sm:$0xf] %v536_v37  ;;  %549 = vst [vmem:[#allocation2 + $0x38] sm:$0xf] %v548_v38  ;;  %v1148_v44 = vld [vmem:[#allocation2 + $0x18] sm:$0xf] }
  0x34   : > { %v1147_v45 = vld [vmem:[#allocation2 + $0x10] sm:$0xf]  ;;  %v784_v46 = vrot.slane %v744_v34, 5  ;;  %v1049_v47 = vld [vmem:[#allocation2 + $0x8] sm:$0xe]  ;;  %v483_v49 = vrot.slane %v479_v20, 4  ;;  %861 = vrot.lane.b32.xlu1 %v842_v28, %s1937_s9  ;;  %v539_v56 = vsel %vm1991_vm4, %v467_v42, %v538_v32 }
  0x35   : > { %v1050_v48 = vld [vmem:[#allocation2 + $0xc] sm:$0x1]  ;;  %859 = vrot.lane.b32.xlu0 %v841_v31, %s1937_s9  ;;  %v1794_v50 = vrot.slane %v741_v35, 9  ;;  %v780_v51 = vrot.slane %v742_v41, 5  ;;  %v745_v52 = vld [vmem:[#allocation2 + $0x18] sm:$0xe] }
  0x36   : > { %v746_v53 = vld [vmem:[#allocation2 + $0x1c] sm:$0x1]  ;;  %v1801_v57 = vrot.slane %v1049_v47, 9  ;;  %v1083_v58 = vrot.slane %v1050_v48, 5  ;;  %v1053_v59 = vld [vmem:[#allocation2 + $0x18] sm:$0xe]  ;;  %v551_v61 = vsel %vm1991_vm4, %v483_v49, %v550_v43  ;;  %v785_v7 = vsel %vm2071_vm10, %v1795_v39, %v784_v46 }
  0x37   : > { %v1054_v60 = vld [vmem:[#allocation2 + $0x1c] sm:$0x1]  ;;  %540 = vst [vmem:[#allocation2 + $0x2c] sm:$0x1] %v539_v56  ;;  %v1796_v62 = vrot.slane %v745_v52, 9  ;;  %v788_v63 = vrot.slane %v746_v53, 5  ;;  %v781_v8 = vsel %vm2071_vm10, %v1794_v50, %v780_v51 }
  0x38   : > { %v2141_v0 = vld [vmem:[#allocation2 + $0x10] sm:$0xe]  ;;  %v2143_v2 = vld [vmem:[#allocation2 + $0x14] sm:$0x1]  ;;  %552 = vst [vmem:[#allocation2 + $0x3c] sm:$0x1] %v551_v61  ;;  %1165 = vrot.lane.b32.xlu1 %v1148_v44, %s1938_s10  ;;  %v1084_v19 = vsel %vm2071_vm10, %v1801_v57, %v1083_v58 }
  0x39   : > { %v1803_v3 = vrot.slane %v1053_v59, 9  ;;  %v1091_v30 = vrot.slane %v1054_v60, 5  ;;  %v1802_v4 = vrot.slane %v2141_v0, 9  ;;  %v2146_v5 = vld [vmem:[#allocation2 + $0x20] sm:$0xe]  ;;  %1163 = vrot.lane.b32.xlu0 %v1147_v45, %s1938_s10  ;;  %v1087_v13 = vrot.slane %v2143_v2, 5 }
  0x3a   : > { %v2154_v9 = vld [vmem:[#allocation2 + $0x24] sm:$0x1]  ;;  %v577_v10 = vld [vmem:[#allocation2 + $0x8] sm:$0xf]  ;;  %v578_v11 = vld [vmem:[#allocation2 + $0xc] sm:$0x1]  ;;  %v789_v20 = vsel %vm2071_vm10, %v1796_v62, %v788_v63 }
  0x3b   : > { %v1804_v15 = vrot.slane %v2146_v5, 9  ;;  %v609_v16 = vshrl.u32 %v577_v10, 16  ;;  %v612_v17 = vshll.u32 %v577_v10, 16  ;;  %v579_v18 = vld [vmem:[#allocation2 + $0x10] sm:$0xf]  ;;  %v1095_v26 = vrot.slane %v2154_v9, 5 }
  0x3c   : > { %v580_v21 = vld [vmem:[#allocation2 + $0x14] sm:$0x1]  ;;  %v623_v22 = vshrl.u32 %v579_v18, 16  ;;  %v626_v24 = vshll.u32 %v579_v18, 16  ;;  %v888_v25 = vld [vmem:[#allocation2 + $0x8] sm:$0xf]  ;;  %808 = vrot.lane.b32.xlu1 %v781_v8, %s1935_s7  ;;  %v1092_v49 = vsel %vm2071_vm10, %v1803_v3, %v1091_v30  ;;  %v1088_v61 = vsel %vm2071_vm10, %v1802_v4, %v1087_v13 }
  0x3d   : > { %v611_v27 = vrot.slane %v609_v16, 4  ;;  %v614_v28 = vrot.slane %v612_v17, 5  ;;  %v618_v31 = vshll.u32 %v578_v11, 16  ;;  %v889_v32 = vld [vmem:[#allocation2 + $0xc] sm:$0x1]  ;;  %810 = vrot.lane.b32.xlu0 %v785_v7, %s1935_s7  ;;  %v905_v35 = vshrl.u32 %v888_v25, 16 }
  0x3e   : > { %v625_v33 = vrot.slane %v623_v22, 4  ;;  %v628_v34 = vrot.slane %v626_v24, 5  ;;  %v908_v37 = vshll.u32 %v888_v25, 16  ;;  %v581_v38 = vld [vmem:[#allocation2 + $0x18] sm:$0xf]  ;;  %v632_v41 = vshll.u32 %v580_v21, 16 }
  0x3f   : > { %v615_v39 = vor.u32 %v614_v28, %v611_v27  ;;  %v914_v42 = vshll.u32 %v889_v32, 16  ;;  %v637_v43 = vshrl.u32 %v581_v38, 16  ;;  %v907_v45 = vrot.slane %v905_v35, 4  ;;  %v892_v48 = vld [vmem:[#allocation2 + $0x18] sm:$0xf] }
  0x40   : > { %v629_v44 = vor.u32 %v628_v34, %v625_v33  ;;  %v910_v46 = vrot.slane %v908_v37, 5  ;;  %v640_v47 = vshll.u32 %v581_v38, 16  ;;  %v620_v51 = vrot.slane %v618_v31, 5  ;;  %v582_v52 = vld [vmem:[#allocation2 + $0x1c] sm:$0x1]  ;;  %812 = vrot.lane.b32.xlu1 %v789_v20, %s1935_s7 }
  0x41   : > { %v616_v50 = vrot.slane %v615_v39, 4  ;;  %v893_v53 = vld [vmem:[#allocation2 + $0x1c] sm:$0x1]  ;;  %1113 = vrot.lane.b32.xlu0 %v1084_v19, %s1939_s11  ;;  %v639_v57 = vrot.slane %v637_v43, 4  ;;  %v933_v59 = vshrl.u32 %v892_v48, 16  ;;  %v634_v62 = vrot.slane %v632_v41, 5 }
  0x42   : > { %v911_v56 = vor.u32 %v910_v46, %v907_v45  ;;  %v642_v58 = vrot.slane %v640_v47, 5  ;;  %v890_v60 = vld [vmem:[#allocation2 + $0x10] sm:$0xf]  ;;  %v916_v63 = vrot.slane %v914_v42, 5  ;;  %v936_v0 = vshll.u32 %v892_v48, 16 }
  0x43   : > { %v630_v2 = vrot.slane %v629_v44, 4  ;;  %v646_v3 = vshll.u32 %v582_v52, 16  ;;  %v935_v30 = vrot.slane %v933_v59, 4  ;;  %v942_v5 = vshll.u32 %v893_v53, 16  ;;  %v894_v7 = vld [vmem:[#allocation2 + $0x20] sm:$0xf] }
  0x44   : > { %v912_v8 = vrot.slane %v911_v56, 4  ;;  %v938_v9 = vrot.slane %v936_v0, 5  ;;  %v919_v10 = vshrl.u32 %v890_v60, 16  ;;  %v922_v11 = vshll.u32 %v890_v60, 16  ;;  %1115 = vrot.lane.b32.xlu1 %v1088_v61, %s1939_s11  ;;  %v891_v16 = vld [vmem:[#allocation2 + $0x14] sm:$0x1] }
  0x45   : > { %1117 = vrot.lane.b32.xlu0 %v1092_v49, %s1939_s11  ;;  %v1096_v12 = vsel %vm2071_vm10, %v1804_v15, %v1095_v26  ;;  %v621_v4 = vsel %vm2087_vm11, %v616_v50, %v620_v51  ;;  %v643_v13 = vor.u32 %v642_v58, %v639_v57  ;;  %v947_v17 = vshrl.u32 %v894_v7, 16  ;;  %v1198_v24 = vld [vmem:[#allocation2 + $0x18] sm:$0xf]  ;;  %v1196_v32 = vld [vmem:[#allocation2 + $0x10] sm:$0xf] }
  0x46   : > { %v939_v18 = vor.u32 %v938_v9, %v935_v30  ;;  %v921_v19 = vrot.slane %v919_v10, 4  ;;  %v924_v20 = vrot.slane %v922_v11, 5  ;;  %v950_v21 = vshll.u32 %v894_v7, 16  ;;  %v1197_v43 = vld [vmem:[#allocation2 + $0x14] sm:$0x1] }
  0x47   : > { %v648_v22 = vrot.slane %v646_v3, 5  ;;  %v321_v25 = vmax.f32 %v2169_v54, 0.0  ;;  %v1857_v27 = vunpack.c.h.bf16 %v2050_v36  ;;  %v635_v28 = vsel %vm2087_vm11, %v630_v2, %v634_v62  ;;  %v895_v36 = vld [vmem:[#allocation2 + $0x24] sm:$0x1]  ;;  %v1200_v46 = vld [vmem:[#allocation2 + $0x20] sm:$0xf] }
  0x48   : > { %v917_v15 = vsel %vm2087_vm11, %v912_v8, %v916_v63  ;;  %v944_v26 = vrot.slane %v942_v5, 5  ;;  %v928_v31 = vshll.u32 %v891_v16, 16  ;;  %1119 = vrot.lane.b32.xlu1 %v1096_v12, %s1939_s11  ;;  %v925_v33 = vor.u32 %v924_v20, %v921_v19  ;;  %v1202_v53 = vld [vmem:[#allocation2 + $0x28] sm:$0xf]  ;;  %v1201_v61 = vld [vmem:[#allocation2 + $0x24] sm:$0x1] }
  0x49   : > { %708 = vrot.lane.b32.xlu0 %v621_v4, %s1936_s8  ;;  %v949_v34 = vrot.slane %v947_v17, 4  ;;  %v952_v35 = vrot.slane %v950_v21, 5  ;;  %v1213_v37 = vshrl.u32 %v1196_v32, 16  ;;  %v644_v38 = vrot.slane %v643_v13, 4  ;;  %v1199_v63 = vld [vmem:[#allocation2 + $0x1c] sm:$0x1] }
  0x4a   : > { %v940_v39 = vrot.slane %v939_v18, 4  ;;  %v1227_v41 = vshrl.u32 %v1198_v24, 16  ;;  %v1230_v42 = vshll.u32 %v1198_v24, 16  ;;  %v1216_v45 = vshll.u32 %v1196_v32, 16  ;;  %v1149_v9 = vld [vmem:[#allocation2 + $0x20] sm:$0xf] }
  0x4b   : > { %v1215_v44 = vrot.slane %v1213_v37, 4  ;;  %v930_v47 = vrot.slane %v928_v31, 5  ;;  %v300_v48 = vmul.f32 %v1857_v27, %v2024_v14  ;;  %v926_v49 = vrot.slane %v925_v33, 4  ;;  %v583_v13 = vld [vmem:[#allocation2 + $0x20] sm:$0xf] }
  0x4c   : > { %710 = vrot.lane.b32.xlu1 %v635_v28, %s1936_s8  ;;  %v953_v50 = vor.u32 %v952_v35, %v949_v34  ;;  %v956_v51 = vshll.u32 %v895_v36, 16  ;;  %v1218_v52 = vrot.slane %v1216_v45, 5  ;;  %v649_v54 = vsel %vm2087_vm11, %v644_v38, %v648_v22  ;;  %v1203_v24 = vld [vmem:[#allocation2 + $0x2c] sm:$0x1]  ;;  %v1358_v32 = vld [vmem:[#allocation2 + $0x14] sm:$0x1] }
  0x4d   : > { %1016 = vrot.lane.b32.xlu0 %v917_v15, %s1940_s12  ;;  %v945_v56 = vsel %vm2087_vm11, %v940_v39, %v944_v26  ;;  %v1222_v57 = vshll.u32 %v1197_v43, 16  ;;  %v1241_v58 = vshrl.u32 %v1200_v46, 16  ;;  %v1229_v59 = vrot.slane %v1227_v41, 4  ;;  %v585_v33 = vld [vmem:[#allocation2 + $0x28] sm:$0xf] }
  0x4e   : > { %v1232_v14 = vrot.slane %v1230_v42, 5  ;;  %v1219_v60 = vor.u32 %v1218_v52, %v1215_v44  ;;  %v2196_v62 = vpack.c.bf16 %v321_v25, %v321_v25  ;;  %v1255_v0 = vshrl.u32 %v1202_v53, 16  ;;  %v1357_v25 = vld [vmem:[#allocation2 + $0x10] sm:$0xe]  ;;  %v584_v34 = vld [vmem:[#allocation2 + $0x24] sm:$0x1] }
  0x4f   : > { %v1258_v2 = vshll.u32 %v1202_v53, 16  ;;  %v1243_v3 = vrot.slane %v1241_v58, 4  ;;  %v1244_v30 = vshll.u32 %v1200_v46, 16  ;;  %v931_v5 = vsel %vm2087_vm11, %v926_v49, %v930_v47  ;;  %v1359_v53 = vld [vmem:[#allocation2 + $0x18] sm:$0xe] }
  0x50   : > { %712 = vrot.lane.b32.xlu1 %v649_v54, %s1936_s8  ;;  %v954_v7 = vrot.slane %v953_v50, 4  ;;  %v958_v8 = vrot.slane %v956_v51, 5  ;;  %v1220_v10 = vrot.slane %v1219_v60, 4  ;;  %v1224_v11 = vrot.slane %v1222_v57, 5  ;;  %v1360_v54 = vld [vmem:[#allocation2 + $0x1c] sm:$0x1] }
  0x51   : > { %1020 = vrot.lane.b32.xlu0 %v945_v56, %s1940_s12  ;;  %v1246_v12 = vrot.slane %v1244_v30, 5  ;;  %v1250_v4 = vshll.u32 %v1201_v61, 16  ;;  %v1236_v16 = vshll.u32 %v1199_v63, 16  ;;  %v469_v17 = vshrl.u32 %v2196_v62, 16  ;;  %v541_v56 = vld [vmem:[#allocation2 + $0x30] sm:$0xf] }
  0x52   : > { %v315_v18 = vadd.f32 %v2036_v23, %v300_v48  ;;  %v1233_v19 = vor.u32 %v1232_v14, %v1229_v59  ;;  %v1257_v20 = vrot.slane %v1255_v0, 4  ;;  %v1260_v21 = vrot.slane %v1258_v2, 5  ;;  %v1150_v48 = vld [vmem:[#allocation2 + $0x28] sm:$0xf]  ;;  %v586_v14 = vld [vmem:[#allocation2 + $0x2c] sm:$0x1] }
  0x53   : > { %v1247_v22 = vor.u32 %v1246_v12, %v1243_v3  ;;  %v651_v27 = vshrl.u32 %v583_v13, 16  ;;  %v654_v28 = vshll.u32 %v583_v13, 16  ;;  %v959_v15 = vsel %vm2087_vm11, %v954_v7, %v958_v8  ;;  %v544_v61 = vld [vmem:[#allocation2 + $0x34] sm:$0x1]  ;;  %v1361_v2 = vld [vmem:[#allocation2 + $0x20] sm:$0xe] }
  0x54   : > { %1018 = vrot.lane.b32.xlu1 %v931_v5, %s1940_s12  ;;  %v1225_v26 = vsel %vm2087_vm11, %v1220_v10, %v1224_v11  ;;  %v1252_v23 = vrot.slane %v1250_v4, 5  ;;  %v472_v38 = vshll.u32 %v2196_v62, 16  ;;  %v323_v39 = vmax.f32 %v315_v18, 0.0  ;;  %v1362_v8 = vld [vmem:[#allocation2 + $0x24] sm:$0x1] }
  0x55   : > { %1167 = vrot.lane.b32.xlu0 %v1149_v9, %s1938_s10  ;;  %v1248_v31 = vrot.slane %v1247_v22, 4  ;;  %v653_v35 = vrot.slane %v651_v27, 4  ;;  %v656_v37 = vrot.slane %v654_v28, 5  ;;  %v1234_v36 = vrot.slane %v1233_v19, 4  ;;  %v589_v10 = vld [vmem:[#allocation2 + $0x38] sm:$0xf] }
  0x56   : > { %v1238_v41 = vrot.slane %v1236_v16, 5  ;;  %v1261_v42 = vor.u32 %v1260_v21, %v1257_v20  ;;  %v1264_v43 = vshll.u32 %v1203_v24, 16  ;;  %v1809_v44 = vrot.slane %v1357_v25, 9  ;;  %v553_v28 = vld [vmem:[#allocation2 + $0x40] sm:$0xf] }
  0x57   : > { %v1391_v45 = vrot.slane %v1358_v32, 5  ;;  %v665_v46 = vshrl.u32 %v585_v33, 16  ;;  %v668_v47 = vshll.u32 %v585_v33, 16  ;;  %v1253_v49 = vsel %vm2087_vm11, %v1248_v31, %v1252_v23  ;;  %v1363_v33 = vld [vmem:[#allocation2 + $0x28] sm:$0xe] }
  0x58   : > { %1022 = vrot.lane.b32.xlu1 %v959_v15, %s1940_s12  ;;  %v657_v50 = vor.u32 %v656_v37, %v653_v35  ;;  %v660_v51 = vshll.u32 %v584_v34, 16  ;;  %v471_v52 = vrot.slane %v469_v17, 7  ;;  %v1841_v57 = vpack.c.bf16 %v323_v39, %v323_v39  ;;  %v556_v15 = vld [vmem:[#allocation2 + $0x44] sm:$0x1]  ;;  %v1364_v34 = vld [vmem:[#allocation2 + $0x2c] sm:$0x1] }
  0x59   : > { %1324 = vrot.lane.b32.xlu0 %v1225_v26, %s1941_s13  ;;  %v1239_v58 = vsel %vm2087_vm11, %v1234_v36, %v1238_v41  ;;  %v1266_v59 = vrot.slane %v1264_v43, 5  ;;  %v1262_v62 = vrot.slane %v1261_v42, 4  ;;  %v1392_v63 = vsel %vm2071_vm10, %v1809_v44, %v1391_v45  ;;  %v590_v43 = vld [vmem:[#allocation2 + $0x3c] sm:$0x1] }
  0x5a   : > { %v474_v60 = vor.u32 %v472_v38, %v471_v52  ;;  %v667_v0 = vrot.slane %v665_v46, 4  ;;  %v475_v3 = vrot.slane %v471_v52, 4  ;;  %v670_v30 = vrot.slane %v668_v47, 5 }
  0x5b   : > { %v658_v5 = vrot.slane %v657_v50, 4  ;;  %v662_v7 = vrot.slane %v660_v51, 5  ;;  %v485_v12 = vshrl.u32 %v1841_v57, 16  ;;  %v1810_v4 = vrot.slane %v1359_v53, 9  ;;  %v748_v50 = vld [vmem:[#allocation2 + $0x24] sm:$0x1] }
  0x5c   : > { %1169 = vrot.lane.b32.xlu1 %v1150_v48, %s1938_s10  ;;  %v542_v9 = vsel %vm2094_vm12, %v474_v60, %v541_v56  ;;  %v545_v11 = vsel %vm1991_vm4, %v475_v3, %v544_v61  ;;  %v1395_v13 = vrot.slane %v1360_v54, 5  ;;  %v674_v16 = vshll.u32 %v586_v14, 16  ;;  %v896_v60 = vld [vmem:[#allocation2 + $0x28] sm:$0xf]  ;;  %v401_v61 = vld [vmem:[#allocation2 + $0x4c] sm:$0x1] }
  0x5d   : > { %1328 = vrot.lane.b32.xlu0 %v1253_v49, %s1941_s13  ;;  %543 = vst [vmem:[#allocation2 + $0x30] sm:$0xf] %v542_v9  ;;  %546 = vst [vmem:[#allocation2 + $0x34] sm:$0x1] %v545_v11  ;;  %v488_v17 = vshll.u32 %v1841_v57, 16  ;;  %v1267_v18 = vsel %vm2087_vm11, %v1262_v62, %v1266_v59  ;;  %v1811_v19 = vrot.slane %v1361_v2, 9  ;;  %v671_v22 = vor.u32 %v670_v30, %v667_v0 }
  0x5e   : > { %v1399_v20 = vrot.slane %v1362_v8, 5  ;;  %v487_v21 = vrot.slane %v485_v12, 7  ;;  %v663_v24 = vsel %vm2087_vm11, %v658_v5, %v662_v7  ;;  %v693_v25 = vshrl.u32 %v589_v10, 16  ;;  %v747_v49 = vld [vmem:[#allocation2 + $0x20] sm:$0xe] }
  0x5f   : > { %v696_v27 = vshll.u32 %v589_v10, 16  ;;  %v1396_v23 = vsel %vm2071_vm10, %v1810_v4, %v1395_v13  ;;  %v676_v32 = vrot.slane %v674_v16, 5  ;;  %v672_v38 = vrot.slane %v671_v22, 4  ;;  %v749_v5 = vld [vmem:[#allocation2 + $0x28] sm:$0xe] }
  0x60   : > { %1326 = vrot.lane.b32.xlu1 %v1239_v58, %s1941_s13  ;;  %v490_v26 = vor.u32 %v488_v17, %v487_v21  ;;  %v491_v31 = vrot.slane %v487_v21, 4  ;;  %v1400_v39 = vsel %vm2071_vm10, %v1811_v19, %v1399_v20  ;;  %v695_v36 = vrot.slane %v693_v25, 4  ;;  %v750_v7 = vld [vmem:[#allocation2 + $0x2c] sm:$0x1]  ;;  %v753_v9 = vld [vmem:[#allocation2 + $0x38] sm:$0xe] }
  0x61   : > { %1421 = vrot.lane.b32.xlu0 %v1392_v63, %s1942_s14  ;;  %v698_v41 = vrot.slane %v696_v27, 5  ;;  %v1812_v47 = vrot.slane %v1363_v33, 9  ;;  %v677_v51 = vsel %vm2087_vm11, %v672_v38, %v676_v32  ;;  %v1403_v52 = vrot.slane %v1364_v34, 5  ;;  %v900_v13 = vld [vmem:[#allocation2 + $0x38] sm:$0xf] }
  0x62   : > { %v554_v35 = vsel %vm2094_vm12, %v490_v26, %v553_v28  ;;  %v557_v37 = vsel %vm1991_vm4, %v491_v31, %v556_v15  ;;  %v702_v54 = vshll.u32 %v590_v43, 16  ;;  %v1797_v58 = vrot.slane %v747_v49, 9  ;;  %v754_v20 = vld [vmem:[#allocation2 + $0x3c] sm:$0x1]  ;;  %v897_v28 = vld [vmem:[#allocation2 + $0x2c] sm:$0x1] }
  0x63   : > { %555 = vst [vmem:[#allocation2 + $0x40] sm:$0xf] %v554_v35  ;;  %558 = vst [vmem:[#allocation2 + $0x44] sm:$0x1] %v557_v37  ;;  %v699_v53 = vor.u32 %v698_v41, %v695_v36  ;;  %v792_v59 = vrot.slane %v748_v50, 5  ;;  %v1404_v62 = vsel %vm2071_vm10, %v1812_v47, %v1403_v52  ;;  %v961_v10 = vshrl.u32 %v896_v60, 16 }
  0x64   : > { %1330 = vrot.lane.b32.xlu1 %v1267_v18, %s1941_s13  ;;  %v587_v42 = vld [vmem:[#allocation2 + $0x30] sm:$0xf]  ;;  %v588_v44 = vld [vmem:[#allocation2 + $0x34] sm:$0x1]  ;;  %v704_v0 = vrot.slane %v702_v54, 5  ;;  %v964_v4 = vshll.u32 %v896_v60, 16 }
  0x65   : > { %714 = vrot.lane.b32.xlu0 %v663_v24, %s1936_s8  ;;  %v679_v45 = vshrl.u32 %v587_v42, 16  ;;  %v682_v46 = vshll.u32 %v587_v42, 16  ;;  %v688_v48 = vshll.u32 %v588_v44, 16  ;;  %v700_v63 = vrot.slane %v699_v53, 4  ;;  %v751_v2 = vld [vmem:[#allocation2 + $0x30] sm:$0xe] }
  0x66   : > { %v752_v3 = vld [vmem:[#allocation2 + $0x34] sm:$0x1]  ;;  %v793_v8 = vsel %vm2071_vm10, %v1797_v58, %v792_v59  ;;  %v1799_v11 = vrot.slane %v751_v2, 9  ;;  %v402_v16 = vsel %vm2001_vm5, 0, %v401_v61  ;;  %v1798_v18 = vrot.slane %v749_v5, 9  ;;  %v1918_v53 = vld [vmem:[%s2471_s1 + $0x18] sm:$0xff]  }
  0x67   : > { %v681_v1 = vrot.slane %v679_v45, 4  ;;  %v684_v40 = vrot.slane %v682_v46, 5  ;;  %v690_v57 = vrot.slane %v688_v48, 5  ;;  %v800_v12 = vrot.slane %v752_v3, 5  ;;  %403 = vst [vmem:[#allocation2 + $0x4c] sm:$0x1] %v402_v16 }
  0x68   : > { %1423 = vrot.lane.b32.xlu1 %v1396_v23, %s1942_s14  ;;  %v705_v17 = vsel %vm2087_vm11, %v700_v63, %v704_v0  ;;  %v796_v19 = vrot.slane %v750_v7, 5  ;;  %v898_v21 = vld [vmem:[#allocation2 + $0x30] sm:$0xf]  ;;  %v1800_v22 = vrot.slane %v753_v9, 9  ;;  %v989_v24 = vshrl.u32 %v900_v13, 16 }
  0x69   : > { %1425 = vrot.lane.b32.xlu0 %v1400_v39, %s1942_s14  ;;  %v685_v56 = vor.u32 %v684_v40, %v681_v1  ;;  %v992_v25 = vshll.u32 %v900_v13, 16  ;;  %v804_v27 = vrot.slane %v754_v20, 5  ;;  %v801_v6 = vsel %vm2071_vm10, %v1799_v11, %v800_v12  ;;  %v843_v39 = vld [vmem:[#allocation2 + $0x28] sm:$0xf]  ;;  %v901_v41 = vld [vmem:[#allocation2 + $0x3c] sm:$0x1] }
  0x6a   : > { %v963_v15 = vrot.slane %v961_v10, 4  ;;  %v966_v26 = vrot.slane %v964_v4, 5  ;;  %v797_v31 = vsel %vm2071_vm10, %v1798_v18, %v796_v19  ;;  %v975_v23 = vshrl.u32 %v898_v21, 16  ;;  %v902_v33 = vld [vmem:[#allocation2 + $0x40] sm:$0xf]  ;;  %v1919_v13 = vld [vmem:[%s2471_s1 + $0x10] sm:$0xff]  }
  0x6b   : > { %v686_v14 = vrot.slane %v685_v56, 4  ;;  %v978_v32 = vshll.u32 %v898_v21, 16  ;;  %v970_v34 = vshll.u32 %v897_v28, 16  ;;  %v991_v35 = vrot.slane %v989_v24, 4  ;;  %v899_v42 = vld [vmem:[#allocation2 + $0x34] sm:$0x1] }
  0x6c   : > { %716 = vrot.lane.b32.xlu1 %v677_v51, %s1936_s8  ;;  %v994_v37 = vrot.slane %v992_v25, 5  ;;  %v805_v38 = vsel %vm2071_vm10, %v1800_v22, %v804_v27  ;;  %v967_v36 = vor.u32 %v966_v26, %v963_v15  ;;  %v977_v43 = vrot.slane %v975_v23, 4  ;;  %v845_v47 = vld [vmem:[#allocation2 + $0x38] sm:$0xf]  ;;  %v844_v49 = vld [vmem:[#allocation2 + $0x30] sm:$0xf] }
  0x6d   : > { %v691_v30 = vsel %vm2087_vm11, %v686_v14, %v690_v57  ;;  %v980_v44 = vrot.slane %v978_v32, 5  ;;  %v1003_v45 = vshrl.u32 %v902_v33, 16  ;;  %v1006_v46 = vshll.u32 %v902_v33, 16  ;;  %v560_v52 = vld [vmem:[#allocation2 + $0x8] sm:$0xf] }
  0x6e   : > { %718 = vrot.lane.b32.xlu0 %v691_v30, %s1936_s8  ;;  %v972_v48 = vrot.slane %v970_v34, 5  ;;  %v995_v1 = vor.u32 %v994_v37, %v991_v35  ;;  %v998_v40 = vshll.u32 %v901_v41, 16  ;;  %v984_v50 = vshll.u32 %v899_v42, 16  ;;  %568 = vst.msk [vmem:[#allocation3 + $0x4] sm:$0xf] %vm332_vm0, %v560_v52  ;;  %v1920_v28 = vld [vmem:[%s2471_s1 + $0x8] sm:$0xff]  }
  0x6f   : > { %v968_v51 = vrot.slane %v967_v36, 4  ;;  %v981_v54 = vor.u32 %v980_v44, %v977_v43  ;;  %v1005_v56 = vrot.slane %v1003_v45, 4  ;;  %v1008_v57 = vrot.slane %v1006_v46, 5  ;;  %v561_v58 = vld [vmem:[#allocation2 + $0x10] sm:$0xf]  ;;  %v1922_v41 = vld [vmem:[%s2471_s1] sm:$0xff]  }
  0x70   : > { %1427 = vrot.lane.b32.xlu1 %v1404_v62, %s1942_s14  ;;  %v562_v59 = vld [vmem:[#allocation2 + $0x18] sm:$0xf]  ;;  %v903_v14 = vld [vmem:[#allocation2 + $0x44] sm:$0x1]  ;;  %569 = vst.msk [vmem:[#allocation3 + $0x8] sm:$0xf] %vm332_vm0, %v561_v58 }
  0x71   : > { %570 = vst.msk [vmem:[#allocation3 + $0xc] sm:$0xf] %vm332_vm0, %v562_v59  ;;  %v1917_v60 = vld [vmem:[%s2471_s1 + $0x20] ss:$0 sps:$4 sm:$0xff]   ;;  %v564_v61 = vld [vmem:[#allocation2 + $0x28] sm:$0xf]  ;;  %v973_v3 = vsel %vm2087_vm11, %v968_v51, %v972_v48  ;;  %v1009_v12 = vor.u32 %v1008_v57, %v1005_v56 }
  0x72   : > { %814 = vrot.lane.b32.xlu0 %v793_v8, %s1935_s7  ;;  %v996_v62 = vrot.slane %v995_v1, 4  ;;  %v1057_v63 = vld [vmem:[#allocation2 + $0x28] sm:$0xe]  ;;  %v1058_v0 = vld [vmem:[#allocation2 + $0x2c] sm:$0x1]  ;;  %vm1531_vm13 = vcmask 1043456  }
  0x73   : > { %572 = vst.msk [vmem:[#allocation3 + $0x14] sm:$0xf] %vm332_vm0, %v564_v61  ;;  %v563_v2 = vld [vmem:[#allocation2 + $0x20] sm:$0xf]  ;;  %v1000_v30 = vrot.slane %v998_v40, 5  ;;  %1898 = vmatprep.subr.msk.bf16.mxu0 %vm1531_vm13, %v1917_v60  ;;  %v1533_v5 = vsel %vm1531_vm13, %v1917_v60, 0  ;;  %1899 = vmatprep.subr.msk.bf16.mxu1 %vm1531_vm13, %v1917_v60 }
  0x74   : > { %720 = vrot.lane.b32.xlu1 %v705_v17, %s1936_s8  ;;  %571 = vst.msk [vmem:[#allocation3 + $0x10] sm:$0xf] %vm332_vm0, %v563_v2  ;;  %v566_v7 = vld [vmem:[#allocation2 + $0x38] sm:$0xf]  ;;  %v565_v8 = vld [vmem:[#allocation2 + $0x30] sm:$0xf]  ;;  %1871 = vmatpush3.bf16.msra.mxu0 %v1533_v5  ;;  %s265_s8 = scalar_lea.vmem %s2475_s5, %s2488_s22 }
  0x75   : > { %v846_v9 = vld [vmem:[#allocation2 + $0x40] sm:$0xf]  ;;  %v982_v10 = vrot.slane %v981_v54, 4  ;;  %v986_v11 = vrot.slane %v984_v50, 5  ;;  %v1012_v4 = vshll.u32 %v903_v14, 16  ;;  %1872 = vmatprep.subr.bf16.mxu0 %v1918_v53  ;;  %1893 = vmatpush3.bf16.msra.mxu1 %v1533_v5  ;;  %v1001_v16 = vsel %vm2087_vm11, %v996_v62, %v1000_v30 }
  0x76   : > { %818 = vrot.lane.b32.xlu0 %v801_v6, %s1935_s7  ;;  %574 = vst.msk [vmem:[#allocation3 + $0x1c] sm:$0xf] %vm332_vm0, %v566_v7  ;;  %573 = vst.msk [vmem:[#allocation3 + $0x18] sm:$0xf] %vm332_vm0, %v565_v8  ;;  %1889 = vmatprep.subr.bf16.mxu1 %v1918_v53  ;;  %v1805_v17 = vrot.slane %v1057_v63, 9  ;;  %v1099_v18 = vrot.slane %v1058_v0, 5 }
  0x77   : > { %v1061_v19 = vld [vmem:[#allocation2 + $0x38] sm:$0xe]  ;;  %v1062_v20 = vld [vmem:[#allocation2 + $0x3c] sm:$0x1]  ;;  %v987_v21 = vsel %vm2087_vm11, %v982_v10, %v986_v11  ;;  %v1010_v22 = vrot.slane %v1009_v12, 4  ;;  %v1014_v24 = vrot.slane %v1012_v4, 5 }
  0x78   : > { %816 = vrot.lane.b32.xlu1 %v797_v31, %s1935_s7  ;;  %v1204_v25 = vld [vmem:[#allocation2 + $0x30] sm:$0xf]  ;;  %1873 = vmatpush3.bf16.msra.mxu0 %v1918_v53  ;;  %v1060_v6 = vld [vmem:[#allocation2 + $0x34] sm:$0x1]  ;;  %v1807_v15 = vrot.slane %v1061_v19, 9  ;;  %v1107_v26 = vrot.slane %v1062_v20, 5  ;;  %v1100_v31 = vsel %vm2071_vm10, %v1805_v17, %v1099_v18 }
  0x79   : > { %v1059_v27 = vld [vmem:[#allocation2 + $0x30] sm:$0xe]  ;;  %1874 = vmatprep.subr.bf16.mxu0 %v1919_v13  ;;  %1894 = vmatpush3.bf16.msra.mxu1 %v1918_v53  ;;  %v1063_v23 = vld [vmem:[#allocation2 + $0x40] sm:$0xe]  ;;  %v1064_v32 = vld [vmem:[#allocation2 + $0x44] sm:$0x1]  ;;  %v1015_v35 = vsel %vm2087_vm11, %v1010_v22, %v1014_v24 }
  0x7a   : > { %863 = vrot.lane.b32.xlu0 %v843_v39, %s1937_s9  ;;  %1890 = vmatprep.subr.bf16.mxu1 %v1919_v13  ;;  %v1269_v33 = vshrl.u32 %v1204_v25, 16  ;;  %v1272_v34 = vshll.u32 %v1204_v25, 16  ;;  %v1806_v37 = vrot.slane %v1059_v27, 9  ;;  %v1208_v39 = vld [vmem:[#allocation2 + $0x40] sm:$0xf]  ;;  %v1808_v42 = vrot.slane %v1063_v23, 9 }
  0x7b   : > { %v1206_v36 = vld [vmem:[#allocation2 + $0x38] sm:$0xf]  ;;  %v1111_v43 = vrot.slane %v1064_v32, 5  ;;  %v1108_v44 = vsel %vm2071_vm10, %v1807_v15, %v1107_v26  ;;  %v1300_v48 = vshll.u32 %v1208_v39, 16  ;;  %v1205_v50 = vld [vmem:[#allocation2 + $0x34] sm:$0x1] }
  0x7c   : > { %820 = vrot.lane.b32.xlu1 %v805_v38, %s1935_s7  ;;  %v1103_v38 = vrot.slane %v1060_v6, 5  ;;  %1875 = vmatpush3.bf16.msra.mxu0 %v1919_v13  ;;  %v1271_v45 = vrot.slane %v1269_v33, 4  ;;  %v1274_v46 = vrot.slane %v1272_v34, 5  ;;  %v1283_v40 = vshrl.u32 %v1206_v36, 16  ;;  %v1210_v51 = vld [vmem:[#allocation2 + $0x48] sm:$0xf] }
  0x7d   : > { %1876 = vmatprep.subr.bf16.mxu0 %v1920_v28  ;;  %1895 = vmatpush3.bf16.msra.mxu1 %v1919_v13  ;;  %v1112_v52 = vsel %vm2071_vm10, %v1808_v42, %v1111_v43  ;;  %v1151_v53 = vld [vmem:[#allocation2 + $0x30] sm:$0xf]  ;;  %v1207_v54 = vld [vmem:[#allocation2 + $0x3c] sm:$0x1]  ;;  %v1278_v57 = vshll.u32 %v1205_v50, 16  ;;  %v1302_v59 = vrot.slane %v1300_v48, 5 }
  0x7e   : > { %867 = vrot.lane.b32.xlu0 %v845_v47, %s1937_s9  ;;  %1891 = vmatprep.subr.bf16.mxu1 %v1920_v28  ;;  %v1297_v47 = vshrl.u32 %v1208_v39, 16  ;;  %v1104_v1 = vsel %vm2071_vm10, %v1806_v37, %v1103_v38  ;;  %v1275_v56 = vor.u32 %v1274_v46, %v1271_v45  ;;  %v1285_v14 = vrot.slane %v1283_v40, 4  ;;  %v1209_v63 = vld [vmem:[#allocation2 + $0x44] sm:$0x1]  ;;  %v1211_v4 = vld [vmem:[#allocation2 + $0x4c] sm:$0x1] }
  0x7f   : > { %v1311_v61 = vshrl.u32 %v1210_v51, 16  ;;  %v1314_v62 = vshll.u32 %v1210_v51, 16  ;;  %v1292_v2 = vshll.u32 %v1207_v54, 16  ;;  %v1280_v5 = vrot.slane %v1278_v57, 5  ;;  %v1154_v13 = vld [vmem:[#allocation2 + $0x48] sm:$0xf] }
  0x80   : > { %865 = vrot.lane.b32.xlu1 %v844_v49, %s1937_s9  ;;  %v1286_v49 = vshll.u32 %v1206_v36, 16  ;;  %1877 = vmatpush3.bf16.msra.mxu0 %v1920_v28  ;;  %v1299_v58 = vrot.slane %v1297_v47, 4  ;;  %v1276_v30 = vrot.slane %v1275_v56, 4  ;;  %v1306_v8 = vshll.u32 %v1209_v63, 16  ;;  %v1365_v25 = vld [vmem:[#allocation2 + $0x30] sm:$0xe] }
  0x81   : > { %1878 = vmatprep.subr.bf16.mxu0 %v1922_v41  ;;  %1896 = vmatpush3.bf16.msra.mxu1 %v1920_v28  ;;  %v1313_v11 = vrot.slane %v1311_v61, 4  ;;  %v1316_v12 = vrot.slane %v1314_v62, 5  ;;  %vm730_vm14 = vcmask 126016   ;;  %vm830_vm15 = vcmask 191616   ;;  %v1366_v27 = vld [vmem:[#allocation2 + $0x34] sm:$0x1] }
  0x82   : > { %1024 = vrot.lane.b32.xlu0 %v973_v3, %s1940_s12  ;;  %1892 = vmatprep.subr.bf16.mxu1 %v1922_v41  ;;  %v1288_v60 = vrot.slane %v1286_v49, 5  ;;  %v1153_v3 = vld [vmem:[#allocation2 + $0x40] sm:$0xf]  ;;  %v1303_v7 = vor.u32 %v1302_v59, %v1299_v58  ;;  %v1281_v17 = vsel %vm2087_vm11, %v1276_v30, %v1280_v5  ;;  %v1308_v19 = vrot.slane %v1306_v8, 5  ;;  %v1370_v33 = vld [vmem:[#allocation2 + $0x44] sm:$0x1] }
  0x83   : > { %v1317_v22 = vor.u32 %v1316_v12, %v1313_v11  ;;  %v1320_v24 = vshll.u32 %v1211_v4, 16  ;;  %v1813_v28 = vrot.slane %v1365_v25, 9  ;;  %v1407_v15 = vrot.slane %v1366_v27, 5  ;;  %v1369_v32 = vld [vmem:[#allocation2 + $0x40] sm:$0xe] }
  0x84   : > { %869 = vrot.lane.b32.xlu1 %v846_v9, %s1937_s9  ;;  %1879 = vmatpush3.bf16.msra.mxu0 %v1922_v41  ;;  %v1152_v9 = vld [vmem:[#allocation2 + $0x38] sm:$0xf]  ;;  %v1289_v10 = vor.u32 %v1288_v60, %v1285_v14  ;;  %v1304_v18 = vrot.slane %v1303_v7, 4  ;;  %vm879_vm2 = vcmask 257216   ;;  %v1815_v38 = vrot.slane %v1369_v32, 9 }
  0x85   : > { %1897 = vmatpush3.bf16.msra.mxu1 %v1922_v41  ;;  %v1322_v23 = vrot.slane %v1320_v24, 5  ;;  %v1367_v34 = vld [vmem:[#allocation2 + $0x38] sm:$0xe]  ;;  %v1408_v37 = vsel %vm2071_vm10, %v1813_v28, %v1407_v15  ;;  %v1415_v39 = vrot.slane %v1370_v33, 5  ;;  %v1371_v45 = vld [vmem:[#allocation2 + $0x48] sm:$0xe] }
  0x86   : > { %1028 = vrot.lane.b32.xlu0 %v1001_v16, %s1940_s12  ;;  %v1294_v16 = vrot.slane %v1292_v2, 5  ;;  %v1309_v6 = vsel %vm2087_vm11, %v1304_v18, %v1308_v19  ;;  %v1814_v41 = vrot.slane %v1367_v34, 9  ;;  %v1372_v46 = vld [vmem:[#allocation2 + $0x4c] sm:$0x1]  ;;  %v1816_v29 = vrot.slane %v1371_v45, 9 }
  0x87   : > { %v1416_v47 = vsel %vm2071_vm10, %v1815_v38, %v1415_v39  ;;  %vm1040_vm3 = vcmask 322816   ;;  %vm1137_vm4 = vcmask 388416   ;;  %vm1187_vm5 = vcmask 454016  }
  0x88   : > { %1026 = vrot.lane.b32.xlu1 %v987_v21, %s1940_s12  ;;  %v1290_v21 = vrot.slane %v1289_v10, 4  ;;  %vm1348_vm6 = vcmask 519616   ;;  %vm1445_vm7 = vcmask 585216   ;;  %vm1518_vm8 = vcmask 588800  }
  0x89   : > { %vm1616_vm9 = vcmask 64512  }
  0x8a   : > { %1121 = vrot.lane.b32.xlu0 %v1100_v31, %s1939_s11  ;;  %v1295_v26 = vsel %vm2087_vm11, %v1290_v21, %v1294_v16  ;;  %v1318_v31 = vrot.slane %v1317_v22, 4 }
  0x8c   : > { %1030 = vrot.lane.b32.xlu1 %v1015_v35, %s1940_s12  ;;  %v1368_v35 = vld [vmem:[#allocation2 + $0x3c] sm:$0x1]  ;;  %v1323_v36 = vsel %vm2087_vm11, %v1318_v31, %v1322_v23 }
  0x8d   : > { %v1411_v42 = vrot.slane %v1368_v35, 5 }
  0x8e   : > { %1125 = vrot.lane.b32.xlu0 %v1108_v44, %s1939_s11 }
  0x8f   : > { %v1412_v48 = vsel %vm2071_vm10, %v1814_v41, %v1411_v42 }
  0x90   : > { %1123 = vrot.lane.b32.xlu1 %v1104_v1, %s1939_s11  ;;  %v1419_v1 = vrot.slane %v1372_v46, 5 }
  0x92   : > { %1171 = vrot.lane.b32.xlu0 %v1151_v53, %s1938_s10  ;;  %v1420_v50 = vsel %vm2071_vm10, %v1816_v29, %v1419_v1 }
  0x93   : > { %v807_v0 = vpop.permute.xlu0 %806 }
  0x94   : > { %1127 = vrot.lane.b32.xlu1 %v1112_v52, %s1939_s11  ;;  %s268_s11 = scalar_lea.vmem %s2476_s6, %s2488_s22 }
  0x96   : > { %1175 = vrot.lane.b32.xlu0 %v1153_v3, %s1938_s10 }
  0x98   : > { %1173 = vrot.lane.b32.xlu1 %v1152_v9, %s1938_s10 }
  0x9a   : > { %v707_v20 = vpop.permute.xlu0 %706  ;;  %1332 = vrot.lane.b32.xlu0 %v1281_v17, %s1941_s13 }
  0x9b   : > { %731 = vst.msk [vmem:[#allocation3] sm:$0xf] %vm730_vm14, %v707_v20 }
  0x9c   : > { %831 = vst.msk [vmem:[#allocation3] sm:$0xf] %vm830_vm15, %v807_v0  ;;  %1177 = vrot.lane.b32.xlu1 %v1154_v13, %s1938_s10 }
  0x9e   : > { %1336 = vrot.lane.b32.xlu0 %v1309_v6, %s1941_s13 }
  0xa0   : > { %1334 = vrot.lane.b32.xlu1 %v1295_v26, %s1941_s13 }
  0xa2   : > { %v858_v43 = vpop.permute.xlu1 %857  ;;  %1429 = vrot.lane.b32.xlu0 %v1408_v37, %s1942_s14 }
  0xa3   : > { %v856_v44 = vpop.permute.xlu0 %855 }
  0xa4   : > { %880 = vst.msk [vmem:[#allocation3] sm:$0xf] %vm879_vm2, %v856_v44  ;;  %1338 = vrot.lane.b32.xlu1 %v1323_v36, %s1941_s13 }
  0xa6   : > { %v862_v40 = vpop.permute.xlu1 %861  ;;  %1433 = vrot.lane.b32.xlu0 %v1416_v47, %s1942_s14 }
  0xa7   : > { %v860_v49 = vpop.permute.xlu0 %859 }
  0xa8   : > { %1431 = vrot.lane.b32.xlu1 %v1412_v48, %s1942_s14 }
  0xaa   : > { %v1166_v51 = vpop.permute.xlu1 %1165 }
  0xab   : > { %v1164_v52 = vpop.permute.xlu0 %1163 }
  0xac   : > { %1435 = vrot.lane.b32.xlu1 %v1420_v50, %s1942_s14 }
  0xae   : > { %v809_v54 = vpop.permute.xlu1 %808 }
  0xaf   : > { %v811_v53 = vpop.permute.xlu0 %810 }
  0xb2   : > { %v813_v57 = vpop.permute.xlu1 %812 }
  0xb3   : > { %v1114_v56 = vpop.permute.xlu0 %1113 }
  0xb6   : > { %v1116_v59 = vpop.permute.xlu1 %1115 }
  0xb7   : > { %v1118_v58 = vpop.permute.xlu0 %1117 }
  0xba   : > { %v1120_v14 = vpop.permute.xlu1 %1119 }
  0xbb   : > { %v709_v60 = vpop.permute.xlu0 %708 }
  0xbc   : > { %732 = vst.msk [vmem:[#allocation3 + $0x4] sm:$0xf] %vm730_vm14, %v709_v60 }
  0xbd   : > { %832 = vst.msk [vmem:[#allocation3 + $0x4] sm:$0xf] %vm830_vm15, %v809_v54 }
  0xbe   : > { %881 = vst.msk [vmem:[#allocation3 + $0x4] sm:$0xf] %vm879_vm2, %v858_v43  ;;  %v711_v55 = vpop.permute.xlu1 %710 }
  0xbf   : > { %v1017_v61 = vpop.permute.xlu0 %1016  ;;  %733 = vst.msk [vmem:[#allocation3 + $0x8] sm:$0xf] %vm730_vm14, %v711_v55 }
  0xc0   : > { %1041 = vst.msk [vmem:[#allocation3] sm:$0xf] %vm1040_vm3, %v1017_v61 }
  0xc1   : > { %833 = vst.msk [vmem:[#allocation3 + $0x8] sm:$0xf] %vm830_vm15, %v811_v53 }
  0xc2   : > { %1138 = vst.msk [vmem:[#allocation3] sm:$0xf] %vm1137_vm4, %v1114_v56  ;;  %v713_v62 = vpop.permute.xlu1 %712 }
  0xc3   : > { %882 = vst.msk [vmem:[#allocation3 + $0x8] sm:$0xf] %vm879_vm2, %v860_v49  ;;  %v1021_v63 = vpop.permute.xlu0 %1020 }
  0xc4   : > { %1188 = vst.msk [vmem:[#allocation3] sm:$0xf] %vm1187_vm5, %v1164_v52 }
  0xc5   : > { %734 = vst.msk [vmem:[#allocation3 + $0xc] sm:$0xf] %vm730_vm14, %v713_v62 }
  0xc6   : > { %1043 = vst.msk [vmem:[#allocation3 + $0x8] sm:$0xf] %vm1040_vm3, %v1021_v63  ;;  %v1019_v0 = vpop.permute.xlu1 %1018 }
  0xc7   : > { %834 = vst.msk [vmem:[#allocation3 + $0xc] sm:$0xf] %vm830_vm15, %v813_v57  ;;  %v1168_v2 = vpop.permute.xlu0 %1167 }
  0xc8   : > { %1140 = vst.msk [vmem:[#allocation3 + $0x8] sm:$0xf] %vm1137_vm4, %v1118_v58 }
  0xc9   : > { %883 = vst.msk [vmem:[#allocation3 + $0xc] sm:$0xf] %vm879_vm2, %v862_v40 }
  0xca   : > { %1042 = vst.msk [vmem:[#allocation3 + $0x4] sm:$0xf] %vm1040_vm3, %v1019_v0  ;;  %v1023_v3 = vpop.permute.xlu1 %1022 }
  0xcb   : > { %1190 = vst.msk [vmem:[#allocation3 + $0x8] sm:$0xf] %vm1187_vm5, %v1168_v2  ;;  %v1325_v30 = vpop.permute.xlu0 %1324 }
  0xcc   : > { %1139 = vst.msk [vmem:[#allocation3 + $0x4] sm:$0xf] %vm1137_vm4, %v1116_v59 }
  0xcd   : > { %1189 = vst.msk [vmem:[#allocation3 + $0x4] sm:$0xf] %vm1187_vm5, %v1166_v51 }
  0xce   : > { %1044 = vst.msk [vmem:[#allocation3 + $0xc] sm:$0xf] %vm1040_vm3, %v1023_v3  ;;  %v1170_v5 = vpop.permute.xlu1 %1169 }
  0xcf   : > { %1349 = vst.msk [vmem:[#allocation3] sm:$0xf] %vm1348_vm6, %v1325_v30  ;;  %v1329_v7 = vpop.permute.xlu0 %1328 }
  0xd0   : > { %1141 = vst.msk [vmem:[#allocation3 + $0xc] sm:$0xf] %vm1137_vm4, %v1120_v14 }
  0xd1   : > { %1191 = vst.msk [vmem:[#allocation3 + $0xc] sm:$0xf] %vm1187_vm5, %v1170_v5 }
  0xd2   : > { %1351 = vst.msk [vmem:[#allocation3 + $0x8] sm:$0xf] %vm1348_vm6, %v1329_v7  ;;  %v1327_v8 = vpop.permute.xlu1 %1326 }
  0xd3   : > { %v1422_v9 = vpop.permute.xlu0 %1421  ;;  %1350 = vst.msk [vmem:[#allocation3 + $0x4] sm:$0xf] %vm1348_vm6, %v1327_v8 }
  0xd4   : > { %1446 = vst.msk [vmem:[#allocation3] sm:$0xf] %vm1445_vm7, %v1422_v9 }
  0xd6   : > { %v1331_v10 = vpop.permute.xlu1 %1330 }
  0xd7   : > { %v715_v11 = vpop.permute.xlu0 %714  ;;  %1352 = vst.msk [vmem:[#allocation3 + $0xc] sm:$0xf] %vm1348_vm6, %v1331_v10 }
  0xd8   : > { %735 = vst.msk [vmem:[#allocation3 + $0x10] sm:$0xf] %vm730_vm14, %v715_v11 }
  0xda   : > { %v1424_v12 = vpop.permute.xlu1 %1423 }
  0xdb   : > { %v1426_v4 = vpop.permute.xlu0 %1425  ;;  %1447 = vst.msk [vmem:[#allocation3 + $0x4] sm:$0xf] %vm1445_vm7, %v1424_v12 }
  0xdc   : > { %1448 = vst.msk [vmem:[#allocation3 + $0x8] sm:$0xf] %vm1445_vm7, %v1426_v4 }
  0xde   : > { %v717_v13 = vpop.permute.xlu1 %716 }
  0xdf   : > { %736 = vst.msk [vmem:[#allocation3 + $0x14] sm:$0xf] %vm730_vm14, %v717_v13 }
  0xe0   : > { %v719_v16 = vpop.permute.xlu0 %718 }
  0xe1   : > { %737 = vst.msk [vmem:[#allocation3 + $0x18] sm:$0xf] %vm730_vm14, %v719_v16 }
  0xe2   : > { %v1428_v17 = vpop.permute.xlu1 %1427  ;;  %v1921_v18 = vld [vmem:[#allocation3] sm:$0xff]  }
  0xe3   : > { %1449 = vst.msk [vmem:[#allocation3 + $0xc] sm:$0xf] %vm1445_vm7, %v1428_v17  ;;  %1880 = vmatprep.mubr.msk.bf16.mxu0 %vm1518_vm8, %v1921_v18 }
  0xe4   : > { %v815_v19 = vpop.permute.xlu0 %814 }
  0xe5   : > { %835 = vst.msk [vmem:[#allocation3 + $0x10] sm:$0xf] %vm830_vm15, %v815_v19 }
  0xe6   : > { %v721_v20 = vpop.permute.xlu1 %720 }
  0xe7   : > { %738 = vst.msk [vmem:[#allocation3 + $0x1c] sm:$0xf] %vm730_vm14, %v721_v20 }
  0xe8   : > { %v819_v21 = vpop.permute.xlu0 %818 }
  0xe9   : > { %837 = vst.msk [vmem:[#allocation3 + $0x18] sm:$0xf] %vm830_vm15, %v819_v21 }
  0xea   : > { %v817_v22 = vpop.permute.xlu1 %816  ;;  %v1923_v24 = vld [vmem:[#allocation3 + $0x8] sm:$0xff]  }
  0xeb   : > { %836 = vst.msk [vmem:[#allocation3 + $0x14] sm:$0xf] %vm830_vm15, %v817_v22  ;;  %1881 = vmatmul.mubr.msk.bf16.vlgmr.msra.gmra.mxu0 %vm1518_vm8, %v1923_v24 }
  0xec   : > { %v864_v25 = vpop.permute.xlu0 %863 }
  0xed   : > { %884 = vst.msk [vmem:[#allocation3 + $0x10] sm:$0xf] %vm879_vm2, %v864_v25 }
  0xee   : > { %v821_v27 = vpop.permute.xlu1 %820 }
  0xef   : > { %838 = vst.msk [vmem:[#allocation3 + $0x1c] sm:$0xf] %vm830_vm15, %v821_v27 }
  0xf0   : > { %v868_v6 = vpop.permute.xlu0 %867 }
  0xf1   : > { %886 = vst.msk [vmem:[#allocation3 + $0x18] sm:$0xf] %vm879_vm2, %v868_v6 }
  0xf2   : > { %v866_v28 = vpop.permute.xlu1 %865 }
  0xf3   : > { %885 = vst.msk [vmem:[#allocation3 + $0x14] sm:$0xf] %vm879_vm2, %v866_v28 }
  0xf4   : > { %v1025_v15 = vpop.permute.xlu0 %1024 }
  0xf5   : > { %1045 = vst.msk [vmem:[#allocation3 + $0x10] sm:$0xf] %vm1040_vm3, %v1025_v15 }
  0xf6   : > { %v870_v26 = vpop.permute.xlu1 %869 }
  0xf7   : > { %887 = vst.msk [vmem:[#allocation3 + $0x1c] sm:$0xf] %vm879_vm2, %v870_v26 }
  0xf8   : > { %v1029_v31 = vpop.permute.xlu0 %1028 }
  0xf9   : > { %1047 = vst.msk [vmem:[#allocation3 + $0x18] sm:$0xf] %vm1040_vm3, %v1029_v31 }
  0xfa   : > { %v1027_v23 = vpop.permute.xlu1 %1026 }
  0xfb   : > { %1046 = vst.msk [vmem:[#allocation3 + $0x14] sm:$0xf] %vm1040_vm3, %v1027_v23 }
  0xfc   : > { %v1122_v32 = vpop.permute.xlu0 %1121 }
  0xfd   : > { %1142 = vst.msk [vmem:[#allocation3 + $0x10] sm:$0xf] %vm1137_vm4, %v1122_v32 }
  0xfe   : > { %v1031_v33 = vpop.permute.xlu1 %1030 }
  0xff   : > { %1048 = vst.msk [vmem:[#allocation3 + $0x1c] sm:$0xf] %vm1040_vm3, %v1031_v33 }
 0x100   : > { %v1126_v34 = vpop.permute.xlu0 %1125 }
 0x101   : > { %1144 = vst.msk [vmem:[#allocation3 + $0x18] sm:$0xf] %vm1137_vm4, %v1126_v34 }
 0x102   : > { %v1124_v35 = vpop.permute.xlu1 %1123 }
 0x103   : > { %1143 = vst.msk [vmem:[#allocation3 + $0x14] sm:$0xf] %vm1137_vm4, %v1124_v35 }
 0x104   : > { %v1172_v37 = vpop.permute.xlu0 %1171 }
 0x105   : > { %1192 = vst.msk [vmem:[#allocation3 + $0x10] sm:$0xf] %vm1187_vm5, %v1172_v37 }
 0x106   : > { %v1128_v38 = vpop.permute.xlu1 %1127 }
 0x107   : > { %1145 = vst.msk [vmem:[#allocation3 + $0x1c] sm:$0xf] %vm1137_vm4, %v1128_v38 }
 0x108   : > { %v1176_v39 = vpop.permute.xlu0 %1175 }
 0x109   : > { %1194 = vst.msk [vmem:[#allocation3 + $0x18] sm:$0xf] %vm1187_vm5, %v1176_v39 }
 0x10a   : > { %v1174_v36 = vpop.permute.xlu1 %1173 }
 0x10b   : > { %1193 = vst.msk [vmem:[#allocation3 + $0x14] sm:$0xf] %vm1187_vm5, %v1174_v36 }
 0x10c   : > { %v1333_v41 = vpop.permute.xlu0 %1332 }
 0x10d   : > { %1353 = vst.msk [vmem:[#allocation3 + $0x10] sm:$0xf] %vm1348_vm6, %v1333_v41 }
 0x10e   : > { %v1178_v42 = vpop.permute.xlu1 %1177 }
 0x10f   : > { %1195 = vst.msk [vmem:[#allocation3 + $0x1c] sm:$0xf] %vm1187_vm5, %v1178_v42 }
 0x110   : > { %v1337_v43 = vpop.permute.xlu0 %1336 }
 0x111   : > { %1355 = vst.msk [vmem:[#allocation3 + $0x18] sm:$0xf] %vm1348_vm6, %v1337_v43 }
 0x112   : > { %v1335_v44 = vpop.permute.xlu1 %1334 }
 0x113   : > { %1354 = vst.msk [vmem:[#allocation3 + $0x14] sm:$0xf] %vm1348_vm6, %v1335_v44 }
 0x114   : > { %v1430_v45 = vpop.permute.xlu0 %1429 }
 0x115   : > { %1450 = vst.msk [vmem:[#allocation3 + $0x10] sm:$0xf] %vm1445_vm7, %v1430_v45 }
 0x116   : > { %v1339_v46 = vpop.permute.xlu1 %1338 }
 0x117   : > { %1356 = vst.msk [vmem:[#allocation3 + $0x1c] sm:$0xf] %vm1348_vm6, %v1339_v46 }
 0x118   : > { %v1434_v47 = vpop.permute.xlu0 %1433 }
 0x119   : > { %1452 = vst.msk [vmem:[#allocation3 + $0x18] sm:$0xf] %vm1445_vm7, %v1434_v47 }
 0x11a   : > { %v1432_v48 = vpop.permute.xlu1 %1431 }
 0x11b   : > { %1451 = vst.msk [vmem:[#allocation3 + $0x14] sm:$0xf] %vm1445_vm7, %v1432_v48 }
 0x11e   : > { %v1436_v29 = vpop.permute.xlu1 %1435 }
 0x11f   : > { %1453 = vst.msk [vmem:[#allocation3 + $0x1c] sm:$0xf] %vm1445_vm7, %v1436_v29 }
 0x122   : > { %v1924_v1 = vld [vmem:[#allocation3 + $0x10] sm:$0xff]  }
 0x123   : > { %1884 = vmatprep.mubr.msk.bf16.mxu1 %vm1518_vm8, %v1924_v1 }
 0x126   : > { %v1925_v40 = vld [vmem:[#allocation3 + $0x18] sm:$0xff]  }
 0x127   : > { %1885 = vmatmul.mubr.msk.bf16.vlgmr.msra.gmra.mxu1 %vm1518_vm8, %v1925_v40 }
 0x1ab   : > { %v1882_v49 = vpop.f32.mrf.mxu0 }
 0x1ac   : > { %v1602_v50 = vpack.c.bf16 %v1882_v49, %v1882_v49  ;;  %v1641_v62 = vmul.f32 %v1882_v49, %v1882_v49  ;;  %v1620_v2 = vsel %vm1616_vm9, %v1882_v49, 0.0 }
 0x1ad   : > { %v1569_v51 = vpop.f32.mrf.mxu0 }
 0x1ae   : > { %1610 = vst.msk [vmem:[%s2423_s30 + $0x8] sm:$0xf] %vm332_vm0, %v1602_v50  ;;  %v1600_v52 = vpack.c.bf16 %v1569_v51, %v1569_v51  ;;  %v1639_v59 = vmul.f32 %v1569_v51, %v1569_v51  ;;  %v1617_v60 = vsel %vm1616_vm9, %v1569_v51, 0.0  ;;  %v1650_v5 = vsel %vm1616_vm9, %v1641_v62, 0.0 }
 0x1af   : > { %v1883_v53 = vpop.f32.mrf.mxu0 }
 0x1b0   : > { %1608 = vst.msk [vmem:[%s2423_s30] sm:$0xf] %vm332_vm0, %v1600_v52  ;;  %v1603_v54 = vpack.c.bf16 %v1883_v53, %v1883_v53  ;;  %v1647_v63 = vsel %vm1616_vm9, %v1639_v59, 0.0  ;;  %v1642_v7 = vmul.f32 %v1883_v53, %v1883_v53  ;;  %v1622_v11 = vsel %vm1616_vm9, %v1883_v53, 0.0 }
 0x1b1   : > { %v1572_v56 = vpop.f32.mrf.mxu0 }
 0x1b2   : > { %1611 = vst.msk [vmem:[%s2423_s30 + $0xc] sm:$0xf] %vm332_vm0, %v1603_v54  ;;  %v1601_v57 = vpack.c.bf16 %v1572_v56, %v1572_v56  ;;  %v1640_v58 = vmul.f32 %v1572_v56, %v1572_v56  ;;  %v1618_v14 = vsel %vm1616_vm9, %v1572_v56, 0.0  ;;  %v1652_v18 = vsel %vm1616_vm9, %v1642_v7, 0.0 }
 0x1b3   : > { %v1619_v61 = vadd.f32 %v1618_v14, %v1617_v60 }
 0x1b4   : > { %1609 = vst.msk [vmem:[%s2423_s30 + $0x4] sm:$0xf] %vm332_vm0, %v1601_v57  ;;  %v1648_v55 = vsel %vm1616_vm9, %v1640_v58, 0.0 }
 0x1b5   : > { %v1649_v0 = vadd.f32 %v1648_v55, %v1647_v63  ;;  %v1621_v3 = vadd.f32 %v1620_v2, %v1619_v61 }
 0x1b7   : > { %v1651_v9 = vadd.f32 %v1650_v5, %v1649_v0  ;;  %v1623_v16 = vadd.f32 %v1622_v11, %v1621_v3 }
 0x1b9   : > { %v1653_v22 = vadd.f32 %v1652_v18, %v1651_v9 }
 0x1e7   : > { %v1886_v30 = vpop.f32.mrf.mxu1 }
 0x1e8   : > { %v1606_v8 = vpack.c.bf16 %v1886_v30, %v1886_v30  ;;  %v1645_v25 = vmul.f32 %v1886_v30, %v1886_v30  ;;  %v1628_v31 = vsel %vm1616_vm9, %v1886_v30, 0.0 }
 0x1e9   : > { %v1585_v10 = vpop.f32.mrf.mxu1 }
 0x1ea   : > { %1614 = vst.msk [vmem:[%s2423_s30 + $0x18] sm:$0xf] %vm332_vm0, %v1606_v8  ;;  %v1604_v12 = vpack.c.bf16 %v1585_v10, %v1585_v10  ;;  %v1624_v4 = vsel %vm1616_vm9, %v1585_v10, 0.0  ;;  %v1643_v13 = vmul.f32 %v1585_v10, %v1585_v10  ;;  %v1658_v35 = vsel %vm1616_vm9, %v1645_v25, 0.0 }
 0x1eb   : > { %v1887_v17 = vpop.f32.mrf.mxu1  ;;  %v1625_v21 = vadd.f32 %v1624_v4, %v1623_v16 }
 0x1ec   : > { %1612 = vst.msk [vmem:[%s2423_s30 + $0x10] sm:$0xf] %vm332_vm0, %v1604_v12  ;;  %v1654_v19 = vsel %vm1616_vm9, %v1643_v13, 0.0  ;;  %v1607_v20 = vpack.c.bf16 %v1887_v17, %v1887_v17  ;;  %v1646_v23 = vmul.f32 %v1887_v17, %v1887_v17  ;;  %v1630_v37 = vsel %vm1616_vm9, %v1887_v17, 0.0 }
 0x1ed   : > { %v1588_v24 = vpop.f32.mrf.mxu1  ;;  %v1655_v15 = vadd.f32 %v1654_v19, %v1653_v22 }
 0x1ee   : > { %1615 = vst.msk [vmem:[%s2423_s30 + $0x1c] sm:$0xf] %vm332_vm0, %v1607_v20  ;;  %v1605_v27 = vpack.c.bf16 %v1588_v24, %v1588_v24  ;;  %v1626_v6 = vsel %vm1616_vm9, %v1588_v24, 0.0  ;;  %v1644_v28 = vmul.f32 %v1588_v24, %v1588_v24  ;;  %v1660_v36 = vsel %vm1616_vm9, %v1646_v23, 0.0 }
 0x1ef   : > { %v1627_v26 = vadd.f32 %v1626_v6, %v1625_v21 }
 0x1f0   : > { %1613 = vst.msk [vmem:[%s2423_s30 + $0x14] sm:$0xf] %vm332_vm0, %v1605_v27  ;;  %v1656_v32 = vsel %vm1616_vm9, %v1644_v28, 0.0 }
 0x1f1   : > { %v1629_v33 = vadd.f32 %v1628_v31, %v1627_v26  ;;  %v1657_v34 = vadd.f32 %v1656_v32, %v1655_v15 }
 0x1f3   : > { %v1631_v38 = vadd.f32 %v1630_v37, %v1629_v33  ;;  %v1659_v39 = vadd.f32 %v1658_v35, %v1657_v34 }
 0x1f5   : > { %v1632_v41 = vrot.slane %v1631_v38, 4  ;;  %v1661_v42 = vadd.f32 %v1660_v36, %v1659_v39 }
 0x1f7   : > { %v1633_v43 = vadd.f32 %v1632_v41, %v1631_v38  ;;  %v1662_v44 = vrot.slane %v1661_v42, 4 }
 0x1f9   : > { %v1634_v45 = vrot.slane %v1633_v43, 2  ;;  %v1663_v46 = vadd.f32 %v1662_v44, %v1661_v42 }
 0x1fb   : > { %v1635_v47 = vadd.f32 %v1634_v45, %v1633_v43  ;;  %v1664_v48 = vrot.slane %v1663_v46, 2 }
 0x1fd   : > { %v1636_v29 = vrot.slane %v1635_v47, 1  ;;  %v1665_v1 = vadd.f32 %v1664_v48, %v1663_v46 }
 0x1ff   : > { %v1637_v40 = vadd.f32 %v1636_v29, %v1635_v47  ;;  %v1666_v49 = vrot.slane %v1665_v1, 1 }
 0x201   : > { %1638 = vst.msk [vmem:[%s265_s8] sm:$0x1] %vm334_vm1, %v1637_v40  ;;  %v1667_v50 = vadd.f32 %v1666_v49, %v1665_v1 }
 0x203   : > { %1668 = vst.msk [vmem:[%s268_s11] sm:$0x1] %vm334_vm1, %v1667_v50 }
 0x204 PF: > { %s17_s21 = sadd.s32 1, %s1932_s21  }
 0x205   : > { %p14_p4 = scmp.ge.s32.totalorder %s17_s21, 4  }
 0x207   :  { %16 = sbr.rel (!%p14_p4) target bundleno = 1 (0x1), region = 93 }

</bundles_post_ra>
